<compile_context>
chip_gen: v7x
topology: tpu7x:2x2x1
jax: 0.10.0
libtpu: 0.0.40
codegen_flags: <defaults>
</compile_context>

<pallas_src>
import functools

import jax
import jax.numpy as jnp
from jax.experimental import pallas as pl
from jax.experimental.pallas import tpu as pltpu


# ----------------------------- activations ---------------------------------
def _hard_sigmoid(v):
    # relu6(x + 3) / 6
    return jnp.clip(v + 3.0, 0.0, 6.0) * (1.0 / 6.0)


def _hard_swish(v):
    return v * _hard_sigmoid(v)


def _act(non_linear):
    return (lambda v: jnp.maximum(v, 0.0)) if non_linear == "RE" else _hard_swish


# ------------------------------- kernel ------------------------------------
def _se_basic_unit_kernel(
    x_ref, w1_ref, wfc1_ref, wfc2_ref, w3_ref, slab_ref,
    out_ref, pad_ref,
    *, kernel_size, padding, non_linear):
    act = _act(non_linear)

    B, H, W, C = x_ref.shape
    E = w1_ref.shape[1]
    E4 = wfc1_ref.shape[1]
    K, P = kernel_size, padding
    HW = H * W
    Hp, Wp = H + 2 * P, W + 2 * P

    # Packed per-channel parameters (single slab input, sliced in-kernel).
    b1 = slab_ref[0:1, :E]                                  # (1, E)
    b2 = slab_ref[1:2, :E].reshape(1, 1, 1, E)
    bfc1 = slab_ref[2:3, :E4]                               # (1, E/4)
    bfc2 = slab_ref[3:4, :E]
    b3 = slab_ref[4:5, :C]

    x = x_ref[...].astype(jnp.float32)                      # (B, H, W, C)

    # --- conv1: 1x1 pointwise (BN folded) + act; bf16 operands, f32 accumulate.
    a1 = jnp.dot(x.reshape(B * HW, C).astype(jnp.bfloat16), w1_ref[...],
                 preferred_element_type=jnp.float32)
    a1 = act(a1 + b1).reshape(B, H, W, E)

    # --- conv2: depthwise KxK, stride 1 (BN folded) + act.
    # Zero only the halo of the padded scratch (not the whole buffer).  This is
    # done every step (NOT gated on program_id): with a "parallel" grid each
    # TensorCore has its own scratch that must be initialised.
    pad_ref[:, 0:P, :, :] = jnp.zeros((B, P, Wp, E), jnp.float32)
    pad_ref[:, H + P:Hp, :, :] = jnp.zeros((B, P, Wp, E), jnp.float32)
    pad_ref[:, P:H + P, 0:P, :] = jnp.zeros((B, H, P, E), jnp.float32)
    pad_ref[:, P:H + P, W + P:Wp, :] = jnp.zeros((B, H, P, E), jnp.float32)
    pad_ref[:, P:H + P, P:W + P, :] = a1

    acc = jnp.zeros((B, H, W, E), jnp.float32)
    for kw in range(K):
        # One sublane-offset load per kw column; the kh shifts below are free
        # slices along the untiled H axis (no relayout, no extra VMEM traffic).
        col = pad_ref[:, :, kw:kw + W, :]                   # (B, Hp, W, E)
        for kh in range(K):
            r = 5 + kh * K + kw
            tap = slab_ref[r:r + 1, :E].reshape(1, 1, 1, E)
            acc = acc + col[:, kh:kh + H, :, :] * tap
    a2 = act(acc + b2)                                      # (B, H, W, E)

    # --- Squeeze-and-Excite: global avg pool -> fc1 -> relu -> fc2 -> hsigmoid.
    # M=B matmuls: kept as plain dots (tiny; MXU gives no real help here).
    pooled = jnp.mean(a2.reshape(B, HW, E), axis=1)         # (B, E)
    h = jnp.maximum(
        jnp.dot(pooled, wfc1_ref[...], preferred_element_type=jnp.float32)
        + bfc1, 0.0)                                        # (B, E/4)
    gate = _hard_sigmoid(
        jnp.dot(h, wfc2_ref[...], preferred_element_type=jnp.float32)
        + bfc2)                                             # (B, E)
    a3 = a2 * gate.reshape(B, 1, 1, E)

    # --- conv3: 1x1 pointwise (BN folded), then residual add.
    y = jnp.dot(a3.reshape(B * HW, E).astype(jnp.bfloat16), w3_ref[...],
                preferred_element_type=jnp.float32)
    y = (y + b3).reshape(B, H, W, C) + x
    out_ref[...] = y.astype(out_ref.dtype)


# ------------------------------- wrapper ------------------------------------
def _rep_spec(shape):
    """Grid-invariant BlockSpec handing the kernel the full array."""
    zeros = (0,) * len(shape)
    return pl.BlockSpec(shape, lambda n, _z=zeros: _z)


def _round_up(v, m):
    return -(-v // m) * m


def _pick_batch_block(n):
    """Images per grid step.

    Single-TC chips (v5e/v6e): fold the whole batch into one grid step so the
    pointwise matmuls see M = N*H*W and per-step pipeline overhead is paid once.
    2-TC chips (v4/v5p megacore, v7x): keep two parallel grid steps so both
    TensorCores get work.
    """
    try:
        kind = jax.devices()[0].device_kind.lower()
    except Exception:
        kind = ""
    two_tc = any(tag in kind for tag in ("v4", "v5p", "v7"))
    if two_tc and n >= 2 and n % 2 == 0:
        return n // 2
    return n


def _pack_slab(p, kernel_size):
    """Pack all per-channel biases and the depthwise taps into one f32 slab."""
    E = p["w1"].shape[1]
    C = p["w3"].shape[1]
    E4 = p["wfc1"].shape[1]
    K = kernel_size
    lanes = _round_up(max(E, C, E4), 128)
    rows = _round_up(5 + K * K, 8)
    slab = jnp.zeros((rows, lanes), jnp.float32)
    slab = slab.at[0, :E].set(p["b1"])
    slab = slab.at[1, :E].set(p["b2"])
    slab = slab.at[2, :E4].set(p["bfc1"])
    slab = slab.at[3, :E].set(p["bfc2"])
    slab = slab.at[4, :C].set(p["b3"])
    slab = slab.at[5:5 + K * K, :E].set(p["wdw"])           # (K*K, E) taps
    return slab


def se_basic_unit(x, p, *, kernel_size, non_linear, batch_block=None):
    N, H, W, C = x.shape
    E = p["w1"].shape[1]
    padding = 1 if kernel_size == 3 else 2

    bb = _pick_batch_block(N) if batch_block is None else batch_block
    assert N % bb == 0, "batch must be divisible by the batch block"
    grid = (N // bb,)

    slab = _pack_slab(p, kernel_size)
    w1 = p["w1"].astype(jnp.bfloat16)                       # bf16 MXU operands
    w3 = p["w3"].astype(jnp.bfloat16)
    wfc1 = p["wfc1"].astype(jnp.float32)
    wfc2 = p["wfc2"].astype(jnp.float32)

    kernel = functools.partial(
        _se_basic_unit_kernel,
        kernel_size=kernel_size, padding=padding, non_linear=non_linear)

    # VMEM budget: x/out blocks (double-buffered) + padded depthwise scratch.
    # For production MobileNetV3 shapes (H=W=56..112, E=240..960) on v7x
    # (64 MiB VMEM) tile over H rows with a 2*padding halo instead of
    # whole-image blocks; at these sizes whole-image blocks fit easily.
    blk = bb * H * W * C * 4
    scratch = bb * (H + 2 * padding) * (W + 2 * padding) * E * 4
    vmem_limit = max(32 * 1024 * 1024, 2 * (2 * 2 * blk + scratch))

    in_specs = [
        pl.BlockSpec((bb, H, W, C), lambda n: (n, 0, 0, 0)),
        _rep_spec(w1.shape), _rep_spec(wfc1.shape), _rep_spec(wfc2.shape),
        _rep_spec(w3.shape), _rep_spec(slab.shape),
    ]

    return pl.pallas_call(
        kernel,
        out_shape=jax.ShapeDtypeStruct((N, H, W, C), x.dtype),
        grid_spec=pltpu.PrefetchScalarGridSpec(
            num_scalar_prefetch=0,
            grid=grid,
            in_specs=in_specs,
            out_specs=pl.BlockSpec((bb, H, W, C), lambda n: (n, 0, 0, 0)),
            scratch_shapes=[
                pltpu.VMEM((bb, H + 2 * padding, W + 2 * padding, E),
                           jnp.float32)
            ],
        ),
        compiler_params=pltpu.CompilerParams(
            dimension_semantics=("parallel",),
            vmem_limit_bytes=vmem_limit),
    )(x, w1, wfc1, wfc2, w3, slab)


# ----------------------- deterministic parameter init -----------------------
def init_params(key, in_channels, exp_size, kernel_size):
    """Random SEBasicUnit params with eval-mode Conv+BN already folded.

    Returned weights have the BN scale folded in (output-channel on the last
    axis) and a single per-channel bias per conv.
    """
    C, E = in_channels, exp_size
    E4 = int(E * 0.25)
    K = kernel_size
    keys = iter(jax.random.split(key, 32))
    eps = 1e-5

    def rnd(shape, scale=0.1):
        return (scale * jax.random.normal(next(keys), shape)).astype(jnp.float32)

    def conv_bn_fold(w, conv_bias, ch):
        # w has the output channel as its LAST axis.
        gamma = 1.0 + rnd((ch,), 0.05)
        beta = rnd((ch,), 0.05)
        mean = rnd((ch,), 0.05)
        var = jnp.abs(rnd((ch,), 0.05)) + 1.0
        scale = gamma / jnp.sqrt(var + eps)
        return w * scale, (conv_bias - mean) * scale + beta

    # conv1 (1x1, C -> E): PyTorch weight (E, C, 1, 1) -> (C, E)
    w1, b1 = conv_bn_fold(rnd((C, E)), rnd((E,)), E)
    # conv2 depthwise (KxK, groups=E): PyTorch weight (E, 1, K, K) -> (K*K, E)
    wdw, b2 = conv_bn_fold(rnd((K * K, E)), rnd((E,)), E)
    # SE fc1 (1x1, E -> E/4) and fc2 (1x1, E/4 -> E), biases kept explicit.
    wfc1 = rnd((E, E4))
    bfc1 = rnd((E4,))
    wfc2 = rnd((E4, E))
    bfc2 = rnd((E,))
    # conv3 (1x1, E -> C)
    w3, b3 = conv_bn_fold(rnd((E, C)), rnd((C,)), C)

    return dict(w1=w1, b1=b1, wdw=wdw, b2=b2, wfc1=wfc1, bfc1=bfc1,
                wfc2=wfc2, bfc2=bfc2, w3=w3, b3=b3)


# ----------------------------- pure-JAX reference ---------------------------
def reference(x, p, *, kernel_size, non_linear):
    """Same math and precision policy (bf16 pointwise-conv operands, f32 acc)."""
    act = _act(non_linear)
    N, H, W, C = x.shape
    K = kernel_size
    pad = 1 if K == 3 else 2
    w1 = p["w1"].astype(jnp.bfloat16)
    w3 = p["w3"].astype(jnp.bfloat16)

    a1 = act(jnp.einsum("nhwc,ce->nhwe", x.astype(jnp.bfloat16), w1,
                        preferred_element_type=jnp.float32) + p["b1"])
    a1p = jnp.pad(a1, ((0, 0), (pad, pad), (pad, pad), (0, 0)))
    acc = jnp.zeros_like(a1)
    for kh in range(K):
        for kw in range(K):
            acc = acc + a1p[:, kh:kh + H, kw:kw + W, :] * p["wdw"][kh * K + kw]
    a2 = act(acc + p["b2"])
    pooled = a2.mean(axis=(1, 2))                                    # (N, E)
    h = jnp.maximum(pooled @ p["wfc1"] + p["bfc1"], 0.0)
    gate = _hard_sigmoid(h @ p["wfc2"] + p["bfc2"])                  # (N, E)
    a3 = a2 * gate[:, None, None, :]
    y = jnp.einsum("nhwe,ec->nhwc", a3.astype(jnp.bfloat16), w3,
                   preferred_element_type=jnp.float32) + p["b3"]
    return y + x


# --------------------------------- main --------------------------------------
if __name__ == "__main__":
    # SEBasicUnit(in_channels=16, out_channels=16, exp_size=32, kernel_size=3, 'HS')
    N, H, W, C = 2, 16, 16, 16
    E, KS, NL = 32, 3, "HS"

    key = jax.random.PRNGKey(0)
    kx, kp = jax.random.split(key)
    x = jax.random.normal(kx, (N, H, W, C), jnp.float32)
    params = init_params(kp, C, E, KS)

    out = se_basic_unit(x, params, kernel_size=KS, non_linear=NL)
    out = jax.block_until_ready(out)

    ref = jax.block_until_ready(reference(x, params, kernel_size=KS, non_linear=NL))
    assert out.shape == (N, H, W, C)
    max_err = float(jnp.max(jnp.abs(out - ref)))
    assert jnp.allclose(out, ref, atol=5e-3, rtol=5e-3), max_err

    print("KERNEL_OK")
</pallas_src>

<mosaic_0001>
module attributes {stable_mosaic.version = 11 : i64} {
  func.func @_se_basic_unit_kernel(%arg0: i32, %arg1: memref<2x16x16x16xf32, #tpu.memory_space<vmem>>, %arg2: memref<16x32xbf16, #tpu.memory_space<vmem>>, %arg3: memref<32x8xf32, #tpu.memory_space<vmem>>, %arg4: memref<8x32xf32, #tpu.memory_space<vmem>>, %arg5: memref<32x16xbf16, #tpu.memory_space<vmem>>, %arg6: memref<16x128xf32, #tpu.memory_space<vmem>>, %arg7: memref<2x16x16x16xf32, #tpu.memory_space<vmem>>, %arg8: memref<2x18x18x32xf32, #tpu.memory_space<vmem>>) attributes {dimension_semantics = [#tpu.dimension_semantics<parallel>], iteration_bounds = array<i64: 1>, scalar_prefetch = 0 : i64, scratch_operands = 1 : i64, tpu.core_type = #tpu.core_type<tc>, window_params = [{transform_indices = @transform_0, window_bounds = array<i64: 2, 16, 16, 16>}, {pipeline_mode = #tpu.pipeline_mode<synchronous>, transform_indices = @transform_1, window_bounds = array<i64: 16, 32>}, {pipeline_mode = #tpu.pipeline_mode<synchronous>, transform_indices = @transform_2, window_bounds = array<i64: 32, 8>}, {pipeline_mode = #tpu.pipeline_mode<synchronous>, transform_indices = @transform_3, window_bounds = array<i64: 8, 32>}, {pipeline_mode = #tpu.pipeline_mode<synchronous>, transform_indices = @transform_4, window_bounds = array<i64: 32, 16>}, {pipeline_mode = #tpu.pipeline_mode<synchronous>, transform_indices = @transform_5, window_bounds = array<i64: 16, 128>}, {transform_indices = @transform_6, window_bounds = array<i64: 2, 16, 16, 16>}]} {
    %c0 = arith.constant 0 : index
    %c0_0 = arith.constant 0 : index
    %0 = vector.load %arg6[%c0, %c0_0] : memref<16x128xf32, #tpu.memory_space<vmem>>, vector<1x32xf32>
    %c1 = arith.constant 1 : index
    %c0_1 = arith.constant 0 : index
    %1 = vector.load %arg6[%c1, %c0_1] : memref<16x128xf32, #tpu.memory_space<vmem>>, vector<1x32xf32>
    %2 = vector.shape_cast %1 : vector<1x32xf32> to vector<1x1x1x32xf32>
    %c2 = arith.constant 2 : index
    %c0_2 = arith.constant 0 : index
    %3 = vector.load %arg6[%c2, %c0_2] : memref<16x128xf32, #tpu.memory_space<vmem>>, vector<1x8xf32>
    %c3 = arith.constant 3 : index
    %c0_3 = arith.constant 0 : index
    %4 = vector.load %arg6[%c3, %c0_3] : memref<16x128xf32, #tpu.memory_space<vmem>>, vector<1x32xf32>
    %c4 = arith.constant 4 : index
    %c0_4 = arith.constant 0 : index
    %5 = vector.load %arg6[%c4, %c0_4] : memref<16x128xf32, #tpu.memory_space<vmem>>, vector<1x16xf32>
    %c0_5 = arith.constant 0 : index
    %c0_6 = arith.constant 0 : index
    %c0_7 = arith.constant 0 : index
    %c0_8 = arith.constant 0 : index
    %6 = vector.load %arg1[%c0_5, %c0_6, %c0_7, %c0_8] : memref<2x16x16x16xf32, #tpu.memory_space<vmem>>, vector<2x16x16x16xf32>
    %7 = vector.shape_cast %6 : vector<2x16x16x16xf32> to vector<512x16xf32>
    %8 = arith.truncf %7 : vector<512x16xf32> to vector<512x16xbf16>
    %c0_9 = arith.constant 0 : index
    %c0_10 = arith.constant 0 : index
    %9 = vector.load %arg2[%c0_9, %c0_10] : memref<16x32xbf16, #tpu.memory_space<vmem>>, vector<16x32xbf16>
    %cst = arith.constant dense<0.000000e+00> : vector<512x32xf32>
    %10 = tpu.matmul %8, %9, %cst {dimension_numbers = #tpu.dot_dimension_numbers<[1], [0], [0], [1], [0, 0, 1, 1], [], []>} : vector<512x16xbf16>, vector<16x32xbf16>, vector<512x32xf32> -> vector<512x32xf32>
    %11 = vector.broadcast %0 : vector<1x32xf32> to vector<512x32xf32>
    %12 = arith.addf %10, %11 : vector<512x32xf32>
    %cst_11 = arith.constant 3.000000e+00 : f32
    %13 = vector.broadcast %cst_11 : f32 to vector<512x32xf32>
    %14 = arith.addf %12, %13 : vector<512x32xf32>
    %cst_12 = arith.constant 0.000000e+00 : f32
    %cst_13 = arith.constant 6.000000e+00 : f32
    %15 = vector.broadcast %cst_12 : f32 to vector<512x32xf32>
    %16 = arith.maximumf %15, %14 : vector<512x32xf32>
    %17 = vector.broadcast %cst_13 : f32 to vector<512x32xf32>
    %18 = arith.minimumf %17, %16 : vector<512x32xf32>
    %cst_14 = arith.constant 0.166666672 : f32
    %19 = vector.broadcast %cst_14 : f32 to vector<512x32xf32>
    %20 = arith.mulf %18, %19 : vector<512x32xf32>
    %21 = arith.mulf %12, %20 : vector<512x32xf32>
    %22 = vector.shape_cast %21 : vector<512x32xf32> to vector<2x16x16x32xf32>
    %cst_15 = arith.constant 0.000000e+00 : f32
    %23 = vector.broadcast %cst_15 : f32 to vector<2x1x18x32xf32>
    %c0_16 = arith.constant 0 : index
    %c0_17 = arith.constant 0 : index
    %c0_18 = arith.constant 0 : index
    %c0_19 = arith.constant 0 : index
    %24 = vector.load %arg8[%c0_16, %c0_17, %c0_18, %c0_19] : memref<2x18x18x32xf32, #tpu.memory_space<vmem>>, vector<2x1x18x32xf32>
    tpu.vector_store %arg8[%c0_16, %c0_17, %c0_18, %c0_19], %23 {strides = array<i32>} : memref<2x18x18x32xf32, #tpu.memory_space<vmem>>, vector<2x1x18x32xf32>,
    %cst_20 = arith.constant 0.000000e+00 : f32
    %25 = vector.broadcast %cst_20 : f32 to vector<2x1x18x32xf32>
    %c0_21 = arith.constant 0 : index
    %c17 = arith.constant 17 : index
    %c0_22 = arith.constant 0 : index
    %c0_23 = arith.constant 0 : index
    %26 = vector.load %arg8[%c0_21, %c17, %c0_22, %c0_23] : memref<2x18x18x32xf32, #tpu.memory_space<vmem>>, vector<2x1x18x32xf32>
    tpu.vector_store %arg8[%c0_21, %c17, %c0_22, %c0_23], %25 {strides = array<i32>} : memref<2x18x18x32xf32, #tpu.memory_space<vmem>>, vector<2x1x18x32xf32>,
    %cst_24 = arith.constant 0.000000e+00 : f32
    %27 = vector.broadcast %cst_24 : f32 to vector<2x16x1x32xf32>
    %c0_25 = arith.constant 0 : index
    %c1_26 = arith.constant 1 : index
    %c0_27 = arith.constant 0 : index
    %c0_28 = arith.constant 0 : index
    %28 = vector.load %arg8[%c0_25, %c1_26, %c0_27, %c0_28] : memref<2x18x18x32xf32, #tpu.memory_space<vmem>>, vector<2x16x1x32xf32>
    tpu.vector_store %arg8[%c0_25, %c1_26, %c0_27, %c0_28], %27 {strides = array<i32>} : memref<2x18x18x32xf32, #tpu.memory_space<vmem>>, vector<2x16x1x32xf32>,
    %cst_29 = arith.constant 0.000000e+00 : f32
    %29 = vector.broadcast %cst_29 : f32 to vector<2x16x1x32xf32>
    %c0_30 = arith.constant 0 : index
    %c1_31 = arith.constant 1 : index
    %c17_32 = arith.constant 17 : index
    %c0_33 = arith.constant 0 : index
    %30 = vector.load %arg8[%c0_30, %c1_31, %c17_32, %c0_33] : memref<2x18x18x32xf32, #tpu.memory_space<vmem>>, vector<2x16x1x32xf32>
    tpu.vector_store %arg8[%c0_30, %c1_31, %c17_32, %c0_33], %29 {strides = array<i32>} : memref<2x18x18x32xf32, #tpu.memory_space<vmem>>, vector<2x16x1x32xf32>,
    %c0_34 = arith.constant 0 : index
    %c1_35 = arith.constant 1 : index
    %c1_36 = arith.constant 1 : index
    %c0_37 = arith.constant 0 : index
    %31 = vector.load %arg8[%c0_34, %c1_35, %c1_36, %c0_37] : memref<2x18x18x32xf32, #tpu.memory_space<vmem>>, vector<2x16x16x32xf32>
    tpu.vector_store %arg8[%c0_34, %c1_35, %c1_36, %c0_37], %22 {strides = array<i32>} : memref<2x18x18x32xf32, #tpu.memory_space<vmem>>, vector<2x16x16x32xf32>,
    %cst_38 = arith.constant 0.000000e+00 : f32
    %32 = vector.broadcast %cst_38 : f32 to vector<2x16x16x32xf32>
    %c0_39 = arith.constant 0 : index
    %c0_40 = arith.constant 0 : index
    %c0_41 = arith.constant 0 : index
    %c0_42 = arith.constant 0 : index
    %33 = vector.load %arg8[%c0_39, %c0_40, %c0_41, %c0_42] : memref<2x18x18x32xf32, #tpu.memory_space<vmem>>, vector<2x18x16x32xf32>
    %c5 = arith.constant 5 : index
    %c0_43 = arith.constant 0 : index
    %34 = vector.load %arg6[%c5, %c0_43] : memref<16x128xf32, #tpu.memory_space<vmem>>, vector<1x32xf32>
    %35 = vector.shape_cast %34 : vector<1x32xf32> to vector<1x1x1x32xf32>
    %36 = vector.extract_strided_slice %33 {offsets = [0, 0, 0, 0], sizes = [2, 16, 16, 32], strides = [1, 1, 1, 1]} : vector<2x18x16x32xf32> to vector<2x16x16x32xf32>
    %37 = vector.broadcast %35 : vector<1x1x1x32xf32> to vector<2x16x16x32xf32>
    %38 = arith.mulf %36, %37 : vector<2x16x16x32xf32>
    %39 = arith.addf %32, %38 : vector<2x16x16x32xf32>
    %c8 = arith.constant 8 : index
    %c0_44 = arith.constant 0 : index
    %40 = vector.load %arg6[%c8, %c0_44] : memref<16x128xf32, #tpu.memory_space<vmem>>, vector<1x32xf32>
    %41 = vector.shape_cast %40 : vector<1x32xf32> to vector<1x1x1x32xf32>
    %42 = vector.extract_strided_slice %33 {offsets = [0, 1, 0, 0], sizes = [2, 16, 16, 32], strides = [1, 1, 1, 1]} : vector<2x18x16x32xf32> to vector<2x16x16x32xf32>
    %43 = vector.broadcast %41 : vector<1x1x1x32xf32> to vector<2x16x16x32xf32>
    %44 = arith.mulf %42, %43 : vector<2x16x16x32xf32>
    %45 = arith.addf %39, %44 : vector<2x16x16x32xf32>
    %c11 = arith.constant 11 : index
    %c0_45 = arith.constant 0 : index
    %46 = vector.load %arg6[%c11, %c0_45] : memref<16x128xf32, #tpu.memory_space<vmem>>, vector<1x32xf32>
    %47 = vector.shape_cast %46 : vector<1x32xf32> to vector<1x1x1x32xf32>
    %48 = vector.extract_strided_slice %33 {offsets = [0, 2, 0, 0], sizes = [2, 16, 16, 32], strides = [1, 1, 1, 1]} : vector<2x18x16x32xf32> to vector<2x16x16x32xf32>
    %49 = vector.broadcast %47 : vector<1x1x1x32xf32> to vector<2x16x16x32xf32>
    %50 = arith.mulf %48, %49 : vector<2x16x16x32xf32>
    %51 = arith.addf %45, %50 : vector<2x16x16x32xf32>
    %c0_46 = arith.constant 0 : index
    %c0_47 = arith.constant 0 : index
    %c1_48 = arith.constant 1 : index
    %c0_49 = arith.constant 0 : index
    %52 = vector.load %arg8[%c0_46, %c0_47, %c1_48, %c0_49] : memref<2x18x18x32xf32, #tpu.memory_space<vmem>>, vector<2x18x16x32xf32>
    %c6 = arith.constant 6 : index
    %c0_50 = arith.constant 0 : index
    %53 = vector.load %arg6[%c6, %c0_50] : memref<16x128xf32, #tpu.memory_space<vmem>>, vector<1x32xf32>
    %54 = vector.shape_cast %53 : vector<1x32xf32> to vector<1x1x1x32xf32>
    %55 = vector.extract_strided_slice %52 {offsets = [0, 0, 0, 0], sizes = [2, 16, 16, 32], strides = [1, 1, 1, 1]} : vector<2x18x16x32xf32> to vector<2x16x16x32xf32>
    %56 = vector.broadcast %54 : vector<1x1x1x32xf32> to vector<2x16x16x32xf32>
    %57 = arith.mulf %55, %56 : vector<2x16x16x32xf32>
    %58 = arith.addf %51, %57 : vector<2x16x16x32xf32>
    %c9 = arith.constant 9 : index
    %c0_51 = arith.constant 0 : index
    %59 = vector.load %arg6[%c9, %c0_51] : memref<16x128xf32, #tpu.memory_space<vmem>>, vector<1x32xf32>
    %60 = vector.shape_cast %59 : vector<1x32xf32> to vector<1x1x1x32xf32>
    %61 = vector.extract_strided_slice %52 {offsets = [0, 1, 0, 0], sizes = [2, 16, 16, 32], strides = [1, 1, 1, 1]} : vector<2x18x16x32xf32> to vector<2x16x16x32xf32>
    %62 = vector.broadcast %60 : vector<1x1x1x32xf32> to vector<2x16x16x32xf32>
    %63 = arith.mulf %61, %62 : vector<2x16x16x32xf32>
    %64 = arith.addf %58, %63 : vector<2x16x16x32xf32>
    %c12 = arith.constant 12 : index
    %c0_52 = arith.constant 0 : index
    %65 = vector.load %arg6[%c12, %c0_52] : memref<16x128xf32, #tpu.memory_space<vmem>>, vector<1x32xf32>
    %66 = vector.shape_cast %65 : vector<1x32xf32> to vector<1x1x1x32xf32>
    %67 = vector.extract_strided_slice %52 {offsets = [0, 2, 0, 0], sizes = [2, 16, 16, 32], strides = [1, 1, 1, 1]} : vector<2x18x16x32xf32> to vector<2x16x16x32xf32>
    %68 = vector.broadcast %66 : vector<1x1x1x32xf32> to vector<2x16x16x32xf32>
    %69 = arith.mulf %67, %68 : vector<2x16x16x32xf32>
    %70 = arith.addf %64, %69 : vector<2x16x16x32xf32>
    %c0_53 = arith.constant 0 : index
    %c0_54 = arith.constant 0 : index
    %c2_55 = arith.constant 2 : index
    %c0_56 = arith.constant 0 : index
    %71 = vector.load %arg8[%c0_53, %c0_54, %c2_55, %c0_56] : memref<2x18x18x32xf32, #tpu.memory_space<vmem>>, vector<2x18x16x32xf32>
    %c7 = arith.constant 7 : index
    %c0_57 = arith.constant 0 : index
    %72 = vector.load %arg6[%c7, %c0_57] : memref<16x128xf32, #tpu.memory_space<vmem>>, vector<1x32xf32>
    %73 = vector.shape_cast %72 : vector<1x32xf32> to vector<1x1x1x32xf32>
    %74 = vector.extract_strided_slice %71 {offsets = [0, 0, 0, 0], sizes = [2, 16, 16, 32], strides = [1, 1, 1, 1]} : vector<2x18x16x32xf32> to vector<2x16x16x32xf32>
    %75 = vector.broadcast %73 : vector<1x1x1x32xf32> to vector<2x16x16x32xf32>
    %76 = arith.mulf %74, %75 : vector<2x16x16x32xf32>
    %77 = arith.addf %70, %76 : vector<2x16x16x32xf32>
    %c10 = arith.constant 10 : index
    %c0_58 = arith.constant 0 : index
    %78 = vector.load %arg6[%c10, %c0_58] : memref<16x128xf32, #tpu.memory_space<vmem>>, vector<1x32xf32>
    %79 = vector.shape_cast %78 : vector<1x32xf32> to vector<1x1x1x32xf32>
    %80 = vector.extract_strided_slice %71 {offsets = [0, 1, 0, 0], sizes = [2, 16, 16, 32], strides = [1, 1, 1, 1]} : vector<2x18x16x32xf32> to vector<2x16x16x32xf32>
    %81 = vector.broadcast %79 : vector<1x1x1x32xf32> to vector<2x16x16x32xf32>
    %82 = arith.mulf %80, %81 : vector<2x16x16x32xf32>
    %83 = arith.addf %77, %82 : vector<2x16x16x32xf32>
    %c13 = arith.constant 13 : index
    %c0_59 = arith.constant 0 : index
    %84 = vector.load %arg6[%c13, %c0_59] : memref<16x128xf32, #tpu.memory_space<vmem>>, vector<1x32xf32>
    %85 = vector.shape_cast %84 : vector<1x32xf32> to vector<1x1x1x32xf32>
    %86 = vector.extract_strided_slice %71 {offsets = [0, 2, 0, 0], sizes = [2, 16, 16, 32], strides = [1, 1, 1, 1]} : vector<2x18x16x32xf32> to vector<2x16x16x32xf32>
    %87 = vector.broadcast %85 : vector<1x1x1x32xf32> to vector<2x16x16x32xf32>
    %88 = arith.mulf %86, %87 : vector<2x16x16x32xf32>
    %89 = arith.addf %83, %88 : vector<2x16x16x32xf32>
    %90 = vector.broadcast %2 : vector<1x1x1x32xf32> to vector<2x16x16x32xf32>
    %91 = arith.addf %89, %90 : vector<2x16x16x32xf32>
    %cst_60 = arith.constant 3.000000e+00 : f32
    %92 = vector.broadcast %cst_60 : f32 to vector<2x16x16x32xf32>
    %93 = arith.addf %91, %92 : vector<2x16x16x32xf32>
    %cst_61 = arith.constant 0.000000e+00 : f32
    %cst_62 = arith.constant 6.000000e+00 : f32
    %94 = vector.broadcast %cst_61 : f32 to vector<2x16x16x32xf32>
    %95 = arith.maximumf %94, %93 : vector<2x16x16x32xf32>
    %96 = vector.broadcast %cst_62 : f32 to vector<2x16x16x32xf32>
    %97 = arith.minimumf %96, %95 : vector<2x16x16x32xf32>
    %cst_63 = arith.constant 0.166666672 : f32
    %98 = vector.broadcast %cst_63 : f32 to vector<2x16x16x32xf32>
    %99 = arith.mulf %97, %98 : vector<2x16x16x32xf32>
    %100 = arith.mulf %91, %99 : vector<2x16x16x32xf32>
    %101 = vector.shape_cast %100 : vector<2x16x16x32xf32> to vector<2x256x32xf32>
    %cst_64 = arith.constant dense<0.000000e+00> : vector<2x32xf32>
    %102 = vector.multi_reduction <add>, %101, %cst_64 [1] : vector<2x256x32xf32> to vector<2x32xf32>
    %cst_65 = arith.constant 2.560000e+02 : f32
    %103 = vector.broadcast %cst_65 : f32 to vector<2x32xf32>
    %104 = arith.divf %102, %103 : vector<2x32xf32>
    %c0_66 = arith.constant 0 : index
    %c0_67 = arith.constant 0 : index
    %105 = vector.load %arg3[%c0_66, %c0_67] : memref<32x8xf32, #tpu.memory_space<vmem>>, vector<32x8xf32>
    %cst_68 = arith.constant dense<0.000000e+00> : vector<2x8xf32>
    %106 = tpu.matmul %104, %105, %cst_68 {dimension_numbers = #tpu.dot_dimension_numbers<[1], [0], [0], [1], [0, 0, 1, 1], [], []>} : vector<2x32xf32>, vector<32x8xf32>, vector<2x8xf32> -> vector<2x8xf32>
    %107 = vector.broadcast %3 : vector<1x8xf32> to vector<2x8xf32>
    %108 = arith.addf %106, %107 : vector<2x8xf32>
    %cst_69 = arith.constant 0.000000e+00 : f32
    %109 = vector.broadcast %cst_69 : f32 to vector<2x8xf32>
    %110 = arith.maximumf %108, %109 : vector<2x8xf32>
    %c0_70 = arith.constant 0 : index
    %c0_71 = arith.constant 0 : index
    %111 = vector.load %arg4[%c0_70, %c0_71] : memref<8x32xf32, #tpu.memory_space<vmem>>, vector<8x32xf32>
    %cst_72 = arith.constant dense<0.000000e+00> : vector<2x32xf32>
    %112 = tpu.matmul %110, %111, %cst_72 {dimension_numbers = #tpu.dot_dimension_numbers<[1], [0], [0], [1], [0, 0, 1, 1], [], []>} : vector<2x8xf32>, vector<8x32xf32>, vector<2x32xf32> -> vector<2x32xf32>
    %113 = vector.broadcast %4 : vector<1x32xf32> to vector<2x32xf32>
    %114 = arith.addf %112, %113 : vector<2x32xf32>
    %cst_73 = arith.constant 3.000000e+00 : f32
    %115 = vector.broadcast %cst_73 : f32 to vector<2x32xf32>
    %116 = arith.addf %114, %115 : vector<2x32xf32>
    %cst_74 = arith.constant 0.000000e+00 : f32
    %cst_75 = arith.constant 6.000000e+00 : f32
    %117 = vector.broadcast %cst_74 : f32 to vector<2x32xf32>
    %118 = arith.maximumf %117, %116 : vector<2x32xf32>
    %119 = vector.broadcast %cst_75 : f32 to vector<2x32xf32>
    %120 = arith.minimumf %119, %118 : vector<2x32xf32>
    %cst_76 = arith.constant 0.166666672 : f32
    %121 = vector.broadcast %cst_76 : f32 to vector<2x32xf32>
    %122 = arith.mulf %120, %121 : vector<2x32xf32>
    %123 = vector.shape_cast %122 : vector<2x32xf32> to vector<2x1x1x32xf32>
    %124 = vector.broadcast %123 : vector<2x1x1x32xf32> to vector<2x16x16x32xf32>
    %125 = arith.mulf %100, %124 : vector<2x16x16x32xf32>
    %126 = vector.shape_cast %125 : vector<2x16x16x32xf32> to vector<512x32xf32>
    %127 = arith.truncf %126 : vector<512x32xf32> to vector<512x32xbf16>
    %c0_77 = arith.constant 0 : index
    %c0_78 = arith.constant 0 : index
    %128 = vector.load %arg5[%c0_77, %c0_78] : memref<32x16xbf16, #tpu.memory_space<vmem>>, vector<32x16xbf16>
    %cst_79 = arith.constant dense<0.000000e+00> : vector<512x16xf32>
    %129 = tpu.matmul %127, %128, %cst_79 {dimension_numbers = #tpu.dot_dimension_numbers<[1], [0], [0], [1], [0, 0, 1, 1], [], []>} : vector<512x32xbf16>, vector<32x16xbf16>, vector<512x16xf32> -> vector<512x16xf32>
    %130 = vector.broadcast %5 : vector<1x16xf32> to vector<512x16xf32>
    %131 = arith.addf %129, %130 : vector<512x16xf32>
    %132 = vector.shape_cast %131 : vector<512x16xf32> to vector<2x16x16x16xf32>
    %133 = arith.addf %132, %6 : vector<2x16x16x16xf32>
    %c0_80 = arith.constant 0 : index
    %c0_81 = arith.constant 0 : index
    %c0_82 = arith.constant 0 : index
    %c0_83 = arith.constant 0 : index
    %134 = vector.load %arg7[%c0_80, %c0_81, %c0_82, %c0_83] : memref<2x16x16x16xf32, #tpu.memory_space<vmem>>, vector<2x16x16x16xf32>
    tpu.vector_store %arg7[%c0_80, %c0_81, %c0_82, %c0_83], %133 {strides = array<i32>} : memref<2x16x16x16xf32, #tpu.memory_space<vmem>>, vector<2x16x16x16xf32>,
    return
  }
  func.func @transform_0(%arg0: i32) -> (i32, i32, i32, i32) {
    %c0_i32 = arith.constant 0 : i32
    %c0_i32_0 = arith.constant 0 : i32
    %c0_i32_1 = arith.constant 0 : i32
    %c0_i32_2 = arith.constant 0 : i32
    return %arg0, %c0_i32, %c0_i32_0, %c0_i32_1 : i32, i32, i32, i32
  }
  func.func @transform_1(%arg0: i32) -> (i32, i32) {
    %c0_i32 = arith.constant 0 : i32
    %c0_i32_0 = arith.constant 0 : i32
    %c0_i32_1 = arith.constant 0 : i32
    return %c0_i32, %c0_i32_0 : i32, i32
  }
  func.func @transform_2(%arg0: i32) -> (i32, i32) {
    %c0_i32 = arith.constant 0 : i32
    %c0_i32_0 = arith.constant 0 : i32
    %c0_i32_1 = arith.constant 0 : i32
    return %c0_i32, %c0_i32_0 : i32, i32
  }
  func.func @transform_3(%arg0: i32) -> (i32, i32) {
    %c0_i32 = arith.constant 0 : i32
    %c0_i32_0 = arith.constant 0 : i32
    %c0_i32_1 = arith.constant 0 : i32
    return %c0_i32, %c0_i32_0 : i32, i32
  }
  func.func @transform_4(%arg0: i32) -> (i32, i32) {
    %c0_i32 = arith.constant 0 : i32
    %c0_i32_0 = arith.constant 0 : i32
    %c0_i32_1 = arith.constant 0 : i32
    return %c0_i32, %c0_i32_0 : i32, i32
  }
  func.func @transform_5(%arg0: i32) -> (i32, i32) {
    %c0_i32 = arith.constant 0 : i32
    %c0_i32_0 = arith.constant 0 : i32
    %c0_i32_1 = arith.constant 0 : i32
    return %c0_i32, %c0_i32_0 : i32, i32
  }
  func.func @transform_6(%arg0: i32) -> (i32, i32, i32, i32) {
    %c0_i32 = arith.constant 0 : i32
    %c0_i32_0 = arith.constant 0 : i32
    %c0_i32_1 = arith.constant 0 : i32
    %c0_i32_2 = arith.constant 0 : i32
    return %arg0, %c0_i32, %c0_i32_0, %c0_i32_1 : i32, i32, i32, i32
  }
}

</mosaic_0001>

<bundles_post_ra>
// kernel: tpu_custom_call.1
= control target key start
LH: loop header
LB: loop body
LE: loop exit
PB: predicated region body
PF: predicated region fallthrough
CT: control target
= control target key end

     0   :  { %11 = vsyncpa [#allocation4], 0  ;;  %s7877_s0 = inlined_call_operand.hbm [shape: f32[2,16,16,16], index: 0, kind: input, shape index: {}]   ;;  %s7878_s1 = inlined_call_operand.vmem [shape: bf16[16,32], index: 1, kind: input, shape index: {}]   ;;  %s7879_s2 = inlined_call_operand.vmem [shape: f32[32,8], index: 2, kind: input, shape index: {}]   ;;  %s7880_s3 = inlined_call_operand.vmem [shape: f32[8,32], index: 3, kind: input, shape index: {}]   ;;  %s7881_s4 = inlined_call_operand.vmem [shape: bf16[32,16], index: 4, kind: input, shape index: {}]   ;;  %s7882_s5 = inlined_call_operand.vmem [shape: f32[16,128], index: 5, kind: input, shape index: {}]   ;;  %s7883_s6 = inlined_call_operand.hbm [shape: f32[2,16,16,16], index: 6, kind: output, shape index: {}]  }
   0x1   :  { %12 = vsyncpa [#allocation5], 0  ;;  %s4265_s21 = smov [#allocation3]   ;;  %s4217_s25 = scalar_lea.hbm %s7877_s0, 8192 }
   0x2   :  { %s18_s22 = sshll.u32 %s4265_s21, 4  ;;  %p4218_p0 = scmp.ne.s32.totalorder %s7877_s0, %s4217_s25  ;;  %s19_s22 = int_to_ptr.vmem [resolvable:$true] %s18_s22 }
   0x3   :  { %p4221_p1 = scmp.lt.u32.totalorder %s4217_s25, %s7877_s0 }
   0x5   :  { %p4223_p2 = pnand %p4221_p1, %p4218_p0 }
   0x7   :  { %4226 = shalt.err (!%p4223_p2)
}
   0x8   :  { %s4227_s30 = scalar_lea.vmem %s19_s22, 8192  ;;  %p4232_p4 = scmp.lt.s32.totalorder %s19_s22, %s19_s22 }
   0x9   :  { %p4228_p3 = scmp.ne.s32.totalorder %s19_s22, %s4227_s30  ;;  %p4233_p5 = scmp.lt.s32.totalorder %s4227_s30, %s4227_s30 }
   0xb   :  { %p4234_p6 = por %p4233_p5, %p4232_p4 }
   0xd   :  { %p4235_p7 = pnand %p4234_p6, %p4228_p3 }
   0xf   :  { %4238 = shalt.err (!%p4235_p7)
}
  0x10   :  { %s4266_s7 = smov 128   ;;  %s4267_s8 = smov 8  }
  0x11   :  { %24 = dma.hbm_to_vmem [thread:$0]  %s7877_s0, 8192, %s19_s22, [#allocation4], %s4266_s7, %s4266_s7, %s4267_s8  }
  0x12   :  { %4261 = dma.done.wait [#allocation4], 8192  }
  0x13   :  { %4262 = vsyncadd [#allocation4], 4294959104  ;;  %v4113_v0 = vld [vmem:[%s7878_s1] sm:$0xff]   ;;  %v45_v2 = vld [vmem:[#allocation3 + $0x8] sm:$0xff]  ;;  %vm152_vm0 = vcmask 130048   ;;  %vm858_vm1 = vcmask 261120  }
  0x14   :  { %v44_v1 = vld [vmem:[#allocation3] sm:$0xff]  ;;  %v46_v3 = vld [vmem:[#allocation3 + $0x10] sm:$0xff]  ;;  %3949 = vmatprep.subr.bf16.mxu0 %v4113_v0  ;;  %v47_v5 = vld [vmem:[#allocation3 + $0x18] sm:$0xff]  ;;  %vm874_vm2 = vcmask 253952   ;;  %vm861_vm3 = vcmask 254976   ;;  %vm4270_vm4 = vmmov 0  }
  0x15   :  { %v108_v4 = vpack.c.bf16 %v45_v2, %v44_v1  ;;  %v48_v6 = vld [vmem:[#allocation3 + $0x20] sm:$0xff]  ;;  %v49_v7 = vld [vmem:[#allocation3 + $0x28] sm:$0xff]  ;;  %3950 = vmatpush3.bf16.msra.mxu0 %v4113_v0  ;;  %v109_v8 = vpack.c.bf16 %v47_v5, %v46_v3  ;;  %v50_v10 = vld [vmem:[#allocation3 + $0x30] sm:$0xff]  ;;  %vm2955_vm5 = vcmask 1041409   ;;  %vm3035_vm6 = vcmask 64512  }
  0x16   :  { %v110_v9 = vpack.c.bf16 %v49_v7, %v48_v6  ;;  %v51_v11 = vld [vmem:[#allocation3 + $0x38] sm:$0xff]  ;;  %v52_v12 = vld [vmem:[#allocation3 + $0x40] sm:$0xff]  ;;  %v53_v13 = vld [vmem:[#allocation3 + $0x48] sm:$0xff] }
  0x17   :  { %3951 = vmatprep.mubr.msk.bf16.mxu0 %vm152_vm0, %v108_v4  ;;  %v111_v14 = vpack.c.bf16 %v51_v11, %v50_v10  ;;  %v112_v15 = vpack.c.bf16 %v53_v13, %v52_v12  ;;  %v54_v16 = vld [vmem:[#allocation3 + $0x50] sm:$0xff]  ;;  %v55_v17 = vld [vmem:[#allocation3 + $0x58] sm:$0xff]  ;;  %v56_v18 = vld [vmem:[#allocation3 + $0x60] sm:$0xff] }
  0x18   :  { %3952 = vmatmul.mubr.msk.bf16.vlgmr.msra.gmra.mrb[0].mxu0 %vm152_vm0, %v109_v8  ;;  %v57_v19 = vld [vmem:[#allocation3 + $0x68] sm:$0xff]  ;;  %v113_v20 = vpack.c.bf16 %v55_v17, %v54_v16  ;;  %v58_v22 = vld [vmem:[#allocation3 + $0x70] sm:$0xff]  ;;  %v59_v23 = vld [vmem:[#allocation3 + $0x78] sm:$0xff] }
  0x19   :  { %3955 = vmatprep.mubr.msk.bf16.mxu0 %vm152_vm0, %v110_v9  ;;  %v114_v21 = vpack.c.bf16 %v57_v19, %v56_v18  ;;  %v60_v24 = vld [vmem:[#allocation3 + $0x80] sm:$0xff]  ;;  %v61_v25 = vld [vmem:[#allocation3 + $0x88] sm:$0xff]  ;;  %v115_v26 = vpack.c.bf16 %v59_v23, %v58_v22  ;;  %v62_v28 = vld [vmem:[#allocation3 + $0x90] sm:$0xff]  ;;  %v7884_v18 = vmov 0.0  }
  0x1a   :  { %v116_v27 = vpack.c.bf16 %v61_v25, %v60_v24  ;;  %v63_v29 = vld [vmem:[#allocation3 + $0x98] sm:$0xff]  ;;  %v64_v30 = vld [vmem:[#allocation3 + $0xa0] sm:$0xff]  ;;  %v65_v31 = vld [vmem:[#allocation3 + $0xa8] sm:$0xff]  ;;  %876 = vst.msk [vmem:[#allocation2 + $0x30] sm:$0x1] %vm874_vm2, %v7884_v18  ;;  %4026 = vmatprep.subr.mxu1 %v7884_v18 }
  0x1b   :  { %v117_v32 = vpack.c.bf16 %v63_v29, %v62_v28  ;;  %v118_v33 = vpack.c.bf16 %v65_v31, %v64_v30  ;;  %v66_v34 = vld [vmem:[#allocation3 + $0xb0] sm:$0xff]  ;;  %v67_v35 = vld [vmem:[#allocation3 + $0xb8] sm:$0xff]  ;;  %v68_v36 = vld [vmem:[#allocation3 + $0xc0] sm:$0xff]  ;;  %859 = vst.msk [vmem:[#allocation2] sm:$0xff] %vm858_vm1, %v7884_v18 }
  0x1c   :  { %v69_v37 = vld [vmem:[#allocation3 + $0xc8] sm:$0xff]  ;;  %v119_v38 = vpack.c.bf16 %v67_v35, %v66_v34  ;;  %v70_v40 = vld [vmem:[#allocation3 + $0xd0] sm:$0xff]  ;;  %v71_v41 = vld [vmem:[#allocation3 + $0xd8] sm:$0xff]  ;;  %860 = vst.msk [vmem:[#allocation2 + $0x8] sm:$0xff] %vm858_vm1, %v7884_v18 }
  0x1d   :  { %v120_v39 = vpack.c.bf16 %v69_v37, %v68_v36  ;;  %v72_v42 = vld [vmem:[#allocation3 + $0xe0] sm:$0xff]  ;;  %v73_v43 = vld [vmem:[#allocation3 + $0xe8] sm:$0xff]  ;;  %v121_v44 = vpack.c.bf16 %v71_v41, %v70_v40  ;;  %v74_v46 = vld [vmem:[#allocation3 + $0xf0] sm:$0xff]  ;;  %863 = vst.msk [vmem:[#allocation2 + $0x1b0] sm:$0xff] %vm858_vm1, %v7884_v18 }
  0x1e   :  { %v122_v45 = vpack.c.bf16 %v73_v43, %v72_v42  ;;  %v75_v47 = vld [vmem:[#allocation3 + $0xf8] sm:$0xff]  ;;  %v76_v48 = vld [vmem:[#allocation3 + $0x100] sm:$0xff]  ;;  %v77_v49 = vld [vmem:[#allocation3 + $0x108] sm:$0xff]  ;;  %864 = vst.msk [vmem:[#allocation2 + $0x1b8] sm:$0xff] %vm858_vm1, %v7884_v18 }
  0x1f   :  { %v123_v50 = vpack.c.bf16 %v75_v47, %v74_v46  ;;  %v124_v51 = vpack.c.bf16 %v77_v49, %v76_v48  ;;  %v78_v52 = vld [vmem:[#allocation3 + $0x110] sm:$0xff]  ;;  %v79_v53 = vld [vmem:[#allocation3 + $0x118] sm:$0xff]  ;;  %v80_v54 = vld [vmem:[#allocation3 + $0x120] sm:$0xff]  ;;  %867 = vst.msk [vmem:[#allocation2 + $0x198] sm:$0xff] %vm858_vm1, %v7884_v18 }
  0x20   :  { %3956 = vmatmul.mubr.msk.bf16.gmra.mrb[4].mxu0 %vm152_vm0, %v111_v14  ;;  %v81_v55 = vld [vmem:[#allocation3 + $0x128] sm:$0xff]  ;;  %v125_v56 = vpack.c.bf16 %v79_v53, %v78_v52  ;;  %v82_v58 = vld [vmem:[#allocation3 + $0x130] sm:$0xff]  ;;  %v83_v59 = vld [vmem:[#allocation3 + $0x138] sm:$0xff]  ;;  %868 = vst.msk [vmem:[#allocation2 + $0x1a0] sm:$0xff] %vm858_vm1, %v7884_v18 }
  0x21   :  { %3959 = vmatprep.mubr.msk.bf16.mxu0 %vm152_vm0, %v112_v15  ;;  %v126_v57 = vpack.c.bf16 %v81_v55, %v80_v54  ;;  %v84_v60 = vld [vmem:[#allocation3 + $0x140] sm:$0xff]  ;;  %v85_v61 = vld [vmem:[#allocation3 + $0x148] sm:$0xff]  ;;  %v127_v62 = vpack.c.bf16 %v83_v59, %v82_v58  ;;  %v86_v0 = vld [vmem:[#allocation3 + $0x150] sm:$0xff]  ;;  %870 = vst.msk [vmem:[#allocation2 + $0x348] sm:$0xff] %vm858_vm1, %v7884_v18 }
  0x22   :  { %v128_v63 = vpack.c.bf16 %v85_v61, %v84_v60  ;;  %v87_v1 = vld [vmem:[#allocation3 + $0x158] sm:$0xff]  ;;  %v88_v2 = vld [vmem:[#allocation3 + $0x160] sm:$0xff]  ;;  %v89_v3 = vld [vmem:[#allocation3 + $0x168] sm:$0xff]  ;;  %871 = vst.msk [vmem:[#allocation2 + $0x350] sm:$0xff] %vm858_vm1, %v7884_v18 }
  0x23   :  { %v129_v4 = vpack.c.bf16 %v87_v1, %v86_v0  ;;  %v130_v5 = vpack.c.bf16 %v89_v3, %v88_v2  ;;  %v90_v6 = vld [vmem:[#allocation3 + $0x170] sm:$0xff]  ;;  %v91_v7 = vld [vmem:[#allocation3 + $0x178] sm:$0xff]  ;;  %v92_v8 = vld [vmem:[#allocation3 + $0x180] sm:$0xff]  ;;  %875 = vst.msk [vmem:[#allocation2 + $0x18] sm:$0x1] %vm874_vm2, %v7884_v18 }
  0x24   :  { %v93_v9 = vld [vmem:[#allocation3 + $0x188] sm:$0xff]  ;;  %v131_v10 = vpack.c.bf16 %v91_v7, %v90_v6  ;;  %v4351_v12 = vld [vmem:[#allocation3 + $0x190] sm:$0xff]  ;;  %v4353_v13 = vld [vmem:[#allocation3 + $0x198] sm:$0xff]  ;;  %877 = vst.msk [vmem:[#allocation2 + $0x48] sm:$0x1] %vm874_vm2, %v7884_v18 }
  0x25   :  { %v132_v11 = vpack.c.bf16 %v93_v9, %v92_v8  ;;  %v4355_v14 = vld [vmem:[#allocation3 + $0x1a0] sm:$0xff]  ;;  %v4357_v15 = vld [vmem:[#allocation3 + $0x1a8] sm:$0xff]  ;;  %v133_v16 = vpack.c.bf16 %v4353_v13, %v4351_v12  ;;  %878 = vst.msk [vmem:[#allocation2 + $0x60] sm:$0x1] %vm874_vm2, %v7884_v18  ;;  %879 = vst.msk [vmem:[#allocation2 + $0x78] sm:$0x1] %vm874_vm2, %v7884_v18 }
  0x26   :  { %v134_v17 = vpack.c.bf16 %v4357_v15, %v4355_v14  ;;  %880 = vst.msk [vmem:[#allocation2 + $0x90] sm:$0x1] %vm874_vm2, %v7884_v18  ;;  %881 = vst.msk [vmem:[#allocation2 + $0xa8] sm:$0x1] %vm874_vm2, %v7884_v18  ;;  %v98_v19 = vld [vmem:[#allocation3 + $0x1b0] sm:$0xff]  ;;  %v101_v22 = vld [vmem:[#allocation3 + $0x1c8] sm:$0xff] }
  0x27   :  { %882 = vst.msk [vmem:[#allocation2 + $0xc0] sm:$0x1] %vm874_vm2, %v7884_v18  ;;  %883 = vst.msk [vmem:[#allocation2 + $0xd8] sm:$0x1] %vm874_vm2, %v7884_v18  ;;  %v102_v25 = vld [vmem:[#allocation3 + $0x1d0] sm:$0xff]  ;;  %v105_v28 = vld [vmem:[#allocation3 + $0x1e8] sm:$0xff] }
  0x28   :  { %3960 = vmatmul.mubr.msk.bf16.gmra.mrb[8].mxu0 %vm152_vm0, %v113_v20  ;;  %884 = vst.msk [vmem:[#allocation2 + $0xf0] sm:$0x1] %vm874_vm2, %v7884_v18  ;;  %885 = vst.msk [vmem:[#allocation2 + $0x108] sm:$0x1] %vm874_vm2, %v7884_v18  ;;  %v99_v20 = vld [vmem:[#allocation3 + $0x1b8] sm:$0xff]  ;;  %v106_v31 = vld [vmem:[#allocation3 + $0x1f0] sm:$0xff] }
  0x29   :  { %3963 = vmatprep.mubr.msk.bf16.mxu0 %vm152_vm0, %v114_v21  ;;  %886 = vst.msk [vmem:[#allocation2 + $0x120] sm:$0x1] %vm874_vm2, %v7884_v18  ;;  %887 = vst.msk [vmem:[#allocation2 + $0x138] sm:$0x1] %vm874_vm2, %v7884_v18  ;;  %v100_v21 = vld [vmem:[#allocation3 + $0x1c0] sm:$0xff]  ;;  %v135_v23 = vpack.c.bf16 %v99_v20, %v98_v19 }
  0x2a   :  { %888 = vst.msk [vmem:[#allocation2 + $0x150] sm:$0x1] %vm874_vm2, %v7884_v18  ;;  %889 = vst.msk [vmem:[#allocation2 + $0x168] sm:$0x1] %vm874_vm2, %v7884_v18  ;;  %v136_v24 = vpack.c.bf16 %v101_v22, %v100_v21  ;;  %v4528_v34 = vld [vmem:[%s7882_s5] ss:$0 sm:$0xff] }
  0x2b   :  { %890 = vst.msk [vmem:[#allocation2 + $0x180] sm:$0x1] %vm874_vm2, %v7884_v18  ;;  %891 = vst.msk [vmem:[#allocation2 + $0x1c8] sm:$0x1] %vm874_vm2, %v7884_v18  ;;  %v4549_v14 = vld [vmem:[%s7882_s5 + $0x5] ss:$0 sm:$0xff] }
  0x2c   :  { %892 = vst.msk [vmem:[#allocation2 + $0x1e0] sm:$0x1] %vm874_vm2, %v7884_v18  ;;  %893 = vst.msk [vmem:[#allocation2 + $0x1f8] sm:$0x1] %vm874_vm2, %v7884_v18  ;;  %v1003_v15 = vld [vmem:[#allocation2] sm:$0xff] }
  0x2d   :  { %894 = vst.msk [vmem:[#allocation2 + $0x210] sm:$0x1] %vm874_vm2, %v7884_v18  ;;  %895 = vst.msk [vmem:[#allocation2 + $0x228] sm:$0x1] %vm874_vm2, %v7884_v18  ;;  %v4556_v21 = vld [vmem:[%s7882_s5 + $0x8] ss:$0 sm:$0xff] }
  0x2e   :  { %896 = vst.msk [vmem:[#allocation2 + $0x240] sm:$0x1] %vm874_vm2, %v7884_v18  ;;  %897 = vst.msk [vmem:[#allocation2 + $0x258] sm:$0x1] %vm874_vm2, %v7884_v18 }
  0x2f   :  { %898 = vst.msk [vmem:[#allocation2 + $0x270] sm:$0x1] %vm874_vm2, %v7884_v18  ;;  %899 = vst.msk [vmem:[#allocation2 + $0x288] sm:$0x1] %vm874_vm2, %v7884_v18 }
  0x30   :  { %3964 = vmatmul.mubr.msk.bf16.gmra.mrb[12].mxu0 %vm152_vm0, %v115_v26  ;;  %900 = vst.msk [vmem:[#allocation2 + $0x2a0] sm:$0x1] %vm874_vm2, %v7884_v18  ;;  %901 = vst.msk [vmem:[#allocation2 + $0x2b8] sm:$0x1] %vm874_vm2, %v7884_v18  ;;  %v103_v26 = vld [vmem:[#allocation3 + $0x1d8] sm:$0xff] }
  0x31   :  { %3967 = vmatprep.mubr.msk.bf16.mxu0 %vm152_vm0, %v116_v27  ;;  %902 = vst.msk [vmem:[#allocation2 + $0x2d0] sm:$0x1] %vm874_vm2, %v7884_v18  ;;  %903 = vst.msk [vmem:[#allocation2 + $0x2e8] sm:$0x1] %vm874_vm2, %v7884_v18  ;;  %v104_v27 = vld [vmem:[#allocation3 + $0x1e0] sm:$0xff]  ;;  %v137_v29 = vpack.c.bf16 %v103_v26, %v102_v25 }
  0x32   :  { %904 = vst.msk [vmem:[#allocation2 + $0x300] sm:$0x1] %vm874_vm2, %v7884_v18  ;;  %905 = vst.msk [vmem:[#allocation2 + $0x318] sm:$0x1] %vm874_vm2, %v7884_v18  ;;  %v138_v30 = vpack.c.bf16 %v105_v28, %v104_v27  ;;  %v4565_v26 = vld [vmem:[%s7882_s5 + $0xb] ss:$0 sm:$0xff]  ;;  %v1080_v27 = vmul.f32 %v4549_v14, %v1003_v15 }
  0x33   :  { %906 = vst.msk [vmem:[#allocation2 + $0x330] sm:$0x1] %vm874_vm2, %v7884_v18  ;;  %907 = vst.msk [vmem:[#allocation2 + $0x29] sm:$0x1] %vm874_vm2, %v7884_v18 }
  0x34   :  { %908 = vst.msk [vmem:[#allocation2 + $0x41] sm:$0x1] %vm874_vm2, %v7884_v18  ;;  %909 = vst.msk [vmem:[#allocation2 + $0x59] sm:$0x1] %vm874_vm2, %v7884_v18 }
  0x35   :  { %910 = vst.msk [vmem:[#allocation2 + $0x71] sm:$0x1] %vm874_vm2, %v7884_v18  ;;  %911 = vst.msk [vmem:[#allocation2 + $0x89] sm:$0x1] %vm874_vm2, %v7884_v18 }
  0x36   :  { %912 = vst.msk [vmem:[#allocation2 + $0xa1] sm:$0x1] %vm874_vm2, %v7884_v18  ;;  %913 = vst.msk [vmem:[#allocation2 + $0xb9] sm:$0x1] %vm874_vm2, %v7884_v18 }
  0x37   :  { %914 = vst.msk [vmem:[#allocation2 + $0xd1] sm:$0x1] %vm874_vm2, %v7884_v18  ;;  %915 = vst.msk [vmem:[#allocation2 + $0xe9] sm:$0x1] %vm874_vm2, %v7884_v18 }
  0x38   :  { %3968 = vmatmul.mubr.msk.bf16.gmra.mrb[16].mxu0 %vm152_vm0, %v117_v32  ;;  %916 = vst.msk [vmem:[#allocation2 + $0x101] sm:$0x1] %vm874_vm2, %v7884_v18  ;;  %917 = vst.msk [vmem:[#allocation2 + $0x119] sm:$0x1] %vm874_vm2, %v7884_v18  ;;  %v107_v32 = vld [vmem:[#allocation3 + $0x1f8] sm:$0xff] }
  0x39   :  { %3971 = vmatprep.mubr.msk.bf16.mxu0 %vm152_vm0, %v118_v33  ;;  %918 = vst.msk [vmem:[#allocation2 + $0x131] sm:$0x1] %vm874_vm2, %v7884_v18  ;;  %919 = vst.msk [vmem:[#allocation2 + $0x149] sm:$0x1] %vm874_vm2, %v7884_v18  ;;  %v139_v33 = vpack.c.bf16 %v107_v32, %v106_v31  ;;  %v1474_v31 = vld [vmem:[#allocation2 + $0x1] sm:$0xff] }
  0x3a   :  { %920 = vst.msk [vmem:[#allocation2 + $0x161] sm:$0x1] %vm874_vm2, %v7884_v18  ;;  %921 = vst.msk [vmem:[#allocation2 + $0x179] sm:$0x1] %vm874_vm2, %v7884_v18 }
  0x3b   :  { %922 = vst.msk [vmem:[#allocation2 + $0x191] sm:$0x1] %vm874_vm2, %v7884_v18  ;;  %923 = vst.msk [vmem:[#allocation2 + $0x1d9] sm:$0x1] %vm874_vm2, %v7884_v18 }
  0x3c   :  { %924 = vst.msk [vmem:[#allocation2 + $0x1f1] sm:$0x1] %vm874_vm2, %v7884_v18  ;;  %925 = vst.msk [vmem:[#allocation2 + $0x209] sm:$0x1] %vm874_vm2, %v7884_v18 }
  0x3d   :  { %926 = vst.msk [vmem:[#allocation2 + $0x221] sm:$0x1] %vm874_vm2, %v7884_v18  ;;  %927 = vst.msk [vmem:[#allocation2 + $0x239] sm:$0x1] %vm874_vm2, %v7884_v18 }
  0x3e   :  { %928 = vst.msk [vmem:[#allocation2 + $0x251] sm:$0x1] %vm874_vm2, %v7884_v18  ;;  %929 = vst.msk [vmem:[#allocation2 + $0x269] sm:$0x1] %vm874_vm2, %v7884_v18 }
  0x3f   :  { %930 = vst.msk [vmem:[#allocation2 + $0x281] sm:$0x1] %vm874_vm2, %v7884_v18  ;;  %931 = vst.msk [vmem:[#allocation2 + $0x299] sm:$0x1] %vm874_vm2, %v7884_v18 }
  0x40   :  { %3972 = vmatmul.mubr.msk.bf16.gmra.mrb[20].mxu0 %vm152_vm0, %v119_v38  ;;  %932 = vst.msk [vmem:[#allocation2 + $0x2b1] sm:$0x1] %vm874_vm2, %v7884_v18  ;;  %933 = vst.msk [vmem:[#allocation2 + $0x2c9] sm:$0x1] %vm874_vm2, %v7884_v18 }
  0x41   :  { %3975 = vmatprep.mubr.msk.bf16.mxu0 %vm152_vm0, %v120_v39  ;;  %934 = vst.msk [vmem:[#allocation2 + $0x2e1] sm:$0x1] %vm874_vm2, %v7884_v18  ;;  %935 = vst.msk [vmem:[#allocation2 + $0x2f9] sm:$0x1] %vm874_vm2, %v7884_v18 }
  0x42   :  { %936 = vst.msk [vmem:[#allocation2 + $0x311] sm:$0x1] %vm874_vm2, %v7884_v18  ;;  %937 = vst.msk [vmem:[#allocation2 + $0x329] sm:$0x1] %vm874_vm2, %v7884_v18 }
  0x43   :  { %938 = vst.msk [vmem:[#allocation2 + $0x341] sm:$0x1] %vm874_vm2, %v7884_v18 }
  0x44   :  { %862 = vst.msk [vmem:[#allocation2 + $0x10] sm:$0x3] %vm861_vm3, %v7884_v18  ;;  %865 = vst.msk [vmem:[#allocation2 + $0x1c0] sm:$0x3] %vm861_vm3, %v7884_v18 }
  0x45   :  { %869 = vst.msk [vmem:[#allocation2 + $0x1a8] sm:$0x3] %vm861_vm3, %v7884_v18  ;;  %872 = vst.msk [vmem:[#allocation2 + $0x358] sm:$0x3] %vm861_vm3, %v7884_v18 }
  0x48   :  { %3976 = vmatmul.mubr.msk.bf16.gmra.mrb[24].mxu0 %vm152_vm0, %v121_v44 }
  0x49   :  { %3979 = vmatprep.mubr.msk.bf16.mxu0 %vm152_vm0, %v122_v45 }
  0x50   :  { %3980 = vmatmul.mubr.msk.bf16.gmra.mrb[28].mxu0 %vm152_vm0, %v123_v50 }
  0x51   :  { %3983 = vmatprep.mubr.msk.bf16.mxu0 %vm152_vm0, %v124_v51 }
  0x58   :  { %3984 = vmatmul.mubr.msk.bf16.gmra.mrb[32].mxu0 %vm152_vm0, %v125_v56 }
  0x59   :  { %3987 = vmatprep.mubr.msk.bf16.mxu0 %vm152_vm0, %v126_v57 }
  0x60   :  { %3988 = vmatmul.mubr.msk.bf16.gmra.mrb[36].mxu0 %vm152_vm0, %v127_v62 }
  0x61   :  { %3991 = vmatprep.mubr.msk.bf16.mxu0 %vm152_vm0, %v128_v63 }
  0x68   :  { %3992 = vmatmul.mubr.msk.bf16.gmra.mrb[40].mxu0 %vm152_vm0, %v129_v4 }
  0x69   :  { %3995 = vmatprep.mubr.msk.bf16.mxu0 %vm152_vm0, %v130_v5 }
  0x70   :  { %3996 = vmatmul.mubr.msk.bf16.gmra.mrb[44].mxu0 %vm152_vm0, %v131_v10 }
  0x71   :  { %3999 = vmatprep.mubr.msk.bf16.mxu0 %vm152_vm0, %v132_v11 }
  0x78   :  { %4000 = vmatmul.mubr.msk.bf16.gmra.mrb[48].mxu0 %vm152_vm0, %v133_v16 }
  0x79   :  { %4003 = vmatprep.mubr.msk.bf16.mxu0 %vm152_vm0, %v134_v17 }
  0x80   :  { %4004 = vmatmul.mubr.msk.bf16.gmra.mrb[52].mxu0 %vm152_vm0, %v135_v23 }
  0x81   :  { %4007 = vmatprep.mubr.msk.bf16.mxu0 %vm152_vm0, %v136_v24 }
  0x88   :  { %4008 = vmatmul.mubr.msk.bf16.gmra.mrb[56].mxu0 %vm152_vm0, %v137_v29 }
  0x89   :  { %4011 = vmatprep.mubr.msk.bf16.mxu0 %vm152_vm0, %v138_v30 }
  0x90   :  { %4012 = vmatmul.mubr.msk.bf16.gmra.mrb[60].mxu0 %vm152_vm0, %v139_v33  ;;  %v1004_v33 = vld [vmem:[#allocation2 + $0x8] sm:$0xff] }
  0xeb   :  { %v3953_v35 = vpop.f32.mrb[0].mxu0 }
  0xec   :  { %v292_v36 = vadd.f32 %v3953_v35, %v4528_v34  ;;  %v283_v37 = vpop.f32.mrb[1].mxu0  ;;  %v4576_v35 = vld [vmem:[%s7882_s5 + $0x6] ss:$0 sm:$0xff] }
  0xed   :  { %v284_v38 = vadd.f32 %v4528_v34, %v283_v37  ;;  %v3954_v39 = vpop.f32.mrb[2].mxu0 }
  0xee   :  { %v540_v40 = vadd.f32 3.0, %v292_v36  ;;  %v295_v41 = vadd.f32 %v3954_v39, %v4528_v34  ;;  %v286_v42 = vpop.f32.mrb[3].mxu0 }
  0xef   :  { %v538_v43 = vadd.f32 3.0, %v284_v38  ;;  %v287_v44 = vadd.f32 %v4528_v34, %v286_v42 }
  0xf0   :  { %v604_v45 = vmax.f32 %v540_v40, 0.0  ;;  %v541_v46 = vadd.f32 3.0, %v295_v41  ;;  %v1551_v40 = vmul.f32 %v4576_v35, %v1474_v31 }
  0xf1   :  { %v602_v47 = vmax.f32 %v538_v43, 0.0  ;;  %v539_v48 = vadd.f32 3.0, %v287_v44  ;;  %v1081_v43 = vmul.f32 %v4549_v14, %v1004_v33 }
  0xf2   :  { %v668_v49 = vmin.f32 %v604_v45, 6.0  ;;  %v605_v50 = vmax.f32 %v541_v46, 0.0  ;;  %v4591_v45 = vld [vmem:[%s7882_s5 + $0x9] ss:$0 sm:$0xff] }
  0xf3   :  { %v666_v51 = vmin.f32 %v602_v47, 6.0  ;;  %v603_v52 = vmax.f32 %v539_v48, 0.0  ;;  %v3957_v53 = vpop.f32.mrb[4].mxu0 }
  0xf4   :  { %v732_v54 = vmul.f32 0.16666667, %v668_v49  ;;  %v669_v55 = vmin.f32 %v605_v50, 6.0  ;;  %v308_v56 = vadd.f32 %v3957_v53, %v4528_v34  ;;  %v299_v57 = vpop.f32.mrb[5].mxu0 }
  0xf5   :  { %v730_v58 = vmul.f32 0.16666667, %v666_v51  ;;  %v667_v59 = vmin.f32 %v603_v52, 6.0  ;;  %v300_v60 = vadd.f32 %v4528_v34, %v299_v57  ;;  %v3958_v61 = vpop.f32.mrb[6].mxu0 }
  0xf6   :  { %v796_v62 = vmul.f32 %v732_v54, %v292_v36  ;;  %v733_v63 = vmul.f32 0.16666667, %v669_v55  ;;  %v544_v0 = vadd.f32 3.0, %v308_v56  ;;  %v302_v1 = vpop.f32.mrb[7].mxu0  ;;  %v4540_v10 = vadd.f32 %v3958_v61, %v4528_v34  ;;  %v4612_v61 = vld [vmem:[%s7882_s5 + $0xc] ss:$0 sm:$0xff] }
  0xf7   :  { %v794_v2 = vmul.f32 %v730_v58, %v284_v38  ;;  %v731_v3 = vmul.f32 0.16666667, %v667_v59  ;;  %v542_v4 = vadd.f32 3.0, %v300_v60  ;;  %v4543_v11 = vadd.f32 %v4528_v34, %v302_v1  ;;  %v1475_v59 = vld [vmem:[#allocation2 + $0x9] sm:$0xff] }
  0xf8   :  { %941 = vst.msk [vmem:[#allocation2 + $0x31] sm:$0xff] %vm858_vm1, %v796_v62  ;;  %v797_v5 = vmul.f32 %v733_v63, %v295_v41  ;;  %v608_v6 = vmax.f32 %v544_v0, 0.0  ;;  %v545_v23 = vadd.f32 3.0, %v4540_v10  ;;  %v1945_v0 = vld [vmem:[#allocation2 + $0x2] sm:$0xff] }
  0xf9   :  { %939 = vst.msk [vmem:[#allocation2 + $0x19] sm:$0xff] %vm858_vm1, %v794_v2  ;;  %v795_v7 = vmul.f32 %v731_v3, %v287_v44  ;;  %v606_v8 = vmax.f32 %v542_v4, 0.0  ;;  %v543_v24 = vadd.f32 3.0, %v4543_v11 }
  0xfa   :  { %942 = vst.msk [vmem:[#allocation2 + $0x39] sm:$0xff] %vm858_vm1, %v797_v5  ;;  %v672_v9 = vmin.f32 %v608_v6, 6.0  ;;  %v609_v36 = vmax.f32 %v545_v23, 0.0  ;;  %v1552_v5 = vmul.f32 %v4576_v35, %v1475_v59 }
  0xfb   :  { %940 = vst.msk [vmem:[#allocation2 + $0x21] sm:$0xff] %vm858_vm1, %v795_v7  ;;  %v670_v12 = vmin.f32 %v606_v8, 6.0  ;;  %v3961_v13 = vpop.f32.mrb[8].mxu0  ;;  %v607_v37 = vmax.f32 %v543_v24, 0.0 }
  0xfc   :  { %v736_v16 = vmul.f32 0.16666667, %v672_v9  ;;  %v315_v17 = vpop.f32.mrb[9].mxu0  ;;  %v673_v51 = vmin.f32 %v609_v36, 6.0  ;;  %v324_v53 = vadd.f32 %v3961_v13, %v4528_v34  ;;  %v4624_v9 = vld [vmem:[%s7882_s5 + $0x7] ss:$0 sm:$0xff] }
  0xfd   :  { %v734_v19 = vmul.f32 0.16666667, %v670_v12  ;;  %v4551_v20 = vpop.f32.mrb[10].mxu0  ;;  %v671_v52 = vmin.f32 %v607_v37, 6.0 }
  0xfe   :  { %v800_v22 = vmul.f32 %v736_v16, %v308_v56  ;;  %v4560_v25 = vpop.f32.mrb[11].mxu0  ;;  %v316_v56 = vadd.f32 %v4528_v34, %v315_v17  ;;  %v737_v1 = vmul.f32 0.16666667, %v673_v51  ;;  %v548_v3 = vadd.f32 3.0, %v324_v53 }
  0xff   :  { %v798_v28 = vmul.f32 %v734_v19, %v300_v60  ;;  %v4568_v29 = vld [vmem:[#allocation2 + $0x30] sm:$0xff]  ;;  %v735_v2 = vmul.f32 0.16666667, %v671_v52  ;;  %v2022_v16 = vmul.f32 %v4624_v9, %v1945_v0 }
 0x100   :  { %v1005_v30 = vld [vmem:[#allocation2 + $0x18] sm:$0xff]  ;;  %945 = vst.msk [vmem:[#allocation2 + $0x61] sm:$0xff] %vm858_vm1, %v800_v22  ;;  %v1346_v38 = vmul.f32 %v4565_v26, %v4568_v29  ;;  %v546_v6 = vadd.f32 3.0, %v316_v56  ;;  %v1215_v13 = vmul.f32 %v4556_v21, %v4568_v29  ;;  %v801_v24 = vmul.f32 %v737_v1, %v4540_v10  ;;  %v4651_v10 = vld [vmem:[%s7882_s5 + $0xa] ss:$0 sm:$0xff] }
 0x101   :  { %v1213_v32 = vmul.f32 %v4556_v21, %v1005_v30  ;;  %943 = vst.msk [vmem:[#allocation2 + $0x49] sm:$0xff] %vm858_vm1, %v798_v28  ;;  %v4593_v47 = vld [vmem:[#allocation2 + $0x19] sm:$0xff]  ;;  %v4607_v60 = vld [vmem:[#allocation2 + $0x31] sm:$0xff]  ;;  %v1082_v15 = vmul.f32 %v4549_v14, %v1005_v30  ;;  %v612_v28 = vmax.f32 %v548_v3, 0.0 }
 0x102   :  { %v4581_v41 = vld [vmem:[#allocation2 + $0x20] sm:$0xff]  ;;  %v4597_v49 = vld [vmem:[#allocation2 + $0x38] sm:$0xff]  ;;  %v1684_v57 = vmul.f32 %v4591_v45, %v4593_v47  ;;  %v1817_v8 = vmul.f32 %v4612_v61, %v4607_v60  ;;  %v610_v33 = vmax.f32 %v546_v6, 0.0  ;;  %946 = vst.msk [vmem:[#allocation2 + $0x69] sm:$0xff] %vm858_vm1, %v801_v24 }
 0x103   :  { %v1277_v39 = vadd.f32 %v1213_v32, %v1080_v27  ;;  %v4583_v42 = vpop.f32.mrb[12].mxu0  ;;  %v1214_v50 = vmul.f32 %v4556_v21, %v4581_v41  ;;  %v1347_v62 = vmul.f32 %v4565_v26, %v4597_v49  ;;  %v4636_v23 = vld [vmem:[#allocation2 + $0x21] sm:$0xff]  ;;  %v799_v27 = vmul.f32 %v735_v2, %v4543_v11  ;;  %v1949_v3 = vld [vmem:[#allocation2 + $0x32] sm:$0xff] }
 0x104   :  { %v4586_v44 = vpop.f32.mrb[13].mxu0  ;;  %v676_v37 = vmin.f32 %v612_v28, 6.0  ;;  %v1685_v11 = vmul.f32 %v4591_v45, %v4636_v23  ;;  %v1083_v24 = vmul.f32 %v4549_v14, %v4581_v41  ;;  %v1085_v41 = vmul.f32 %v4549_v14, %v4597_v49 }
 0x105   :  { %v1410_v46 = vadd.f32 %v1346_v38, %v1277_v39  ;;  %v4595_v48 = vpop.f32.mrb[14].mxu0  ;;  %v1278_v58 = vadd.f32 %v1214_v50, %v1081_v43  ;;  %944 = vst.msk [vmem:[#allocation2 + $0x51] sm:$0xff] %vm858_vm1, %v799_v27  ;;  %v4655_v38 = vld [vmem:[#allocation2 + $0x1a] sm:$0xff]  ;;  %v674_v39 = vmin.f32 %v610_v33, 6.0  ;;  %v1279_v43 = vadd.f32 %v1215_v13, %v1082_v15  ;;  %v1946_v50 = vld [vmem:[#allocation2 + $0xa] sm:$0xff] }
 0x106   :  { %v4602_v54 = vpop.f32.mrb[15].mxu0  ;;  %v740_v52 = vmul.f32 0.16666667, %v676_v37  ;;  %v1553_v13 = vmul.f32 %v4576_v35, %v4593_v47  ;;  %v4694_v47 = vadd.f32 %v4528_v34, %v4560_v25  ;;  %v1555_v33 = vmul.f32 %v4576_v35, %v4607_v60 }
 0x107   :  { %v1615_v55 = vadd.f32 %v1551_v40, %v1410_v46  ;;  %v1411_v4 = vadd.f32 %v1347_v62, %v1278_v58  ;;  %v1084_v40 = vmul.f32 %v4549_v14, %v4568_v29  ;;  %v1479_v46 = vld [vmem:[#allocation2 + $0x39] sm:$0xff]  ;;  %v738_v58 = vmul.f32 0.16666667, %v674_v39 }
 0x108   :  { %v4632_v17 = vld [vmem:[#allocation2 + $0x48] sm:$0xff]  ;;  %v2155_v62 = vmul.f32 %v4651_v10, %v4655_v38  ;;  %v804_v1 = vmul.f32 %v740_v52, %v324_v53  ;;  %v1818_v29 = vmul.f32 %v4612_v61, %v1479_v46  ;;  %v1556_v37 = vmul.f32 %v4576_v35, %v1479_v46 }
 0x109   :  { %v1748_v63 = vadd.f32 %v1684_v57, %v1615_v55  ;;  %v1616_v32 = vadd.f32 %v1552_v5, %v1411_v4  ;;  %v1217_v30 = vmul.f32 %v4556_v21, %v4632_v17  ;;  %v1348_v36 = vmul.f32 %v4565_v26, %v4632_v17  ;;  %v4659_v57 = vld [vmem:[#allocation2 + $0x60] sm:$0xff]  ;;  %v4671_v4 = vld [vmem:[%s7882_s5 + $0xd] ss:$0 sm:$0xff] }
 0x10a   :  { %v2023_v5 = vmul.f32 %v4624_v9, %v1946_v50  ;;  %v802_v6 = vmul.f32 %v738_v58, %v316_v56  ;;  %v1350_v53 = vmul.f32 %v4565_v26, %v4659_v57  ;;  %949 = vst.msk [vmem:[#allocation2 + $0x91] sm:$0xff] %vm858_vm1, %v804_v1  ;;  %v1216_v56 = vmul.f32 %v4556_v21, %v4597_v49  ;;  %v1480_v39 = vld [vmem:[#allocation2 + $0x49] sm:$0xff]  ;;  %v4711_v50 = vld [vmem:[%s7882_s5 + $0x1] ss:$0 sm:$0xff] }
 0x10b   :  { %v4617_v7 = vpop.f32.mrb[16].mxu0  ;;  %v1881_v22 = vadd.f32 %v1817_v8, %v1748_v63  ;;  %v1749_v55 = vadd.f32 %v1685_v11, %v1616_v32  ;;  %v1281_v63 = vadd.f32 %v1217_v30, %v1084_v40  ;;  %v1412_v0 = vadd.f32 %v1348_v36, %v1279_v43  ;;  %v1948_v11 = vld [vmem:[#allocation2 + $0x22] sm:$0xff]  ;;  %v1950_v49 = vld [vmem:[#allocation2 + $0x3a] sm:$0xff] }
 0x10c   :  { %v4626_v12 = vpop.f32.mrb[17].mxu0  ;;  %947 = vst.msk [vmem:[#allocation2 + $0x79] sm:$0xff] %vm858_vm1, %v802_v6  ;;  %v2288_v28 = vmul.f32 %v4671_v4, %v1949_v3  ;;  %v1686_v30 = vmul.f32 %v4591_v45, %v4607_v60  ;;  %v4701_v36 = vld [vmem:[#allocation2 + $0x50] sm:$0xff]  ;;  %v1687_v43 = vmul.f32 %v4591_v45, %v1479_v46  ;;  %v1280_v60 = vadd.f32 %v1216_v56, %v1083_v24 }
 0x10d   :  { %v4634_v19 = vpop.f32.mrb[18].mxu0  ;;  %v2086_v51 = vadd.f32 %v2022_v16, %v1881_v22  ;;  %v4683_v16 = vadd.f32 %v4551_v20, %v4528_v34  ;;  %v1882_v27 = vadd.f32 %v1818_v29, %v1749_v55  ;;  %v1414_v32 = vadd.f32 %v1350_v53, %v1281_v63  ;;  %v4716_v63 = vld [vmem:[#allocation2 + $0x68] sm:$0xff] }
 0x10e   :  { %v4640_v31 = vpop.f32.mrb[19].mxu0  ;;  %v1617_v20 = vadd.f32 %v1553_v13, %v1412_v0  ;;  %v547_v52 = vadd.f32 3.0, %v4694_v47  ;;  %v1218_v0 = vmul.f32 %v4556_v21, %v4701_v36  ;;  %v1349_v46 = vmul.f32 %v4565_v26, %v4701_v36 }
 0x10f   :  { %v2219_v15 = vadd.f32 %v2155_v62, %v2086_v51  ;;  %v549_v40 = vadd.f32 3.0, %v4683_v16  ;;  %v2087_v51 = vadd.f32 %v2023_v5, %v1882_v27  ;;  %v1619_v58 = vadd.f32 %v1555_v33, %v1414_v32 }
 0x110   :  { %v1750_v62 = vadd.f32 %v1686_v30, %v1617_v20  ;;  %v2026_v29 = vmul.f32 %v4624_v9, %v1949_v3  ;;  %v2156_v5 = vmul.f32 %v4651_v10, %v1948_v11  ;;  %v1688_v6 = vmul.f32 %v4591_v45, %v1480_v39  ;;  %v1482_v30 = vld [vmem:[#allocation2 + $0x61] sm:$0xff] }
 0x111   :  { %v2352_v25 = vadd.f32 %v2288_v28, %v2219_v15  ;;  %v1819_v13 = vmul.f32 %v4612_v61, %v1480_v39  ;;  %v1282_v56 = vadd.f32 %v1218_v0, %v1085_v41  ;;  %v1413_v24 = vadd.f32 %v1349_v46, %v1280_v60 }
 0x112   :  { %v613_v27 = vmax.f32 %v549_v40, 0.0  ;;  %v4736_v32 = vmul.f32 %v4624_v9, %v1950_v49  ;;  %v1554_v20 = vmul.f32 %v4576_v35, %v4636_v23  ;;  %v2220_v33 = vadd.f32 %v2156_v5, %v2087_v51 }
 0x113   :  { %v4661_v59 = vpop.f32.mrb[20].mxu0  ;;  %v4731_v53 = vadd.f32 %v4711_v50, %v2352_v25  ;;  %v1351_v18 = vmul.f32 %v4565_v26, %v4716_v63  ;;  %v1752_v25 = vadd.f32 %v1688_v6, %v1619_v58  ;;  %v611_v41 = vmax.f32 %v547_v52, 0.0 }
 0x114   :  { %7936 = vst [vmem:[#allocation9_spill] sm:$0xff] %v4661_v59  ;;  %v4665_v2 = vpop.f32.mrb[21].mxu0  ;;  %v4744_v40 = vmul.f32 %v4651_v10, %v1950_v49  ;;  %v2289_v60 = vmul.f32 %v4671_v4, %v1950_v49  ;;  %v1618_v46 = vadd.f32 %v1554_v20, %v1413_v24  ;;  %v2024_v23 = vmul.f32 %v4624_v9, %v4655_v38  ;;  %v4756_v49 = vld [vmem:[#allocation2 + $0x78] sm:$0xff] }
 0x115   :  { %7937 = vst [vmem:[#allocation10_spill] sm:$0xff] %v4665_v2  ;;  %v4674_v8 = vpop.f32.mrb[22].mxu0  ;;  %v1415_v0 = vadd.f32 %v1351_v18, %v1282_v56  ;;  %v2484_v51 = vadd.f32 3.0, %v4731_v53  ;;  %v1821_v5 = vmul.f32 %v4612_v61, %v1482_v30  ;;  %v1088_v52 = vmul.f32 %v4549_v14, %v4659_v57 }
 0x116   :  { %7938 = vst [vmem:[#allocation11_spill] sm:$0xff] %v4674_v8  ;;  %v4685_v22 = vpop.f32.mrb[23].mxu0  ;;  %v2353_v58 = vadd.f32 %v2289_v60, %v2220_v33  ;;  %v1086_v18 = vmul.f32 %v4549_v14, %v4632_v17  ;;  %v675_v56 = vmin.f32 %v611_v41, 6.0  ;;  %v4763_v24 = vmul.f32 %v4576_v35, %v1482_v30 }
 0x117   :  { %7939 = vst [vmem:[#allocation12_spill] sm:$0xff] %v4685_v22  ;;  %v1885_v38 = vadd.f32 %v1821_v5, %v1752_v25  ;;  %v1751_v20 = vadd.f32 %v1687_v43, %v1618_v46  ;;  %v2548_v33 = vmax.f32 %v2484_v51, 0.0  ;;  %v1221_v60 = vmul.f32 %v4556_v21, %v4756_v49 }
 0x118   :  { %v4790_v22 = vadd.f32 %v4583_v42, %v4528_v34  ;;  %v4794_v8 = vadd.f32 %v4528_v34, %v4586_v44 }
 0x119   :  { %v2090_v46 = vadd.f32 %v2026_v29, %v1885_v38  ;;  %v2612_v42 = vmin.f32 %v2548_v33, 6.0  ;;  %v1954_v33 = vld [vmem:[#allocation2 + $0x6a] sm:$0xff] }
 0x11b   :  { %v4714_v55 = vpop.f32.mrb[24].mxu0 }
 0x11c   :  { %7940 = vst [vmem:[#allocation13_spill] sm:$0xff] %v4714_v55  ;;  %v4722_v1 = vpop.f32.mrb[25].mxu0  ;;  %v4786_v55 = vld [vmem:[#allocation2 + $0x90] sm:$0xff] }
 0x11d   :  { %7941 = vst [vmem:[#allocation14_spill] sm:$0xff] %v4722_v1  ;;  %v4728_v15 = vpop.f32.mrb[26].mxu0  ;;  %v1883_v1 = vadd.f32 %v1819_v13, %v1750_v62  ;;  %v1219_v62 = vmul.f32 %v4556_v21, %v4659_v57  ;;  %v4760_v13 = vld [vmem:[#allocation2 + $0x51] sm:$0xff]  ;;  %v1557_v57 = vmul.f32 %v4576_v35, %v1480_v39 }
 0x11e   :  { %7942 = vst [vmem:[#allocation15_spill] sm:$0xff] %v4728_v15  ;;  %v4733_v28 = vpop.f32.mrb[27].mxu0  ;;  %v2157_v15 = vmul.f32 %v4651_v10, %v1949_v3  ;;  %v2025_v3 = vmul.f32 %v4624_v9, %v1948_v11  ;;  %v4766_v11 = vmul.f32 %v4591_v45, %v1482_v30  ;;  %v1689_v25 = vmul.f32 %v4591_v45, %v4760_v13  ;;  %v4778_v30 = vld [vmem:[#allocation2 + $0x4a] sm:$0xff] }
 0x11f   :  { %7943 = vst [vmem:[#allocation16_spill] sm:$0xff] %v4733_v28  ;;  %v677_v28 = vmin.f32 %v613_v27, 6.0  ;;  %v2088_v6 = vadd.f32 %v2024_v23, %v1883_v1  ;;  %v1620_v27 = vadd.f32 %v1556_v37, %v1415_v0  ;;  %v4772_v1 = vadd.f32 %v4711_v50, %v2353_v58  ;;  %v1483_v0 = vld [vmem:[#allocation2 + $0x69] sm:$0xff] }
 0x120   :  { %v1820_v41 = vmul.f32 %v4612_v61, %v4760_v13  ;;  %v1352_v37 = vmul.f32 %v4565_v26, %v4756_v49  ;;  %v1283_v39 = vadd.f32 %v1219_v62, %v1086_v18  ;;  %v739_v23 = vmul.f32 0.16666667, %v675_v56 }
 0x121   :  { %v741_v17 = vmul.f32 0.16666667, %v677_v28  ;;  %v2221_v28 = vadd.f32 %v2157_v15, %v2088_v6  ;;  %v1753_v5 = vadd.f32 %v1689_v25, %v1620_v27  ;;  %v2159_v29 = vmul.f32 %v4651_v10, %v4778_v30  ;;  %v1953_v27 = vld [vmem:[#allocation2 + $0x62] sm:$0xff] }
 0x122   :  { %v1884_v58 = vadd.f32 %v1820_v41, %v1751_v20  ;;  %v2290_v15 = vmul.f32 %v4671_v4, %v4778_v30  ;;  %v1285_v62 = vadd.f32 %v1221_v60, %v1088_v52  ;;  %v1416_v18 = vadd.f32 %v1352_v37, %v1283_v39 }
 0x123   :  { %v4782_v43 = vpop.f32.mrb[28].mxu0  ;;  %v2485_v6 = vadd.f32 3.0, %v4772_v1  ;;  %v1822_v56 = vmul.f32 %v4612_v61, %v1483_v0  ;;  %v805_v44 = vmul.f32 %v741_v17, %v4683_v16  ;;  %v2223_v20 = vadd.f32 %v2159_v29, %v2090_v46 }
 0x124   :  { %7944 = vst [vmem:[#allocation17_spill] sm:$0xff] %v4782_v43  ;;  %v4784_v51 = vpop.f32.mrb[29].mxu0  ;;  %v2354_v25 = vadd.f32 %v2290_v15, %v2221_v28  ;;  %v1354_v41 = vmul.f32 %v4565_v26, %v4786_v55  ;;  %v4812_v52 = vmul.f32 %v4549_v14, %v4716_v63  ;;  %v1220_v60 = vmul.f32 %v4556_v21, %v4716_v63 }
 0x125   :  { %7945 = vst [vmem:[#allocation18_spill] sm:$0xff] %v4784_v51  ;;  %v4796_v43 = vpop.f32.mrb[30].mxu0  ;;  %v1886_v37 = vadd.f32 %v1822_v56, %v1753_v5  ;;  %v2089_v39 = vadd.f32 %v2025_v3, %v1884_v58  ;;  %950 = vst.msk [vmem:[#allocation2 + $0x99] sm:$0xff] %vm858_vm1, %v805_v44  ;;  %v2292_v16 = vmul.f32 %v4671_v4, %v1953_v27  ;;  %v2549_v28 = vmax.f32 %v2485_v6, 0.0  ;;  %v4832_v58 = vld [vmem:[#allocation2 + $0x52] sm:$0xff] }
 0x126   :  { %7946 = vst [vmem:[#allocation19_spill] sm:$0xff] %v4796_v43  ;;  %v4802_v38 = vpop.f32.mrb[31].mxu0  ;;  %v803_v43 = vmul.f32 %v739_v23, %v4694_v47  ;;  %v1418_v17 = vadd.f32 %v1354_v41, %v1285_v62  ;;  %v1621_v46 = vadd.f32 %v1557_v57, %v1416_v18  ;;  %v552_v47 = vadd.f32 3.0, %v4790_v22  ;;  %v4844_v6 = vld [vmem:[#allocation2 + $0x79] sm:$0xff] }
 0x127   :  { %7947 = vst [vmem:[#allocation20_spill] sm:$0xff] %v4802_v38  ;;  %v2676_v23 = vmul.f32 0.16666667, %v2612_v42  ;;  %v4821_v29 = vmul.f32 %v4576_v35, %v1483_v0  ;;  %v4824_v63 = vmul.f32 %v4591_v45, %v1483_v0  ;;  %v4827_v3 = vmul.f32 %v4624_v9, %v1953_v27 }
 0x128   :  { %948 = vst.msk [vmem:[#allocation2 + $0x81] sm:$0xff] %vm858_vm1, %v803_v43  ;;  %v4830_v5 = vmul.f32 %v4624_v9, %v1954_v33  ;;  %v2356_v57 = vadd.f32 %v2292_v16, %v2223_v20  ;;  %v4835_v43 = vadd.f32 %v4711_v50, %v2354_v25  ;;  %v4838_v15 = vmul.f32 %v4651_v10, %v1953_v27 }
 0x129   :  { %v1087_v62 = vmul.f32 %v4549_v14, %v4701_v36  ;;  %v2091_v0 = vadd.f32 %v4736_v32, %v1886_v37  ;;  %v2222_v18 = vadd.f32 %v4744_v40, %v2089_v39  ;;  %v1623_v42 = vadd.f32 %v4763_v24, %v1418_v17  ;;  %v4868_v17 = vld [vmem:[#allocation2 + $0x91] sm:$0xff] }
 0x12a   :  { %v1754_v56 = vadd.f32 %v4766_v11, %v1621_v46  ;;  %v616_v44 = vmax.f32 %v552_v47, 0.0  ;;  %v550_v20 = vadd.f32 3.0, %v4794_v8  ;;  %v2613_v25 = vmin.f32 %v2549_v28, 6.0 }
 0x12b   :  { %v4850_v27 = vmul.f32 %v2676_v23, %v4731_v53  ;;  %v2160_v36 = vmul.f32 %v4651_v10, %v4832_v58  ;;  %v2291_v32 = vmul.f32 %v4671_v4, %v4832_v58  ;;  %v4857_v40 = vadd.f32 %v4711_v50, %v2356_v57  ;;  %v4870_v46 = vpop.f32.mrb[32].mxu0 }
 0x12c   :  { %v2486_v24 = vadd.f32 3.0, %v4835_v43  ;;  %v1692_v11 = vmul.f32 %v4591_v45, %v4844_v6  ;;  %v1823_v41 = vmul.f32 %v4612_v61, %v4844_v6  ;;  %v4865_v53 = vmul.f32 %v4651_v10, %v1954_v33  ;;  %7949 = vst [vmem:[#allocation22_spill] sm:$0xff] %v4870_v46  ;;  %v4874_v51 = vpop.f32.mrb[33].mxu0 }
 0x12d   :  { %7948 = vst [vmem:[#allocation21_spill] sm:$0xff] %v4850_v27  ;;  %v2293_v37 = vmul.f32 %v4671_v4, %v1954_v33  ;;  %v2224_v39 = vadd.f32 %v2160_v36, %v2091_v0  ;;  %v2355_v16 = vadd.f32 %v2291_v32, %v2222_v18  ;;  %v680_v57 = vmin.f32 %v616_v44, 6.0  ;;  %7950 = vst [vmem:[#allocation23_spill] sm:$0xff] %v4874_v51  ;;  %v4884_v18 = vpop.f32.mrb[34].mxu0  ;;  %v4889_v36 = vld [vmem:[#allocation2 + $0x98] sm:$0xff] }
 0x12e   :  { %v1756_v47 = vadd.f32 %v1692_v11, %v1623_v42  ;;  %v1887_v28 = vadd.f32 %v1823_v41, %v1754_v56  ;;  %v614_v38 = vmax.f32 %v550_v20, 0.0  ;;  %v4878_v2 = vsel %vm858_vm1, %v4850_v27, 0.0  ;;  %7951 = vst [vmem:[#allocation24_spill] sm:$0xff] %v4884_v18 }
 0x12f   :  { %v4872_v23 = vld [vmem:[#allocation2 + $0x80] sm:$0xff]  ;;  %v1284_v59 = vadd.f32 %v1220_v60, %v1087_v62  ;;  %v1558_v33 = vmul.f32 %v4576_v35, %v4760_v13  ;;  %v2028_v0 = vmul.f32 %v4624_v9, %v4778_v30  ;;  %v2677_v42 = vmul.f32 0.16666667, %v2613_v25 }
 0x130   :  { %v2488_v56 = vadd.f32 3.0, %v4857_v40  ;;  %v2550_v44 = vmax.f32 %v2486_v24, 0.0  ;;  %v1825_v20 = vmul.f32 %v4612_v61, %v4868_v17  ;;  %v2357_v32 = vadd.f32 %v2293_v37, %v2224_v39  ;;  %v4903_v39 = vpop.f32.mrb[35].mxu0 }
 0x131   :  { %v4892_v60 = vadd.f32 %v4711_v50, %v2355_v16  ;;  %v1222_v13 = vmul.f32 %v4556_v21, %v4872_v23  ;;  %v1353_v30 = vmul.f32 %v4565_v26, %v4872_v23  ;;  %v2092_v25 = vadd.f32 %v2028_v0, %v1887_v28  ;;  %7952 = vst [vmem:[#allocation25_spill] sm:$0xff] %v4903_v39 }
 0x132   :  { %v1889_v62 = vadd.f32 %v1825_v20, %v1756_v47  ;;  %v744_v11 = vmul.f32 0.16666667, %v680_v57  ;;  %v678_v41 = vmin.f32 %v614_v38, 6.0  ;;  %v1355_v24 = vmul.f32 %v4565_v26, %v4889_v36  ;;  %v4917_v57 = vld [vmem:[#allocation2 + $0x81] sm:$0xff] }
 0x133   :  { %v1286_v27 = vadd.f32 %v1222_v13, %v4812_v52  ;;  %v1417_v18 = vadd.f32 %v1353_v30, %v1284_v59  ;;  %v343_v37 = vadd.f32 %v4595_v48, %v4528_v34  ;;  %v4906_v16 = vmul.f32 %v2677_v42, %v4772_v1  ;;  %v4922_v1 = vld [vmem:[#allocation2 + $0x7a] sm:$0xff] }
 0x134   :  { %v2552_v51 = vmax.f32 %v2488_v56, 0.0  ;;  %v4910_v47 = vadd.f32 %v4528_v34, %v4602_v54  ;;  %v4914_v38 = vadd.f32 %v4617_v7, %v4528_v34  ;;  %v2487_v52 = vadd.f32 3.0, %v4892_v60  ;;  %v4935_v13 = vld [vmem:[#allocation2 + $0x99] sm:$0xff] }
 0x135   :  { %7953 = vst [vmem:[#allocation26_spill] sm:$0xff] %v4906_v16  ;;  %v2614_v59 = vmin.f32 %v2550_v44, 6.0  ;;  %v1419_v28 = vadd.f32 %v1355_v24, %v1286_v27  ;;  %v1622_v48 = vadd.f32 %v1558_v33, %v1417_v18  ;;  %v4920_v0 = vadd.f32 %v4711_v50, %v2357_v32 }
 0x136   :  { %v2094_v42 = vadd.f32 %v4827_v3, %v1889_v62  ;;  %v808_v54 = vmul.f32 %v744_v11, %v4790_v22  ;;  %v742_v56 = vmul.f32 0.16666667, %v678_v41  ;;  %v2225_v44 = vadd.f32 %v4838_v15, %v2092_v25  ;;  %v4942_v25 = vld [vmem:[#allocation2 + $0x92] sm:$0xff]  ;;  %v4947_v41 = vpop.f32.mrb[36].mxu0 }
 0x137   :  { %v1624_v7 = vadd.f32 %v4821_v29, %v1419_v28  ;;  %v1755_v20 = vadd.f32 %v4824_v63, %v1622_v48  ;;  %v553_v27 = vadd.f32 3.0, %v343_v37  ;;  %v1693_v33 = vmul.f32 %v4591_v45, %v4917_v57  ;;  %7954 = vst [vmem:[#allocation27_spill] sm:$0xff] %v4947_v41 }
 0x138   :  { %953 = vst.msk [vmem:[#allocation2 + $0xc1] sm:$0xff] %vm858_vm1, %v808_v54  ;;  %v806_v18 = vmul.f32 %v742_v56, %v4794_v8  ;;  %v551_v32 = vadd.f32 3.0, %v4910_v47  ;;  %v556_v3 = vadd.f32 3.0, %v4914_v38  ;;  %v2551_v22 = vmax.f32 %v2487_v52, 0.0 }
 0x139   :  { %v1824_v29 = vmul.f32 %v4612_v61, %v4917_v57  ;;  %v2163_v63 = vmul.f32 %v4651_v10, %v4922_v1  ;;  %v617_v15 = vmax.f32 %v553_v27, 0.0  ;;  %v2489_v30 = vadd.f32 3.0, %v4920_v0 }
 0x13a   :  { %v2678_v62 = vmul.f32 0.16666667, %v2614_v59  ;;  %v1757_v8 = vadd.f32 %v1693_v33, %v1624_v7  ;;  %v2294_v11 = vmul.f32 %v4671_v4, %v4922_v1  ;;  %951 = vst.msk [vmem:[#allocation2 + $0xa9] sm:$0xff] %vm858_vm1, %v806_v18  ;;  %v2029_v24 = vmul.f32 %v4624_v9, %v4832_v58 }
 0x13b   :  { %v1888_v52 = vadd.f32 %v1824_v29, %v1755_v20  ;;  %v2227_v28 = vadd.f32 %v2163_v63, %v2094_v42  ;;  %v681_v48 = vmin.f32 %v617_v15, 6.0  ;;  %v1826_v54 = vmul.f32 %v4612_v61, %v4935_v13 }
 0x13c   :  { %v2358_v59 = vadd.f32 %v2294_v11, %v2225_v44  ;;  %v615_v56 = vmax.f32 %v551_v32, 0.0  ;;  %v620_v27 = vmax.f32 %v556_v3, 0.0  ;;  %v2615_v7 = vmin.f32 %v2551_v22, 6.0 }
 0x13d   :  { %v2616_v33 = vmin.f32 %v2552_v51, 6.0  ;;  %v2296_v39 = vmul.f32 %v4671_v4, %v4942_v25  ;;  %v745_v18 = vmul.f32 0.16666667, %v681_v48  ;;  %v2805_v41 = vsel %vm858_vm1, %v4906_v16, 0.0 }
 0x13e   :  { %v2553_v46 = vmax.f32 %v2489_v30, 0.0  ;;  %v4958_v58 = vmul.f32 %v2678_v62, %v4835_v43  ;;  %v1890_v42 = vadd.f32 %v1826_v54, %v1757_v8  ;;  %v2093_v20 = vadd.f32 %v2029_v24, %v1888_v52 }
 0x13f   :  { %v2360_v29 = vadd.f32 %v2296_v39, %v2227_v28  ;;  %v809_v63 = vmul.f32 %v745_v18, %v343_v37  ;;  %v4962_v44 = vadd.f32 %v4528_v34, %v4626_v12  ;;  %v4966_v51 = vmul.f32 %v4549_v14, %v4786_v55  ;;  %v4977_v12 = vld [vmem:[#allocation2 + $0x82] sm:$0xff]  ;;  %v4980_v39 = vpop.f32.mrb[37].mxu0 }
 0x140   :  { %7955 = vst [vmem:[#allocation28_spill] sm:$0xff] %v4958_v58  ;;  %v4969_v32 = vadd.f32 %v4711_v50, %v2358_v59  ;;  %v679_v3 = vmin.f32 %v615_v56, 6.0  ;;  %v684_v22 = vmin.f32 %v620_v27, 6.0  ;;  %v2679_v15 = vmul.f32 0.16666667, %v2615_v7 }
 0x141   :  { %v2680_v43 = vmul.f32 0.16666667, %v2616_v33  ;;  %v1223_v30 = vmul.f32 %v4556_v21, %v4786_v55  ;;  %v4975_v37 = vmul.f32 %v4576_v35, %v4868_v17  ;;  %954 = vst.msk [vmem:[#allocation2 + $0xc9] sm:$0xff] %vm858_vm1, %v809_v63  ;;  %v2806_v62 = vadd.f32 %v2805_v41, %v4878_v2  ;;  %v4986_v52 = vld [vmem:[#allocation2 + $0xa8] sm:$0xff] }
 0x142   :  { %v2617_v8 = vmin.f32 %v2553_v46, 6.0  ;;  %v1090_v11 = vmul.f32 %v4549_v14, %v4756_v49  ;;  %v2095_v24 = vadd.f32 %v4830_v5, %v1890_v42  ;;  %v2807_v55 = vsel %vm858_vm1, %v4958_v58, 0.0  ;;  %v4998_v5 = vpop.f32.mrb[38].mxu0 }
 0x143   :  { %v2226_v28 = vadd.f32 %v4865_v53, %v2093_v20  ;;  %v4992_v48 = vadd.f32 %v4711_v50, %v2360_v29  ;;  %v554_v54 = vadd.f32 3.0, %v4962_v44  ;;  %v2164_v2 = vmul.f32 %v4651_v10, %v4977_v12  ;;  %v1958_v53 = vld [vmem:[#allocation2 + $0x9a] sm:$0xff] }
 0x144   :  { %v2490_v46 = vadd.f32 3.0, %v4969_v32  ;;  %v743_v49 = vmul.f32 0.16666667, %v679_v3  ;;  %v748_v41 = vmul.f32 0.16666667, %v684_v22  ;;  %v5001_v59 = vmul.f32 %v2679_v15, %v4892_v60 }
 0x145   :  { %v5004_v56 = vmul.f32 %v2680_v43, %v4857_v40  ;;  %v2295_v27 = vmul.f32 %v4671_v4, %v4977_v12  ;;  %v1356_v7 = vmul.f32 %v4565_v26, %v4986_v52  ;;  %v2681_v33 = vmul.f32 0.16666667, %v2617_v8 }
 0x146   :  { %7956 = vst [vmem:[#allocation29_spill] sm:$0xff] %v5001_v59  ;;  %v1694_v18 = vmul.f32 %v4591_v45, %v4868_v17  ;;  %v1287_v42 = vadd.f32 %v1223_v30, %v1090_v11  ;;  %v2228_v20 = vadd.f32 %v2164_v2, %v2095_v24  ;;  %v2808_v29 = vadd.f32 %v2807_v55, %v2806_v62 }
 0x147   :  { %7957 = vst [vmem:[#allocation30_spill] sm:$0xff] %v5004_v56  ;;  %v2359_v63 = vadd.f32 %v2295_v27, %v2226_v28  ;;  %v2492_v60 = vadd.f32 3.0, %v4992_v48  ;;  %v618_v3 = vmax.f32 %v554_v54, 0.0  ;;  %v2297_v40 = vmul.f32 %v4671_v4, %v1958_v53  ;;  %v5036_v54 = vpop.f32.mrb[39].mxu0 }
 0x148   :  { %v2554_v22 = vmax.f32 %v2490_v46, 0.0  ;;  %v807_v15 = vmul.f32 %v743_v49, %v4910_v47  ;;  %v812_v43 = vmul.f32 %v748_v41, %v4914_v38  ;;  %v2809_v8 = vsel %vm858_vm1, %v5001_v59, 0.0 }
 0x149   :  { %v2811_v17 = vsel %vm858_vm1, %v5004_v56, 0.0  ;;  %v1561_v30 = vmul.f32 %v4576_v35, %v4844_v6  ;;  %v1420_v62 = vadd.f32 %v1356_v7, %v1287_v42  ;;  %v5023_v11 = vmul.f32 %v2681_v33, %v4920_v0 }
 0x14a   :  { %v1093_v24 = vmul.f32 %v4549_v14, %v4889_v36  ;;  %v1224_v47 = vmul.f32 %v4556_v21, %v4889_v36  ;;  %v2361_v38 = vadd.f32 %v2297_v40, %v2228_v20  ;;  %952 = vst.msk [vmem:[#allocation2 + $0xb1] sm:$0xff] %vm858_vm1, %v807_v15  ;;  %957 = vst.msk [vmem:[#allocation2 + $0xf1] sm:$0xff] %vm858_vm1, %v812_v43  ;;  %v2556_v28 = vmax.f32 %v2492_v60, 0.0 }
 0x14b   :  { %7958 = vst [vmem:[#allocation31_spill] sm:$0xff] %v5023_v11  ;;  %v5032_v55 = vadd.f32 %v4711_v50, %v2359_v63  ;;  %v1225_v6 = vmul.f32 %v4556_v21, %v4986_v52  ;;  %v682_v0 = vmin.f32 %v618_v3, 6.0  ;;  %v2810_v2 = vadd.f32 %v2809_v8, %v2808_v29  ;;  %v1019_v29 = vld [vmem:[#allocation2 + $0xc0] sm:$0xff]  ;;  %v1488_v8 = vld [vmem:[#allocation2 + $0xa9] sm:$0xff] }
 0x14c   :  { %v5040_v46 = vmul.f32 %v4576_v35, %v4935_v13  ;;  %v1091_v36 = vmul.f32 %v4549_v14, %v4872_v23  ;;  %v2618_v49 = vmin.f32 %v2554_v22, 6.0  ;;  %v1695_v41 = vmul.f32 %v4591_v45, %v4935_v13 }
 0x14d   :  { %v5048_v27 = vmul.f32 %v4624_v9, %v4942_v25  ;;  %v5051_v7 = vmul.f32 %v4624_v9, %v1958_v53  ;;  %v1625_v33 = vadd.f32 %v1561_v30, %v1420_v62  ;;  %v2813_v42 = vsel %vm858_vm1, %v5023_v11, 0.0 }
 0x14e   :  { %v5057_v20 = vmul.f32 %v4651_v10, %v4942_v25  ;;  %v5060_v23 = vmul.f32 %v4651_v10, %v1958_v53  ;;  %v5063_v13 = vadd.f32 %v4711_v50, %v2361_v38  ;;  %v2491_v63 = vadd.f32 3.0, %v5032_v55  ;;  %v1020_v38 = vld [vmem:[#allocation2 + $0xc8] sm:$0xff] }
 0x14f   :  { %v2620_v60 = vmin.f32 %v2556_v28, 6.0  ;;  %v1289_v3 = vadd.f32 %v1225_v6, %v4966_v51  ;;  %v746_v40 = vmul.f32 0.16666667, %v682_v0  ;;  %v2812_v22 = vadd.f32 %v2811_v17, %v2810_v2 }
 0x150   :  { %v1288_v15 = vadd.f32 %v1224_v47, %v1091_v36  ;;  %v1562_v43 = vmul.f32 %v4576_v35, %v4917_v57  ;;  %v2682_v25 = vmul.f32 0.16666667, %v2618_v49  ;;  %v2032_v53 = vmul.f32 %v4624_v9, %v4922_v1 }
 0x151   :  { %v1358_v30 = vmul.f32 %v4565_v26, %v1019_v29  ;;  %v1758_v62 = vadd.f32 %v1694_v18, %v1625_v33  ;;  %v5072_v11 = vld [vmem:[#allocation2 + $0xb0] sm:$0xff]  ;;  %v810_v28 = vmul.f32 %v746_v40, %v4962_v44  ;;  %v5077_v51 = vmul.f32 %v4624_v9, %v4977_v12  ;;  %v1490_v12 = vld [vmem:[#allocation2 + $0xc1] sm:$0xff] }
 0x152   :  { %v2493_v17 = vadd.f32 3.0, %v5063_v13  ;;  %v1226_v57 = vmul.f32 %v4556_v21, %v5072_v11  ;;  %v1357_v1 = vmul.f32 %v4565_v26, %v5072_v11  ;;  %v2555_v47 = vmax.f32 %v2491_v63, 0.0 }
 0x153   :  { %v2684_v6 = vmul.f32 0.16666667, %v2620_v60  ;;  %v1422_v18 = vadd.f32 %v1358_v30, %v1289_v3  ;;  %v1827_v0 = vmul.f32 %v4612_v61, %v1488_v8  ;;  %955 = vst.msk [vmem:[#allocation2 + $0xd9] sm:$0xff] %vm858_vm1, %v810_v28  ;;  %v5087_v44 = vmul.f32 %v2682_v25, %v4969_v32  ;;  %v5094_v3 = vpop.f32.mrb[40].mxu0  ;;  %v5098_v25 = vld [vmem:[#allocation2 + $0xb1] sm:$0xff] }
 0x154   :  { %v1359_v2 = vmul.f32 %v4565_v26, %v1020_v38  ;;  %v1290_v36 = vadd.f32 %v1226_v57, %v1093_v24  ;;  %v1421_v49 = vadd.f32 %v1357_v1, %v1288_v15  ;;  %v2814_v33 = vadd.f32 %v2813_v42, %v2812_v22  ;;  %v5100_v59 = vpop.f32.mrb[41].mxu0 }
 0x155   :  { %7959 = vst [vmem:[#allocation32_spill] sm:$0xff] %v5087_v44  ;;  %v5091_v40 = vmul.f32 %v4549_v14, %v1019_v29  ;;  %v1227_v63 = vmul.f32 %v4556_v21, %v1019_v29  ;;  %v1891_v60 = vadd.f32 %v1827_v0, %v1758_v62  ;;  %v2557_v30 = vmax.f32 %v2493_v17, 0.0  ;;  %7960 = vst [vmem:[#allocation33_spill] sm:$0xff] %v5100_v59 }
 0x156   :  { %v1094_v28 = vmul.f32 %v4549_v14, %v4986_v52  ;;  %v1423_v32 = vadd.f32 %v1359_v2, %v1290_v36  ;;  %v1626_v56 = vadd.f32 %v1562_v43, %v1421_v49  ;;  %v2619_v24 = vmin.f32 %v2555_v47, 6.0  ;;  %v1491_v2 = vld [vmem:[#allocation2 + $0xc9] sm:$0xff] }
 0x157   :  { %v5103_v42 = vmul.f32 %v4576_v35, %v1490_v12  ;;  %v5106_v22 = vmul.f32 %v4591_v45, %v1490_v12  ;;  %v1627_v29 = vadd.f32 %v4975_v37, %v1422_v18  ;;  %v5110_v15 = vmul.f32 %v2684_v6, %v4992_v48  ;;  %v5124_v37 = vld [vmem:[%s7882_s5] ss:$0 sm:$0xff] }
 0x158   :  { %v2815_v52 = vsel %vm858_vm1, %v5087_v44, 0.0  ;;  %v1759_v62 = vadd.f32 %v1695_v41, %v1626_v56  ;;  %v5116_v43 = vadd.f32 %v4634_v19, %v4528_v34  ;;  %v1696_v17 = vmul.f32 %v4591_v45, %v1488_v8 }
 0x159   :  { %7961 = vst [vmem:[#allocation34_spill] sm:$0xff] %v5110_v15  ;;  %v2096_v57 = vadd.f32 %v2032_v53, %v1891_v60  ;;  %v1828_v1 = vmul.f32 %v4612_v61, %v5098_v25  ;;  %v5128_v48 = vadd.f32 %v5124_v37, %v4640_v31  ;;  %v2621_v56 = vmin.f32 %v2557_v30, 6.0  ;;  %v5134_v53 = vpop.f32.mrb[42].mxu0 }
 0x15a   :  { %v1829_v41 = vmul.f32 %v4612_v61, %v1490_v12  ;;  %v1291_v34 = vadd.f32 %v1227_v63, %v1094_v28  ;;  %v1628_v19 = vadd.f32 %v5040_v46, %v1423_v32  ;;  %v5132_v47 = vld [vmem:[#allocation2 + $0xd8] sm:$0xff]  ;;  %7962 = vst [vmem:[#allocation35_spill] sm:$0xff] %v5134_v53  ;;  %v2683_v6 = vmul.f32 0.16666667, %v2619_v24  ;;  %v5145_v46 = vld [vmem:[#allocation2 + $0xaa] sm:$0xff] }
 0x15b   :  { %v1565_v18 = vmul.f32 %v4576_v35, %v1488_v8  ;;  %v1760_v0 = vadd.f32 %v1696_v17, %v1627_v29  ;;  %v1892_v36 = vadd.f32 %v1828_v1, %v1759_v62  ;;  %v5137_v49 = vadd.f32 %v2815_v52, %v2814_v33  ;;  %v1961_v62 = vld [vmem:[#allocation2 + $0xc2] sm:$0xff]  ;;  %v1962_v17 = vld [vmem:[#allocation2 + $0xca] sm:$0xff] }
 0x15c   :  { %v5141_v31 = vsel %vm858_vm1, %v5110_v15, 0.0  ;;  %v1697_v12 = vmul.f32 %v4591_v45, %v5098_v25  ;;  %v557_v63 = vadd.f32 3.0, %v5116_v43  ;;  %v5149_v60 = vmul.f32 %v4549_v14, %v1020_v38  ;;  %v5187_v15 = vld [vmem:[#allocation2 + $0xf0] sm:$0xff] }
 0x15d   :  { %v2229_v8 = vadd.f32 %v5057_v20, %v2096_v57  ;;  %v1360_v33 = vmul.f32 %v4565_v26, %v5132_v47  ;;  %v555_v30 = vadd.f32 3.0, %v5128_v48  ;;  %v2685_v28 = vmul.f32 0.16666667, %v2621_v56 }
 0x15e   :  { %v5156_v32 = vmul.f32 %v4556_v21, %v1020_v38  ;;  %v5159_v24 = vmul.f32 %v4576_v35, %v1491_v2  ;;  %v1761_v29 = vadd.f32 %v1697_v12, %v1628_v19  ;;  %v5162_v52 = vmul.f32 %v2683_v6, %v5032_v55  ;;  %v7964_v35 = vld [vmem:[#allocation9_spill] sm:$0xff]  ;;  %v5183_v12 = vld [vmem:[#allocation2 + $0xb2] sm:$0xff] }
 0x15f   :  { %v1893_v14 = vadd.f32 %v1829_v41, %v1760_v0  ;;  %v2097_v20 = vadd.f32 %v5077_v51, %v1892_v36  ;;  %v2298_v26 = vmul.f32 %v4671_v4, %v5145_v46  ;;  %v1830_v57 = vmul.f32 %v4612_v61, %v1491_v2 }
 0x160   :  { %7963 = vst [vmem:[#allocation36_spill] sm:$0xff] %v5162_v52  ;;  %v1229_v38 = vmul.f32 %v4556_v21, %v5132_v47  ;;  %v621_v1 = vmax.f32 %v557_v63, 0.0  ;;  %v5172_v56 = vadd.f32 %v5124_v37, %v7964_v35  ;;  %v5175_v55 = vmul.f32 %v4591_v45, %v1491_v2  ;;  %v7965_v2 = vld [vmem:[#allocation10_spill] sm:$0xff] }
 0x161   :  { %v2362_v41 = vadd.f32 %v2298_v26, %v2229_v8  ;;  %v1424_v19 = vadd.f32 %v1360_v33, %v1291_v34  ;;  %v619_v6 = vmax.f32 %v555_v30, 0.0  ;;  %v5178_v51 = vmul.f32 %v4624_v9, %v1961_v62  ;;  %v5195_v26 = vpop.f32.mrb[43].mxu0 }
 0x162   :  { %v5181_v0 = vmul.f32 %v4624_v9, %v1962_v17  ;;  %v1894_v36 = vadd.f32 %v1830_v57, %v1761_v29  ;;  %v685_v21 = vmin.f32 %v621_v1, 6.0  ;;  %v2098_v63 = vadd.f32 %v5048_v27, %v1893_v14  ;;  %7966 = vst [vmem:[#allocation9_spill] sm:$0xff] %v5195_v26 }
 0x163   :  { %v2230_v35 = vadd.f32 %v5060_v23, %v2097_v20  ;;  %v683_v45 = vmin.f32 %v619_v6, 6.0  ;;  %v364_v34 = vadd.f32 %v5124_v37, %v7965_v2  ;;  %v2167_v8 = vmul.f32 %v4651_v10, %v5145_v46 }
 0x164   :  { %v1293_v33 = vadd.f32 %v1229_v38, %v5091_v40  ;;  %v749_v30 = vmul.f32 0.16666667, %v685_v21  ;;  %v560_v29 = vadd.f32 3.0, %v5172_v56  ;;  %v2299_v27 = vmul.f32 %v4671_v4, %v5183_v12  ;;  %v5211_v38 = vld [vmem:[%s7882_s5 + $0xb] ss:$0 sm:$0xff] }
 0x165   :  { %v5200_v23 = vadd.f32 %v4711_v50, %v2362_v41  ;;  %v1629_v14 = vadd.f32 %v1565_v18, %v1424_v19  ;;  %v747_v20 = vmul.f32 0.16666667, %v683_v45  ;;  %v5203_v57 = vmul.f32 %v2685_v28, %v5063_v13  ;;  %v5219_v45 = vld [vmem:[#allocation2 + $0xd9] sm:$0xff] }
 0x166   :  { %v2817_v1 = vsel %vm858_vm1, %v5162_v52, 0.0  ;;  %v2099_v40 = vadd.f32 %v5051_v7, %v1894_v36  ;;  %v1362_v6 = vmul.f32 %v5211_v38, %v5187_v15  ;;  %v2231_v41 = vadd.f32 %v2167_v8, %v2098_v63 }
 0x167   :  { %7967 = vst [vmem:[#allocation10_spill] sm:$0xff] %v5203_v57  ;;  %v2363_v21 = vadd.f32 %v2299_v27, %v2230_v35  ;;  %v813_v18 = vmul.f32 %v749_v30, %v5116_v43  ;;  %v811_v13 = vmul.f32 %v747_v20, %v5128_v48  ;;  %v2168_v28 = vmul.f32 %v4651_v10, %v5183_v12 }
 0x168   :  { %v1426_v19 = vadd.f32 %v1362_v6, %v1293_v33  ;;  %v624_v7 = vmax.f32 %v560_v29, 0.0  ;;  %v558_v36 = vadd.f32 3.0, %v364_v34  ;;  %v5222_v2 = vmul.f32 %v4651_v10, %v1961_v62 }
 0x169   :  { %v2300_v52 = vmul.f32 %v4671_v4, %v1961_v62  ;;  %v2494_v63 = vadd.f32 3.0, %v5200_v23  ;;  %v1762_v35 = vadd.f32 %v5106_v22, %v1629_v14  ;;  %958 = vst.msk [vmem:[#allocation2 + $0xf9] sm:$0xff] %vm858_vm1, %v813_v18  ;;  %956 = vst.msk [vmem:[#allocation2 + $0xe1] sm:$0xff] %vm858_vm1, %v811_v13  ;;  %v2818_v43 = vadd.f32 %v2817_v1, %v5137_v49  ;;  %v5243_v49 = vld [vmem:[%s7882_s5 + $0x5] ss:$0 sm:$0xff] }
 0x16a   :  { %v2232_v48 = vadd.f32 %v2168_v28, %v2099_v40  ;;  %v688_v8 = vmin.f32 %v624_v7, 6.0  ;;  %v622_v33 = vmax.f32 %v558_v36, 0.0  ;;  %v5231_v30 = vmul.f32 %v4651_v10, %v1962_v17  ;;  %v7968_v40 = vld [vmem:[#allocation11_spill] sm:$0xff] }
 0x16b   :  { %v2364_v29 = vadd.f32 %v2300_v52, %v2231_v41  ;;  %v5234_v27 = vadd.f32 %v4711_v50, %v2363_v21  ;;  %v1831_v62 = vmul.f32 %v4612_v61, %v5219_v45  ;;  %v2301_v22 = vmul.f32 %v4671_v4, %v1962_v17  ;;  %v5266_v7 = vld [vmem:[#allocation2 + $0xf1] sm:$0xff] }
 0x16c   :  { %v1631_v14 = vadd.f32 %v5103_v42, %v1426_v19  ;;  %v752_v20 = vmul.f32 0.16666667, %v688_v8  ;;  %v686_v6 = vmin.f32 %v622_v33, 6.0  ;;  %v1095_v10 = vmul.f32 %v5243_v49, %v5072_v11  ;;  %v5254_v42 = vld [vmem:[%s7882_s5 + $0x9] ss:$0 sm:$0xff]  ;;  %v7969_v8 = vld [vmem:[#allocation12_spill] sm:$0xff] }
 0x16d   :  { %v2558_v52 = vmax.f32 %v2494_v63, 0.0  ;;  %v1895_v1 = vadd.f32 %v1831_v62, %v1762_v35  ;;  %v5249_v41 = vadd.f32 %v5124_v37, %v7968_v40  ;;  %v2365_v61 = vadd.f32 %v2301_v22, %v2232_v48  ;;  %v5301_v22 = vld [vmem:[%s7882_s5 + $0xc] ss:$0 sm:$0xff]  ;;  %v5318_v40 = vld [vmem:[%s7882_s5 + $0x8] ss:$0 sm:$0xff] }
 0x16e   :  { %v1700_v17 = vmul.f32 %v5254_v42, %v5219_v45  ;;  %v816_v21 = vmul.f32 %v752_v20, %v5172_v56  ;;  %v750_v18 = vmul.f32 0.16666667, %v686_v6  ;;  %v2820_v11 = vadd.f32 %v5141_v31, %v2818_v43  ;;  %v5273_v56 = vld [vmem:[%s7882_s5 + $0x6] ss:$0 sm:$0xff] }
 0x16f   :  { %v2036_v13 = vmul.f32 %v4624_v9, %v5145_v46  ;;  %v5263_v28 = vadd.f32 %v4711_v50, %v2364_v29  ;;  %v2495_v19 = vadd.f32 3.0, %v5234_v27  ;;  %v2821_v36 = vsel %vm858_vm1, %v5203_v57, 0.0 }
 0x170   :  { %v1566_v31 = vmul.f32 %v5273_v56, %v5098_v25  ;;  %v1764_v63 = vadd.f32 %v1700_v17, %v1631_v14  ;;  %961 = vst.msk [vmem:[#allocation2 + $0x121] sm:$0xff] %vm858_vm1, %v816_v21  ;;  %v814_v9 = vmul.f32 %v750_v18, %v364_v34  ;;  %v2622_v46 = vmin.f32 %v2558_v52, 6.0  ;;  %v5278_v43 = vld [vmem:[#allocation2 + $0xe0] sm:$0xff]  ;;  %v7971_v18 = vld [vmem:[#allocation14_spill] sm:$0xff] }
 0x171   :  { %v2100_v35 = vadd.f32 %v2036_v13, %v1895_v1  ;;  %v561_v48 = vadd.f32 3.0, %v5249_v41  ;;  %v5283_v33 = vadd.f32 %v5124_v37, %v7969_v8  ;;  %v1292_v29 = vadd.f32 %v5156_v32, %v1095_v10  ;;  %v5289_v25 = vld [vmem:[%s7882_s5 + $0x7] ss:$0 sm:$0xff]  ;;  %v5324_v21 = vld [vmem:[#allocation2 + $0xda] sm:$0xff] }
 0x172   :  { %v5293_v34 = vmul.f32 %v5289_v25, %v5183_v12  ;;  %v5296_v62 = vadd.f32 %v4711_v50, %v2365_v61  ;;  %v1833_v32 = vmul.f32 %v5301_v22, %v5266_v7  ;;  %959 = vst.msk [vmem:[#allocation2 + $0x109] sm:$0xff] %vm858_vm1, %v814_v9  ;;  %v2496_v14 = vadd.f32 3.0, %v5263_v28  ;;  %v5309_v12 = vld [vmem:[#allocation2 + $0xf8] sm:$0xff]  ;;  %v7970_v10 = vld [vmem:[#allocation13_spill] sm:$0xff]  ;;  %v5332_v9 = vpop.f32.mrb[44].mxu0 }
 0x173   :  { %v2559_v20 = vmax.f32 %v2495_v19, 0.0  ;;  %v5307_v6 = vadd.f32 %v2821_v36, %v2820_v11  ;;  %v5313_v52 = vadd.f32 %v5124_v37, %v7970_v10  ;;  %v1230_v61 = vmul.f32 %v5318_v40, %v5278_v43  ;;  %7972 = vst [vmem:[#allocation11_spill] sm:$0xff] %v5332_v9  ;;  %v5338_v44 = vpop.f32.mrb[45].mxu0 }
 0x174   :  { %v1897_v1 = vadd.f32 %v1833_v32, %v1764_v63  ;;  %v1361_v17 = vmul.f32 %v5211_v38, %v5278_v43  ;;  %v5328_v11 = vadd.f32 %v5124_v37, %v7971_v18  ;;  %v2686_v13 = vmul.f32 0.16666667, %v2622_v46  ;;  %7973 = vst [vmem:[#allocation12_spill] sm:$0xff] %v5338_v44 }
 0x175   :  { %v2233_v19 = vadd.f32 %v5222_v2, %v2100_v35  ;;  %v625_v36 = vmax.f32 %v561_v48, 0.0  ;;  %v559_v63 = vadd.f32 3.0, %v5283_v33  ;;  %v2497_v8 = vadd.f32 3.0, %v5296_v62  ;;  %v5343_v48 = vld [vmem:[#allocation2 + $0xe1] sm:$0xff] }
 0x176   :  { %v1363_v32 = vmul.f32 %v5211_v38, %v5309_v12  ;;  %v1294_v10 = vadd.f32 %v1230_v61, %v5149_v60  ;;  %v1425_v57 = vadd.f32 %v1361_v17, %v1292_v29  ;;  %v2560_v18 = vmax.f32 %v2496_v14, 0.0 }
 0x177   :  { %v2623_v58 = vmin.f32 %v2559_v20, 6.0  ;;  %v2302_v2 = vmul.f32 %v4671_v4, %v5324_v21  ;;  %v564_v46 = vadd.f32 3.0, %v5313_v52  ;;  %v2102_v9 = vadd.f32 %v5178_v51, %v1897_v1  ;;  %v5350_v20 = vpop.f32.mrb[46].mxu0  ;;  %v5402_v53 = vld [vmem:[#allocation2 + $0x120] sm:$0xff] }
 0x178   :  { %v1427_v35 = vadd.f32 %v1363_v32, %v1294_v10  ;;  %v1630_v16 = vadd.f32 %v1566_v31, %v1425_v57  ;;  %v562_v26 = vadd.f32 3.0, %v5328_v11  ;;  %v5348_v60 = vmul.f32 %v2686_v13, %v5200_v23  ;;  %7975 = vst [vmem:[#allocation14_spill] sm:$0xff] %v5350_v20  ;;  %v5357_v57 = vld [vmem:[%s7882_s5 + $0xa] ss:$0 sm:$0xff]  ;;  %v5361_v31 = vld [vmem:[#allocation2 + $0xf2] sm:$0xff] }
 0x179   :  { %v2366_v29 = vadd.f32 %v2302_v2, %v2233_v19  ;;  %v689_v61 = vmin.f32 %v625_v36, 6.0  ;;  %v623_v14 = vmax.f32 %v559_v63, 0.0  ;;  %v2561_v17 = vmax.f32 %v2497_v8, 0.0  ;;  %v5374_v10 = vld [vmem:[#allocation2 + $0x108] sm:$0xff] }
 0x17a   :  { %7974 = vst [vmem:[#allocation13_spill] sm:$0xff] %v5348_v60  ;;  %v1632_v4 = vadd.f32 %v5159_v24, %v1427_v35  ;;  %v1763_v32 = vadd.f32 %v5175_v55, %v1630_v16  ;;  %v2171_v51 = vmul.f32 %v5357_v57, %v5324_v21  ;;  %v2687_v23 = vmul.f32 0.16666667, %v2623_v58  ;;  %v5369_v55 = vld [vmem:[#allocation2 + $0xf9] sm:$0xff] }
 0x17b   :  { %v1701_v1 = vmul.f32 %v5254_v42, %v5343_v48  ;;  %v1832_v13 = vmul.f32 %v5301_v22, %v5343_v48  ;;  %v628_v24 = vmax.f32 %v564_v46, 0.0  ;;  %v1231_v16 = vmul.f32 %v5318_v40, %v5187_v15 }
 0x17c   :  { %v2235_v19 = vadd.f32 %v2171_v51, %v2102_v9  ;;  %v5372_v36 = vadd.f32 %v4711_v50, %v2366_v29  ;;  %v626_v63 = vmax.f32 %v562_v26, 0.0  ;;  %v753_v2 = vmul.f32 0.16666667, %v689_v61  ;;  %v5383_v9 = vld [vmem:[%s7882_s5 + $0xd] ss:$0 sm:$0xff] }
 0x17d   :  { %v1765_v58 = vadd.f32 %v1701_v1, %v1632_v4  ;;  %v1896_v8 = vadd.f32 %v1832_v13, %v1763_v32  ;;  %v687_v35 = vmin.f32 %v623_v14, 6.0  ;;  %v2624_v20 = vmin.f32 %v2560_v18, 6.0 }
 0x17e   :  { %v2823_v46 = vsel %vm858_vm1, %v5348_v60, 0.0  ;;  %v1098_v44 = vmul.f32 %v5243_v49, %v5132_v47  ;;  %v2304_v50 = vmul.f32 %v5383_v9, %v5361_v31  ;;  %v2625_v26 = vmin.f32 %v2561_v17, 6.0 }
 0x17f   :  { %v5388_v29 = vmul.f32 %v2687_v23, %v5234_v27  ;;  %v1834_v18 = vmul.f32 %v5301_v22, %v5369_v55  ;;  %v692_v61 = vmin.f32 %v628_v24, 6.0  ;;  %v2498_v4 = vadd.f32 3.0, %v5372_v36 }
 0x180   :  { %v2368_v14 = vadd.f32 %v2304_v50, %v2235_v19  ;;  %v1233_v47 = vmul.f32 %v5318_v40, %v5374_v10  ;;  %v690_v32 = vmin.f32 %v626_v63, 6.0  ;;  %v2101_v1 = vadd.f32 %v5293_v34, %v1896_v8 }
 0x181   :  { %7976 = vst [vmem:[#allocation37_spill] sm:$0xff] %v5388_v29  ;;  %v1898_v51 = vadd.f32 %v1834_v18, %v1765_v58  ;;  %v817_v13 = vmul.f32 %v753_v2, %v5249_v41  ;;  %v751_v17 = vmul.f32 0.16666667, %v687_v35  ;;  %v2688_v60 = vmul.f32 0.16666667, %v2624_v20  ;;  %v5408_v20 = vld [vmem:[#allocation2 + $0xe2] sm:$0xff] }
 0x182   :  { %v1100_v27 = vmul.f32 %v5243_v49, %v5187_v15  ;;  %v1295_v23 = vadd.f32 %v1231_v16, %v1098_v44  ;;  %v1364_v24 = vmul.f32 %v5211_v38, %v5374_v10  ;;  %v2689_v19 = vmul.f32 0.16666667, %v2625_v26  ;;  %v5413_v44 = vld [vmem:[%s7882_s5 + $0x1] ss:$0 sm:$0xff] }
 0x183   :  { %v2824_v50 = vadd.f32 %v2823_v46, %v5307_v6  ;;  %962 = vst.msk [vmem:[#allocation2 + $0x129] sm:$0xff] %vm858_vm1, %v817_v13  ;;  %v815_v34 = vmul.f32 %v751_v17, %v5283_v33  ;;  %v756_v63 = vmul.f32 0.16666667, %v692_v61  ;;  %v2825_v41 = vsel %vm858_vm1, %v5388_v29, 0.0  ;;  %v5436_v61 = vpop.f32.mrb[47].mxu0 }
 0x184   :  { %v5416_v15 = vadd.f32 %v5413_v44, %v2368_v14  ;;  %v2562_v6 = vmax.f32 %v2498_v4, 0.0  ;;  %v1297_v16 = vadd.f32 %v1233_v47, %v1100_v27  ;;  %v2103_v58 = vadd.f32 %v5181_v0, %v1898_v51  ;;  %7979 = vst [vmem:[#allocation40_spill] sm:$0xff] %v5436_v61  ;;  %v1966_v14 = vld [vmem:[#allocation2 + $0xfa] sm:$0xff] }
 0x185   :  { %v2234_v33 = vadd.f32 %v5231_v30, %v2101_v1  ;;  %960 = vst.msk [vmem:[#allocation2 + $0x111] sm:$0xff] %vm858_vm1, %v815_v34  ;;  %v820_v8 = vmul.f32 %v756_v63, %v5313_v52  ;;  %v754_v2 = vmul.f32 0.16666667, %v690_v32  ;;  %v5423_v35 = vmul.f32 %v2688_v60, %v5263_v28  ;;  %v7980_v34 = vld [vmem:[#allocation15_spill] sm:$0xff] }
 0x186   :  { %v1366_v46 = vmul.f32 %v5211_v38, %v5402_v53  ;;  %v1428_v26 = vadd.f32 %v1364_v24, %v1295_v23  ;;  %v5428_v18 = vmul.f32 %v2689_v19, %v5296_v62  ;;  %v2172_v0 = vmul.f32 %v5357_v57, %v5408_v20  ;;  %v1496_v23 = vld [vmem:[#allocation2 + $0x109] sm:$0xff] }
 0x187   :  { %7977 = vst [vmem:[#allocation38_spill] sm:$0xff] %v5423_v35  ;;  %v2303_v30 = vmul.f32 %v5383_v9, %v5408_v20  ;;  %965 = vst.msk [vmem:[#allocation2 + $0x151] sm:$0xff] %vm858_vm1, %v820_v8  ;;  %v818_v52 = vmul.f32 %v754_v2, %v5328_v11  ;;  %v2826_v28 = vadd.f32 %v2825_v41, %v2824_v50  ;;  %v2500_v62 = vadd.f32 3.0, %v5416_v15 }
 0x188   :  { %7978 = vst [vmem:[#allocation39_spill] sm:$0xff] %v5428_v18  ;;  %v1569_v60 = vmul.f32 %v5273_v56, %v5219_v45  ;;  %v1430_v4 = vadd.f32 %v1366_v46, %v1297_v16  ;;  %v2236_v47 = vadd.f32 %v2172_v0, %v2103_v58  ;;  %v2626_v51 = vmin.f32 %v2562_v6, 6.0 }
 0x189   :  { %v2367_v32 = vadd.f32 %v2303_v30, %v2234_v33  ;;  %963 = vst.msk [vmem:[#allocation2 + $0x139] sm:$0xff] %vm858_vm1, %v818_v52  ;;  %v1571_v1 = vmul.f32 %v5273_v56, %v5266_v7  ;;  %v2827_v11 = vsel %vm858_vm1, %v5423_v35, 0.0  ;;  %v2829_v17 = vsel %vm858_vm1, %v5428_v18, 0.0  ;;  %v1498_v52 = vld [vmem:[#allocation2 + $0x121] sm:$0xff]  ;;  %v7985_v35 = vld [vmem:[#allocation16_spill] sm:$0xff] }
 0x18a   :  { %v1633_v13 = vadd.f32 %v1569_v60, %v1428_v26  ;;  %v1702_v45 = vmul.f32 %v5254_v42, %v5266_v7  ;;  %v2305_v27 = vmul.f32 %v5383_v9, %v1966_v14  ;;  %v2828_v24 = vadd.f32 %v2827_v11, %v2826_v28  ;;  %v5568_v29 = vld [vmem:[#allocation2 + $0x12a] sm:$0xff] }
 0x18b   :  { %v2564_v19 = vmax.f32 %v2500_v62, 0.0  ;;  %v1635_v50 = vadd.f32 %v1571_v1, %v1430_v4  ;;  %v5453_v63 = vadd.f32 %v5124_v37, %v7980_v34  ;;  %v5457_v41 = vmul.f32 %v5243_v49, %v5309_v12 }
 0x18c   :  { %v2369_v6 = vadd.f32 %v2305_v27, %v2236_v47  ;;  %v5460_v16 = vadd.f32 %v5413_v44, %v2367_v32  ;;  %v2690_v58 = vmul.f32 0.16666667, %v2626_v51  ;;  %v1232_v7 = vmul.f32 %v5318_v40, %v5309_v12  ;;  %v5469_v46 = vld [vmem:[#allocation2 + $0x110] sm:$0xff] }
 0x18d   :  { %v5466_v33 = vmul.f32 %v5273_v56, %v5369_v55  ;;  %v1704_v8 = vmul.f32 %v5254_v42, %v1496_v23  ;;  %v1766_v2 = vadd.f32 %v1702_v45, %v1633_v13  ;;  %v5473_v26 = vmul.f32 %v5254_v42, %v5369_v55 }
 0x18e   :  { %v2042_v0 = vmul.f32 %v5289_v25, %v5361_v31  ;;  %v5478_v30 = vmul.f32 %v5289_v25, %v1966_v14  ;;  %v1099_v12 = vmul.f32 %v5243_v49, %v5278_v43  ;;  %v2173_v28 = vmul.f32 %v5357_v57, %v5361_v31  ;;  %v5494_v43 = vpop.f32.mrb[48].mxu0 }
 0x18f   :  { %v2628_v60 = vmin.f32 %v2564_v19, 6.0  ;;  %v1768_v62 = vadd.f32 %v1704_v8, %v1635_v50  ;;  %v1835_v4 = vmul.f32 %v5301_v22, %v1496_v23  ;;  %v5486_v55 = vadd.f32 %v5413_v44, %v2369_v6  ;;  %7982 = vst [vmem:[#allocation41_spill] sm:$0xff] %v5494_v43  ;;  %v5501_v45 = vpop.f32.mrb[49].mxu0 }
 0x190   :  { %v2499_v47 = vadd.f32 3.0, %v5460_v16  ;;  %v5490_v32 = vmul.f32 %v2690_v58, %v5372_v36  ;;  %v1365_v51 = vmul.f32 %v5211_v38, %v5469_v46  ;;  %v5497_v1 = vmul.f32 %v5357_v57, %v1966_v14  ;;  %7983 = vst [vmem:[#allocation42_spill] sm:$0xff] %v5501_v45 }
 0x191   :  { %v1837_v31 = vmul.f32 %v5301_v22, %v1498_v52  ;;  %v1899_v13 = vadd.f32 %v1835_v4, %v1766_v2  ;;  %v565_v11 = vadd.f32 3.0, %v5453_v63  ;;  %v1296_v27 = vadd.f32 %v1232_v7, %v1099_v12 }
 0x192   :  { %7981 = vst [vmem:[#allocation15_spill] sm:$0xff] %v5490_v32  ;;  %v1570_v36 = vmul.f32 %v5273_v56, %v5343_v48  ;;  %v1235_v19 = vmul.f32 %v5318_v40, %v5402_v53  ;;  %v1102_v50 = vmul.f32 %v5243_v49, %v5374_v10  ;;  %v2040_v14 = vmul.f32 %v5289_v25, %v5324_v21  ;;  %v5514_v48 = vpop.f32.mrb[50].mxu0 }
 0x193   :  { %v2692_v34 = vmul.f32 0.16666667, %v2628_v60  ;;  %v2830_v6 = vadd.f32 %v2829_v17, %v2828_v24  ;;  %v1901_v58 = vadd.f32 %v1837_v31, %v1768_v62  ;;  %v2501_v8 = vadd.f32 3.0, %v5486_v55  ;;  %7984 = vst [vmem:[#allocation43_spill] sm:$0xff] %v5514_v48  ;;  %v7987_v31 = vld [vmem:[#allocation17_spill] sm:$0xff]  ;;  %v5574_v48 = vld [vmem:[#allocation2 + $0x10a] sm:$0xff] }
 0x194   :  { %v2563_v2 = vmax.f32 %v2499_v47, 0.0  ;;  %v2831_v7 = vsel %vm858_vm1, %v5490_v32, 0.0  ;;  %v1429_v12 = vadd.f32 %v1365_v51, %v1296_v27  ;;  %v5518_v4 = vmul.f32 %v5289_v25, %v5408_v20 }
 0x195   :  { %v2104_v10 = vadd.f32 %v2040_v14, %v1899_v13  ;;  %v629_v18 = vmax.f32 %v565_v11, 0.0  ;;  %v383_v21 = vadd.f32 %v5124_v37, %v7985_v35  ;;  %v5524_v17 = vmul.f32 %v5243_v49, %v5402_v53  ;;  %v1028_v35 = vld [vmem:[#allocation2 + $0x128] sm:$0xff] }
 0x196   :  { %v5527_v24 = vmul.f32 %v5273_v56, %v1498_v52  ;;  %v5530_v60 = vmul.f32 %v5254_v42, %v1498_v52  ;;  %v5532_v62 = vadd.f32 %v1235_v19, %v1102_v50  ;;  %v5535_v20 = vmul.f32 %v2692_v34, %v5416_v15  ;;  %v1499_v52 = vld [vmem:[#allocation2 + $0x129] sm:$0xff] }
 0x197   :  { %v5537_v47 = vadd.f32 %v2831_v7, %v2830_v6  ;;  %v5540_v51 = vmul.f32 %v5273_v56, %v1496_v23  ;;  %v404_v53 = vadd.f32 %v5124_v37, %v7987_v31  ;;  %v2565_v13 = vmax.f32 %v2501_v8, 0.0  ;;  %v7988_v15 = vld [vmem:[#allocation18_spill] sm:$0xff] }
 0x198   :  { %7986 = vst [vmem:[#allocation16_spill] sm:$0xff] %v5535_v20  ;;  %v2627_v11 = vmin.f32 %v2563_v2, 6.0  ;;  %v1634_v27 = vadd.f32 %v1570_v36, %v1429_v12  ;;  %v5544_v14 = vadd.f32 %v2042_v0, %v1901_v58  ;;  %v2237_v19 = vadd.f32 %v2173_v28, %v2104_v10  ;;  %v7990_v36 = vld [vmem:[#allocation19_spill] sm:$0xff]  ;;  %v1969_v28 = vld [vmem:[#allocation2 + $0x122] sm:$0xff] }
 0x199   :  { %v693_v50 = vmin.f32 %v629_v18, 6.0  ;;  %v563_v32 = vadd.f32 3.0, %v383_v21  ;;  %v5548_v34 = vadd.f32 %v5124_v37, %v7988_v15  ;;  %v5551_v23 = vmul.f32 %v5243_v49, %v1028_v35  ;;  %v5563_v58 = vld [vmem:[#allocation2 + $0x111] sm:$0xff] }
 0x19a   :  { %v5554_v6 = vmul.f32 %v5318_v40, %v1028_v35  ;;  %v1234_v8 = vmul.f32 %v5318_v40, %v5469_v46  ;;  %v5560_v0 = vadd.f32 %v5124_v37, %v7990_v36  ;;  %v1367_v18 = vmul.f32 %v5211_v38, %v1028_v35 }
 0x19b   :  { %7989 = vst [vmem:[#allocation17_spill] sm:$0xff] %v5551_v23  ;;  %v757_v2 = vmul.f32 0.16666667, %v693_v50  ;;  %v627_v7 = vmax.f32 %v563_v32, 0.0  ;;  %v568_v12 = vadd.f32 3.0, %v404_v53  ;;  %v2629_v10 = vmin.f32 %v2565_v13, 6.0 }
 0x19c   :  { %v2691_v31 = vmul.f32 0.16666667, %v2627_v11  ;;  %v5566_v15 = vmul.f32 %v5273_v56, %v1499_v52  ;;  %v1767_v20 = vadd.f32 %v5473_v26, %v1634_v27  ;;  %v5572_v36 = vmul.f32 %v5254_v42, %v1499_v52 }
 0x19d   :  { %v821_v35 = vmul.f32 %v757_v2, %v5453_v63  ;;  %v691_v45 = vmin.f32 %v627_v7, 6.0  ;;  %v632_v50 = vmax.f32 %v568_v12, 0.0  ;;  %v5578_v32 = vmul.f32 %v5301_v22, %v1499_v52 }
 0x19e   :  { %7991 = vst [vmem:[#allocation18_spill] sm:$0xff] %v5566_v15  ;;  %7992 = vst [vmem:[#allocation19_spill] sm:$0xff] %v5572_v36  ;;  %v5581_v13 = vmul.f32 %v5289_v25, %v1969_v28  ;;  %v1298_v11 = vadd.f32 %v1234_v8, %v5457_v41  ;;  %v1836_v26 = vmul.f32 %v5301_v22, %v5563_v58  ;;  %v566_v7 = vadd.f32 3.0, %v5548_v34  ;;  %v5597_v8 = vld [vmem:[#allocation2 + $0x138] sm:$0xff] }
 0x19f   :  { %v5588_v27 = vmul.f32 %v5289_v25, %v5568_v29  ;;  %966 = vst.msk [vmem:[#allocation2 + $0x159] sm:$0xff] %vm858_vm1, %v821_v35  ;;  %v755_v63 = vmul.f32 0.16666667, %v691_v45  ;;  %v696_v2 = vmin.f32 %v632_v50, 6.0  ;;  %v5593_v52 = vmul.f32 %v5357_v57, %v1969_v28  ;;  %v7996_v15 = vld [vmem:[#allocation20_spill] sm:$0xff] }
 0x1a0   :  { %7993 = vst [vmem:[#allocation44_spill] sm:$0xff] %v5581_v13  ;;  %v1900_v12 = vadd.f32 %v1836_v26, %v1767_v20  ;;  %v2306_v41 = vmul.f32 %v5383_v9, %v5574_v48  ;;  %v569_v13 = vadd.f32 3.0, %v5560_v0  ;;  %v630_v50 = vmax.f32 %v566_v7, 0.0 }
 0x1a1   :  { %7994 = vst [vmem:[#allocation45_spill] sm:$0xff] %v5588_v27  ;;  %v5602_v27 = vmul.f32 %v5357_v57, %v5568_v29  ;;  %v819_v35 = vmul.f32 %v755_v63, %v383_v21  ;;  %v760_v45 = vmul.f32 0.16666667, %v696_v2  ;;  %v1431_v43 = vadd.f32 %v1367_v18, %v1298_v11  ;;  %v5614_v21 = vpop.f32.mrb[51].mxu0  ;;  %v7998_v11 = vld [vmem:[#allocation22_spill] sm:$0xff] }
 0x1a2   :  { %v2370_v61 = vadd.f32 %v2306_v41, %v2237_v19  ;;  %v633_v36 = vmax.f32 %v569_v13, 0.0  ;;  %v5606_v20 = vadd.f32 %v5124_v37, %v7996_v15  ;;  %v5609_v26 = vmul.f32 %v2691_v31, %v5460_v16 }
 0x1a3   :  { %7995 = vst [vmem:[#allocation46_spill] sm:$0xff] %v5602_v27  ;;  %v1368_v23 = vmul.f32 %v5211_v38, %v5597_v8  ;;  %964 = vst.msk [vmem:[#allocation2 + $0x141] sm:$0xff] %vm858_vm1, %v819_v35  ;;  %v824_v59 = vmul.f32 %v760_v45, %v404_v53  ;;  %v694_v27 = vmin.f32 %v630_v50, 6.0  ;;  %v2105_v18 = vadd.f32 %v5518_v4, %v1900_v12  ;;  %v7999_v53 = vld [vmem:[#allocation23_spill] sm:$0xff] }
 0x1a4   :  { %7997 = vst [vmem:[#allocation20_spill] sm:$0xff] %v5609_v26  ;;  %v697_v19 = vmin.f32 %v633_v36, 6.0  ;;  %v567_v13 = vadd.f32 3.0, %v5606_v20  ;;  %v5620_v15 = vadd.f32 %v5124_v37, %v7998_v11  ;;  %v2693_v16 = vmul.f32 0.16666667, %v2629_v10  ;;  %v1031_v45 = vld [vmem:[#allocation2 + $0x150] sm:$0xff] }
 0x1a5   :  { %v5623_v31 = vmul.f32 %v5383_v9, %v1969_v28  ;;  %969 = vst.msk [vmem:[#allocation2 + $0x181] sm:$0xff] %vm858_vm1, %v824_v59  ;;  %v758_v63 = vmul.f32 0.16666667, %v694_v27  ;;  %v5628_v2 = vadd.f32 %v5124_v37, %v7999_v53  ;;  %v1636_v4 = vadd.f32 %v5466_v33, %v1431_v43  ;;  %v1968_v27 = vld [vmem:[#allocation2 + $0x112] sm:$0xff]  ;;  %v8001_v53 = vld [vmem:[#allocation25_spill] sm:$0xff] }
 0x1a6   :  { %v5632_v36 = vadd.f32 %v5413_v44, %v2370_v61  ;;  %v1237_v7 = vmul.f32 %v5318_v40, %v5597_v8  ;;  %v761_v12 = vmul.f32 0.16666667, %v697_v19  ;;  %v2833_v28 = vsel %vm858_vm1, %v5609_v26, 0.0  ;;  %v8000_v11 = vld [vmem:[#allocation24_spill] sm:$0xff] }
 0x1a7   :  { %v1103_v59 = vmul.f32 %v5243_v49, %v5469_v46  ;;  %v1705_v10 = vmul.f32 %v5254_v42, %v5563_v58  ;;  %v631_v41 = vmax.f32 %v567_v13, 0.0  ;;  %v2238_v33 = vadd.f32 %v5497_v1, %v2105_v18 }
 0x1a8   :  { %v1432_v61 = vadd.f32 %v1368_v23, %v5532_v62  ;;  %v822_v43 = vmul.f32 %v758_v63, %v5548_v34  ;;  %v572_v35 = vadd.f32 3.0, %v5620_v15  ;;  %v825_v50 = vmul.f32 %v761_v12, %v5560_v0 }
 0x1a9   :  { %v570_v19 = vadd.f32 3.0, %v5628_v2  ;;  %v5650_v46 = vadd.f32 %v5124_v37, %v8000_v11  ;;  %v5654_v13 = vadd.f32 %v5124_v37, %v8001_v53  ;;  %v1769_v1 = vadd.f32 %v1705_v10, %v1636_v4  ;;  %v5679_v11 = vpop.f32.mrb[52].mxu0 }
 0x1aa   :  { %v2307_v62 = vmul.f32 %v5383_v9, %v1968_v27  ;;  %v2502_v34 = vadd.f32 3.0, %v5632_v36  ;;  %v1301_v23 = vadd.f32 %v1237_v7, %v5524_v17  ;;  %967 = vst.msk [vmem:[#allocation2 + $0x169] sm:$0xff] %vm858_vm1, %v822_v43  ;;  %v5661_v0 = vmul.f32 %v2693_v16, %v5486_v55  ;;  %970 = vst.msk [vmem:[#allocation2 + $0x189] sm:$0xff] %vm858_vm1, %v825_v50 }
 0x1ab   :  { %v5665_v18 = vmul.f32 %v5383_v9, %v5568_v29  ;;  %v5669_v63 = vmul.f32 %v5273_v56, %v5563_v58  ;;  %v695_v4 = vmin.f32 %v631_v41, 6.0  ;;  %v1370_v10 = vmul.f32 %v5211_v38, %v1031_v45 }
 0x1ac   :  { %8002 = vst [vmem:[#allocation22_spill] sm:$0xff] %v5661_v0  ;;  %v2371_v12 = vadd.f32 %v2307_v62, %v2238_v33  ;;  %v1637_v17 = vadd.f32 %v5540_v51, %v1432_v61  ;;  %v636_v7 = vmax.f32 %v572_v35, 0.0  ;;  %v5675_v55 = vadd.f32 %v2833_v28, %v5537_v47  ;;  %v1500_v61 = vld [vmem:[#allocation2 + $0x139] sm:$0xff] }
 0x1ad   :  { %v634_v16 = vmax.f32 %v570_v19, 0.0  ;;  %v573_v29 = vadd.f32 3.0, %v5650_v46  ;;  %v571_v43 = vadd.f32 3.0, %v5654_v13  ;;  %v5682_v58 = vadd.f32 %v5554_v6, %v1103_v59  ;;  %v1502_v59 = vld [vmem:[#allocation2 + $0x151] sm:$0xff] }
 0x1ae   :  { %8003 = vst [vmem:[#allocation23_spill] sm:$0xff] %v5675_v55  ;;  %v1902_v41 = vadd.f32 %v5578_v32, %v1769_v1  ;;  %v2566_v33 = vmax.f32 %v2502_v34, 0.0  ;;  %v1434_v50 = vadd.f32 %v1370_v10, %v1301_v23  ;;  %v2044_v51 = vmul.f32 %v5289_v25, %v5574_v48 }
 0x1af   :  { %v5688_v47 = vmul.f32 %v5289_v25, %v1968_v27  ;;  %v2175_v28 = vmul.f32 %v5357_v57, %v5574_v48  ;;  %v759_v35 = vmul.f32 0.16666667, %v695_v4  ;;  %v2176_v19 = vmul.f32 %v5357_v57, %v1968_v27 }
 0x1b0   :  { %v5694_v6 = vadd.f32 %v5413_v44, %v2371_v12  ;;  %v1770_v32 = vadd.f32 %v5530_v60, %v1637_v17  ;;  %v700_v53 = vmin.f32 %v636_v7, 6.0  ;;  %v698_v62 = vmin.f32 %v634_v16, 6.0 }
 0x1b1   :  { %v823_v1 = vmul.f32 %v759_v35, %v5606_v20  ;;  %v637_v34 = vmax.f32 %v573_v29, 0.0  ;;  %v635_v23 = vmax.f32 %v571_v43, 0.0  ;;  %v2107_v10 = vadd.f32 %v5478_v30, %v1902_v41  ;;  %v2946_v41 = vld [vmem:[%s7879_s2 + $0x8] sm:$0xff] }
 0x1b2   :  { %8004 = vst [vmem:[#allocation24_spill] sm:$0xff] %v5694_v6  ;;  %v2630_v26 = vmin.f32 %v2566_v33, 6.0  ;;  %v1639_v48 = vadd.f32 %v5527_v24, %v1434_v50  ;;  %v1839_v4 = vmul.f32 %v5301_v22, %v1500_v61  ;;  %v2239_v27 = vadd.f32 %v2175_v28, %v5544_v14  ;;  %v2945_v14 = vld [vmem:[%s7879_s2] sm:$0xff]  ;;  %v5720_v33 = vpop.f32.mrb[53].mxu0 }
 0x1b3   :  { %v5703_v12 = vmul.f32 %v5243_v49, %v1031_v45  ;;  %v1239_v60 = vmul.f32 %v5318_v40, %v1031_v45  ;;  %v5707_v17 = vmul.f32 %v5273_v56, %v1502_v59  ;;  %968 = vst.msk [vmem:[#allocation2 + $0x171] sm:$0xff] %vm858_vm1, %v823_v1  ;;  %v2503_v20 = vadd.f32 3.0, %v5694_v6  ;;  %8006 = vst [vmem:[#allocation47_spill] sm:$0xff] %v5720_v33 }
 0x1b4   :  { %v1708_v30 = vmul.f32 %v5254_v42, %v1500_v61  ;;  %v1903_v7 = vadd.f32 %v1839_v4, %v1770_v32  ;;  %v764_v24 = vmul.f32 0.16666667, %v700_v53  ;;  %v1106_v16 = vmul.f32 %v5243_v49, %v5597_v8 }
 0x1b5   :  { %8005 = vst [vmem:[#allocation25_spill] sm:$0xff] %v5707_v17  ;;  %v762_v29 = vmul.f32 0.16666667, %v698_v62  ;;  %v701_v45 = vmin.f32 %v637_v34, 6.0  ;;  %v699_v43 = vmin.f32 %v635_v23, 6.0  ;;  %v2240_v50 = vadd.f32 %v2176_v19, %v2107_v10  ;;  %v8007_v23 = vld [vmem:[#allocation27_spill] sm:$0xff] }
 0x1b6   :  { %v2694_v28 = vmul.f32 0.16666667, %v2630_v26  ;;  %v1772_v35 = vadd.f32 %v1708_v30, %v1639_v48  ;;  %v828_v32 = vmul.f32 %v764_v24, %v5620_v15  ;;  %v2567_v0 = vmax.f32 %v2503_v20, 0.0  ;;  %v1032_v19 = vld [vmem:[#allocation2 + $0x158] sm:$0xff]  ;;  %v1039_v10 = vld [vmem:[#allocation2 + $0x1b0] sm:$0xff] }
 0x1b7   :  { %v826_v53 = vmul.f32 %v762_v29, %v5628_v2  ;;  %v765_v1 = vmul.f32 0.16666667, %v701_v45  ;;  %v763_v4 = vmul.f32 0.16666667, %v699_v43  ;;  %v2108_v8 = vadd.f32 %v2044_v51, %v1903_v7  ;;  %v1510_v48 = vld [vmem:[#allocation2 + $0x1b1] sm:$0xff] }
 0x1b8   :  { %973 = vst.msk [vmem:[#allocation2 + $0x1e1] sm:$0xff] %vm858_vm1, %v828_v32  ;;  %v4269_v62 = vmov 0.0|0.0   ;;  %v4100_v34 = vpack.c.bf16 %v2946_v41, %v2945_v14  ;;  %v5727_v55 = vadd.f32 %v5124_v37, %v8007_v23  ;;  %v5730_v26 = vadd.f32 %v5623_v31, %v2239_v27  ;;  %v1973_v14 = vld [vmem:[#allocation2 + $0x152] sm:$0xff]  ;;  %v5857_v17 = vld [vmem:[%s7882_s5] ss:$0 sm:$0xff] }
 0x1b9   :  { %4099 = vmatprep.subr.bf16.mxu0 %v4269_v62  ;;  %v1841_v15 = vmul.f32 %v5301_v22, %v1502_v59  ;;  %971 = vst.msk [vmem:[#allocation2 + $0x1c9] sm:$0xff] %vm858_vm1, %v826_v53  ;;  %v829_v2 = vmul.f32 %v765_v1, %v5650_v46  ;;  %v827_v51 = vmul.f32 %v763_v4, %v5654_v13  ;;  %v1511_v41 = vld [vmem:[#allocation2 + $0x1b9] sm:$0xff] }
 0x1ba   :  { %8008 = vst [vmem:[#allocation27_spill] sm:$0xff] %v5730_v26  ;;  %4101 = vmatpush3.bf16.msra.mxu0 %v4100_v34  ;;  %v576_v20 = vadd.f32 3.0, %v5727_v55  ;;  %v5739_v30 = vadd.f32 %v5124_v37, %v4980_v39  ;;  %v5743_v31 = vadd.f32 %v5124_v37, %v4998_v5  ;;  %v5747_v27 = vadd.f32 %v5124_v37, %v5036_v54  ;;  %v5762_v39 = vpop.f32.mrb[54].mxu0  ;;  %v8017_v1 = vld [vmem:[#allocation33_spill] sm:$0xff] }
 0x1bb   :  { %v5750_v46 = vadd.f32 %v5665_v18, %v2240_v50  ;;  %v5753_v13 = vmul.f32 %v5254_v42, %v1502_v59  ;;  %v5755_v7 = vadd.f32 %v1239_v60, %v1106_v16  ;;  %v5758_v24 = vmul.f32 %v5273_v56, %v1500_v61  ;;  %974 = vst.msk [vmem:[#allocation2 + $0x1e9] sm:$0xff] %vm858_vm1, %v829_v2  ;;  %v1503_v59 = vld [vmem:[#allocation2 + $0x159] sm:$0xff] }
 0x1bc   :  { %972 = vst.msk [vmem:[#allocation2 + $0x1d1] sm:$0xff] %vm858_vm1, %v827_v51  ;;  %8011 = vst [vmem:[#allocation50_spill] sm:$0xff] %v5762_v39  ;;  %4102 = vmatprep.subr.bf16.mxu0 %v4269_v62  ;;  %v5764_v5 = vmin.f32 %v2567_v0, 6.0  ;;  %v5767_v54 = vmul.f32 %v2694_v28, %v5632_v36  ;;  %v5769_v18 = vadd.f32 %v1841_v15, %v1772_v35  ;;  %v1030_v16 = vld [vmem:[#allocation2 + $0x140] sm:$0xff]  ;;  %v640_v0 = vmax.f32 %v576_v20, 0.0  ;;  %v1040_v36 = vld [vmem:[#allocation2 + $0x1b8] sm:$0xff] }
 0x1bd   :  { %8009 = vst [vmem:[#allocation48_spill] sm:$0xff] %v5750_v46  ;;  %8010 = vst [vmem:[#allocation49_spill] sm:$0xff] %v5753_v13  ;;  %v5772_v60 = vadd.f32 %v5593_v52, %v2108_v8  ;;  %v5775_v61 = vmul.f32 %v5243_v49, %v1032_v19  ;;  %v1112_v29 = vmul.f32 %v5243_v49, %v1039_v10  ;;  %v574_v50 = vadd.f32 3.0, %v5739_v30  ;;  %v8022_v26 = vld [vmem:[#allocation17_spill] sm:$0xff] }
 0x1be   :  { %8012 = vst [vmem:[#allocation51_spill] sm:$0xff] %v5764_v5  ;;  %8013 = vst [vmem:[#allocation52_spill] sm:$0xff] %v5767_v54  ;;  %v1583_v45 = vmul.f32 %v5273_v56, %v1510_v48  ;;  %v1240_v43 = vmul.f32 %v5318_v40, %v1032_v19  ;;  %v577_v28 = vadd.f32 3.0, %v5743_v31  ;;  %v575_v52 = vadd.f32 3.0, %v5747_v27  ;;  %v5813_v48 = vpop.f32.mrb[55].mxu0 }
 0x1bf   :  { %8014 = vst [vmem:[#allocation53_spill] sm:$0xff] %v5769_v18  ;;  %8015 = vst [vmem:[#allocation54_spill] sm:$0xff] %v5775_v61  ;;  %v1371_v35 = vmul.f32 %v5211_v38, %v1032_v19  ;;  %v5785_v32 = vmul.f32 %v5273_v56, %v1503_v59  ;;  %v5789_v53 = vadd.f32 %v5124_v37, %v5094_v3  ;;  %v5805_v15 = vld [vmem:[#allocation2 + $0x1e0] sm:$0xff]  ;;  %v704_v10 = vmin.f32 %v640_v0, 6.0 }
 0x1c0   :  { %v5793_v4 = vadd.f32 %v5124_v37, %v8017_v1  ;;  %v5796_v8 = vmul.f32 %v5254_v42, %v1503_v59  ;;  %v5799_v62 = vmul.f32 %v5301_v22, %v1503_v59  ;;  %v5802_v34 = vmul.f32 %v5383_v9, %v1973_v14  ;;  %v5807_v2 = vld [vmem:[#allocation2 + $0x1c8] sm:$0xff]  ;;  %8021 = vst [vmem:[#allocation58_spill] sm:$0xff] %v5813_v48  ;;  %v5816_v59 = vld [vmem:[#allocation2 + $0x13a] sm:$0xff] }
 0x1c1   :  { %8016 = vst [vmem:[#allocation55_spill] sm:$0xff] %v5785_v32  ;;  %v1238_v23 = vmul.f32 %v5318_v40, %v1030_v16  ;;  %v1501_v3 = vld [vmem:[#allocation2 + $0x141] sm:$0xff]  ;;  %v1245_v37 = vmul.f32 %v5318_v40, %v5807_v2  ;;  %v1113_v51 = vmul.f32 %v5243_v49, %v1040_v36  ;;  %v1584_v19 = vmul.f32 %v5273_v56, %v1511_v41 }
 0x1c2   :  { %8018 = vst [vmem:[#allocation33_spill] sm:$0xff] %v5796_v8  ;;  %8019 = vst [vmem:[#allocation56_spill] sm:$0xff] %v5799_v62  ;;  %v1107_v20 = vmul.f32 %v5243_v49, %v1030_v16  ;;  %v638_v14 = vmax.f32 %v574_v50, 0.0  ;;  %v641_v1 = vmax.f32 %v577_v28, 0.0  ;;  %v639_v54 = vmax.f32 %v575_v52, 0.0  ;;  %v5847_v13 = vld [vmem:[#allocation2 + $0x1e1] sm:$0xff] }
 0x1c3   :  { %8020 = vst [vmem:[#allocation57_spill] sm:$0xff] %v5802_v34  ;;  %v1378_v6 = vmul.f32 %v5211_v38, %v5805_v15  ;;  %v1309_v5 = vadd.f32 %v1245_v37, %v1112_v29  ;;  %v580_v46 = vadd.f32 3.0, %v5789_v53  ;;  %v578_v36 = vadd.f32 3.0, %v5793_v4  ;;  %v5830_v50 = vld [vmem:[#allocation2 + $0x1d0] sm:$0xff] }
 0x1c4   :  { %v1302_v41 = vadd.f32 %v1238_v23, %v8022_v26  ;;  %v1369_v0 = vmul.f32 %v5211_v38, %v1030_v16  ;;  %v5825_v34 = vmul.f32 %v5273_v56, %v1501_v3  ;;  %v5828_v18 = vmul.f32 %v5254_v42, %v1501_v3  ;;  %v5843_v56 = vld [vmem:[#allocation2 + $0x1c9] sm:$0xff] }
 0x1c5   :  { %v5833_v28 = vmul.f32 %v5301_v22, %v1501_v3  ;;  %v5837_v29 = vmul.f32 %v5289_v25, %v5816_v59  ;;  %v1442_v52 = vadd.f32 %v1378_v6, %v1309_v5  ;;  %v768_v37 = vmul.f32 0.16666667, %v704_v10  ;;  %v5845_v16 = vld [vmem:[#allocation2 + $0x1e8] sm:$0xff] }
 0x1c6   :  { %8023 = vst [vmem:[#allocation17_spill] sm:$0xff] %v5825_v34  ;;  %v5841_v26 = vmul.f32 %v5357_v57, %v5816_v59  ;;  %v702_v23 = vmin.f32 %v638_v14, 6.0  ;;  %v705_v62 = vmin.f32 %v641_v1, 6.0  ;;  %v703_v8 = vmin.f32 %v639_v54, 6.0  ;;  %v8027_v14 = vld [vmem:[#allocation35_spill] sm:$0xff] }
 0x1c7   :  { %8024 = vst [vmem:[#allocation59_spill] sm:$0xff] %v5837_v29  ;;  %v1647_v3 = vadd.f32 %v1583_v45, %v1442_v52  ;;  %v1246_v32 = vmul.f32 %v5318_v40, %v5830_v50  ;;  %v644_v29 = vmax.f32 %v580_v46, 0.0  ;;  %v642_v6 = vmax.f32 %v578_v36, 0.0  ;;  %v5872_v52 = vld [vmem:[#allocation2 + $0x1e9] sm:$0xff]  ;;  %v1981_v34 = vld [vmem:[#allocation2 + $0x1b2] sm:$0xff] }
 0x1c8   :  { %8025 = vst [vmem:[#allocation60_spill] sm:$0xff] %v5841_v26  ;;  %v5851_v5 = vadd.f32 %v1240_v43, %v1107_v20  ;;  %v1433_v10 = vadd.f32 %v1369_v0, %v5682_v58  ;;  %v1435_v26 = vadd.f32 %v1371_v35, %v1302_v41  ;;  %v5861_v54 = vadd.f32 %v5857_v17, %v8027_v14  ;;  %v5867_v20 = vld [vmem:[#allocation2 + $0x1d1] sm:$0xff] }
 0x1c9   :  { %v1716_v45 = vmul.f32 %v5254_v42, %v5843_v56  ;;  %v1379_v46 = vmul.f32 %v5211_v38, %v5845_v16  ;;  %v1310_v43 = vadd.f32 %v1246_v32, %v1113_v51  ;;  %v832_v58 = vmul.f32 %v768_v37, %v5727_v55  ;;  %v5875_v32 = vpop.f32.mrb[56].mxu0 }
 0x1ca   :  { %8026 = vst [vmem:[#allocation61_spill] sm:$0xff] %v5851_v5  ;;  %v1849_v35 = vmul.f32 %v5301_v22, %v5847_v13  ;;  %v766_v1 = vmul.f32 0.16666667, %v702_v23  ;;  %v769_v36 = vmul.f32 0.16666667, %v705_v62  ;;  %v708_v5 = vmin.f32 %v644_v29, 6.0 }
 0x1cb   :  { %v767_v41 = vmul.f32 0.16666667, %v703_v8  ;;  %v1780_v0 = vadd.f32 %v1716_v45, %v1647_v3  ;;  %v1443_v14 = vadd.f32 %v1379_v46, %v1310_v43  ;;  %977 = vst.msk [vmem:[#allocation2 + $0x211] sm:$0xff] %vm858_vm1, %v832_v58  ;;  %v706_v38 = vmin.f32 %v642_v6, 6.0  ;;  %8028 = vst [vmem:[#allocation35_spill] sm:$0xff] %v5875_v32  ;;  %v5881_v8 = vpop.f32.mrb[57].mxu0 }
 0x1cc   :  { %v830_v51 = vmul.f32 %v766_v1, %v5739_v30  ;;  %v833_v55 = vmul.f32 %v769_v36, %v5743_v31  ;;  %v581_v62 = vadd.f32 3.0, %v5861_v54  ;;  %8029 = vst [vmem:[#allocation62_spill] sm:$0xff] %v5881_v8  ;;  %v1972_v23 = vld [vmem:[#allocation2 + $0x142] sm:$0xff]  ;;  %v1717_v45 = vmul.f32 %v5254_v42, %v5867_v20  ;;  %v1982_v31 = vld [vmem:[#allocation2 + $0x1ba] sm:$0xff] }
 0x1cd   :  { %v831_v37 = vmul.f32 %v767_v41, %v5747_v27  ;;  %v1648_v3 = vadd.f32 %v1584_v19, %v1443_v14  ;;  %v772_v46 = vmul.f32 0.16666667, %v708_v5  ;;  %v770_v29 = vmul.f32 0.16666667, %v706_v38  ;;  %v1035_v43 = vld [vmem:[#allocation2 + $0x180] sm:$0xff]  ;;  %v8032_v38 = vld [vmem:[#allocation18_spill] sm:$0xff] }
 0x1ce   :  { %v1638_v6 = vadd.f32 %v5669_v63, %v1433_v10  ;;  %v1850_v30 = vmul.f32 %v5301_v22, %v5872_v52  ;;  %v2054_v27 = vmul.f32 %v5289_v25, %v1981_v34  ;;  %975 = vst.msk [vmem:[#allocation2 + $0x1f9] sm:$0xff] %vm858_vm1, %v830_v51  ;;  %978 = vst.msk [vmem:[#allocation2 + $0x219] sm:$0xff] %vm858_vm1, %v833_v55  ;;  %v645_v19 = vmax.f32 %v581_v62, 0.0  ;;  %v1506_v41 = vld [vmem:[#allocation2 + $0x181] sm:$0xff] }
 0x1cf   :  { %976 = vst.msk [vmem:[#allocation2 + $0x201] sm:$0xff] %vm858_vm1, %v831_v37  ;;  %v1913_v58 = vadd.f32 %v1849_v35, %v1780_v0  ;;  %v1781_v1 = vadd.f32 %v1717_v45, %v1648_v3  ;;  %v836_v5 = vmul.f32 %v772_v46, %v5789_v53  ;;  %v834_v63 = vmul.f32 %v770_v29, %v5793_v4  ;;  %v1033_v0 = vld [vmem:[#allocation2 + $0x168] sm:$0xff] }
 0x1d0   :  { %v5895_v10 = vmul.f32 %v5357_v57, %v1972_v23  ;;  %v2310_v36 = vmul.f32 %v5383_v9, %v5816_v59  ;;  %v5900_v34 = vmul.f32 %v5383_v9, %v1972_v23  ;;  %v709_v14 = vmin.f32 %v645_v19, 6.0  ;;  %v1504_v53 = vld [vmem:[#allocation2 + $0x169] sm:$0xff]  ;;  %v5938_v19 = vld [vmem:[#allocation2 + $0x1d2] sm:$0xff] }
 0x1d1   :  { %v1640_v51 = vadd.f32 %v8032_v38, %v1435_v26  ;;  %v5904_v35 = vmul.f32 %v5318_v40, %v1035_v43  ;;  %v1914_v55 = vadd.f32 %v1850_v30, %v1781_v1  ;;  %v2055_v4 = vmul.f32 %v5289_v25, %v1982_v31  ;;  %981 = vst.msk [vmem:[#allocation2 + $0x241] sm:$0xff] %vm858_vm1, %v836_v5  ;;  %v8034_v59 = vld [vmem:[#allocation19_spill] sm:$0xff]  ;;  %v5922_v25 = vld [vmem:[%s7882_s5 + $0xb] ss:$0 sm:$0xff]  ;;  %v5961_v38 = vld [vmem:[%s7882_s5 + $0x5] ss:$0 sm:$0xff] }
 0x1d2   :  { %8030 = vst [vmem:[#allocation63_spill] sm:$0xff] %v5895_v10  ;;  %8031 = vst [vmem:[#allocation64_spill] sm:$0xff] %v5900_v34  ;;  %v1771_v37 = vadd.f32 %v8034_v59, %v1638_v6  ;;  %v1247_v62 = vmul.f32 %v5318_v40, %v5805_v15  ;;  %v1114_v26 = vmul.f32 %v5243_v49, %v5807_v2  ;;  %v5914_v23 = vld [vmem:[#allocation2 + $0x1ca] sm:$0xff]  ;;  %v773_v3 = vmul.f32 0.16666667, %v709_v14 }
 0x1d3   :  { %8033 = vst [vmem:[#allocation18_spill] sm:$0xff] %v5904_v35  ;;  %979 = vst.msk [vmem:[#allocation2 + $0x229] sm:$0xff] %vm858_vm1, %v834_v63  ;;  %v5917_v45 = vadd.f32 %v2310_v36, %v5772_v60  ;;  %v5925_v46 = vmul.f32 %v5922_v25, %v1035_v43  ;;  %v5928_v29 = vmul.f32 %v5301_v22, %v1506_v41  ;;  %v1036_v43 = vld [vmem:[#allocation2 + $0x188] sm:$0xff] }
 0x1d4   :  { %v2118_v6 = vadd.f32 %v2054_v27, %v1913_v58  ;;  %v5931_v2 = vmul.f32 %v5243_v49, %v1033_v0  ;;  %v1241_v30 = vmul.f32 %v5318_v40, %v1033_v0  ;;  %v1372_v60 = vmul.f32 %v5922_v25, %v1033_v0  ;;  %v5949_v41 = vld [vmem:[#allocation2 + $0x1e2] sm:$0xff] }
 0x1d5   :  { %8035 = vst [vmem:[#allocation19_spill] sm:$0xff] %v5917_v45  ;;  %8036 = vst [vmem:[#allocation65_spill] sm:$0xff] %v5925_v46  ;;  %v5936_v31 = vmul.f32 %v5254_v42, %v1504_v53  ;;  %v5941_v1 = vadd.f32 %v5828_v18, %v1640_v51  ;;  %v2119_v5 = vadd.f32 %v2055_v4, %v1914_v55  ;;  %v5945_v58 = vld [vmem:[#allocation2 + $0x1f8] sm:$0xff]  ;;  %v5981_v4 = vld [vmem:[#allocation2 + $0x210] sm:$0xff] }
 0x1d6   :  { %8037 = vst [vmem:[#allocation66_spill] sm:$0xff] %v5928_v29  ;;  %8038 = vst [vmem:[#allocation67_spill] sm:$0xff] %v5931_v2  ;;  %v2187_v27 = vmul.f32 %v5357_v57, %v5914_v23  ;;  %v837_v49 = vmul.f32 %v773_v3, %v5861_v54  ;;  %v1904_v63 = vadd.f32 %v5833_v28, %v1771_v37  ;;  %v6050_v34 = vld [vmem:[#allocation2 + $0x218] sm:$0xff] }
 0x1d7   :  { %8039 = vst [vmem:[#allocation68_spill] sm:$0xff] %v5936_v31  ;;  %8040 = vst [vmem:[#allocation69_spill] sm:$0xff] %v5941_v1  ;;  %v1311_v36 = vadd.f32 %v1247_v62, %v1114_v26  ;;  %v1249_v42 = vmul.f32 %v5318_v40, %v5945_v58  ;;  %v1380_v18 = vmul.f32 %v5922_v25, %v5945_v58  ;;  %v5988_v26 = vpop.f32.mrb[58].mxu0  ;;  %v8054_v31 = vld [vmem:[#allocation12_spill] sm:$0xff] }
 0x1d8   :  { %v5956_v14 = vmul.f32 %v5301_v22, %v1504_v53  ;;  %v1116_v28 = vmul.f32 %v5961_v38, %v5805_v15  ;;  %v2188_v54 = vmul.f32 %v5357_v57, %v5938_v19  ;;  %v2251_v51 = vadd.f32 %v2187_v27, %v2118_v6  ;;  %982 = vst.msk [vmem:[#allocation2 + $0x249] sm:$0xff] %vm858_vm1, %v837_v49  ;;  %v5975_v22 = vld [vmem:[%s7882_s5 + $0x6] ss:$0 sm:$0xff]  ;;  %v5979_v15 = vld [vmem:[#allocation2 + $0x1ea] sm:$0xff]  ;;  %v1519_v35 = vld [vmem:[#allocation2 + $0x219] sm:$0xff] }
 0x1d9   :  { %v1436_v0 = vadd.f32 %v1372_v60, %v5755_v7  ;;  %v5970_v55 = vmul.f32 %v5318_v40, %v1036_v43  ;;  %v1585_v53 = vmul.f32 %v5975_v22, %v5843_v56  ;;  %v1444_v57 = vadd.f32 %v1380_v18, %v1311_v36  ;;  %8044 = vst [vmem:[#allocation73_spill] sm:$0xff] %v5988_v26  ;;  %v5996_v6 = vld [vmem:[#allocation2 + $0x170] sm:$0xff]  ;;  %v6033_v18 = vld [vmem:[%s7882_s5 + $0x8] ss:$0 sm:$0xff]  ;;  %v6168_v61 = vld [vmem:[#allocation2 + $0x240] sm:$0xff] }
 0x1da   :  { %8041 = vst [vmem:[#allocation70_spill] sm:$0xff] %v5956_v14  ;;  %v5984_v59 = vadd.f32 %v1241_v30, %v5703_v12  ;;  %v2320_v7 = vmul.f32 %v5383_v9, %v5949_v41  ;;  %v2252_v37 = vadd.f32 %v2188_v54, %v2119_v5  ;;  %v1313_v62 = vadd.f32 %v1249_v42, %v1116_v28  ;;  %v8050_v36 = vld [vmem:[#allocation11_spill] sm:$0xff] }
 0x1db   :  { %8042 = vst [vmem:[#allocation71_spill] sm:$0xff] %v5970_v55  ;;  %v5991_v3 = vadd.f32 %v5688_v47, %v1904_v63  ;;  %v5994_v56 = vmul.f32 %v5922_v25, %v1036_v43  ;;  %8047 = vst [vmem:[#allocation76_spill] sm:$0xff] %v5996_v6  ;;  %v1248_v60 = vmul.f32 %v5318_v40, %v5845_v16  ;;  %v6012_v43 = vld [vmem:[%s7882_s5 + $0x9] ss:$0 sm:$0xff]  ;;  %v6016_v63 = vld [vmem:[#allocation2 + $0x200] sm:$0xff] }
 0x1dc   :  { %8043 = vst [vmem:[#allocation72_spill] sm:$0xff] %v5984_v59  ;;  %v1649_v12 = vadd.f32 %v1585_v53, %v1444_v57  ;;  %v2321_v30 = vmul.f32 %v5383_v9, %v5979_v15  ;;  %v1115_v5 = vmul.f32 %v5961_v38, %v5830_v50  ;;  %v2384_v27 = vadd.f32 %v2320_v7, %v2251_v51  ;;  %v8049_v9 = vld [vmem:[#allocation9_spill] sm:$0xff] }
 0x1dd   :  { %8045 = vst [vmem:[#allocation74_spill] sm:$0xff] %v5991_v3  ;;  %8046 = vst [vmem:[#allocation75_spill] sm:$0xff] %v5994_v56  ;;  %v1382_v47 = vmul.f32 %v5922_v25, %v5981_v4  ;;  %v6007_v49 = vadd.f32 %v5758_v24, %v1436_v0  ;;  %v1718_v40 = vmul.f32 %v6012_v43, %v5847_v13  ;;  %v6039_v0 = vld [vmem:[#allocation2 + $0x1f9] sm:$0xff]  ;;  %v6077_v3 = vld [vmem:[%s7882_s5 + $0x7] ss:$0 sm:$0xff] }
 0x1de   :  { %v6020_v50 = vadd.f32 %v5857_v17, %v8049_v9  ;;  %v6024_v42 = vadd.f32 %v5857_v17, %v8050_v36  ;;  %v6028_v24 = vmul.f32 %v5961_v38, %v5996_v6  ;;  %v6037_v28 = vmul.f32 %v6033_v18, %v5996_v6 }
 0x1df   :  { %8048 = vst [vmem:[#allocation77_spill] sm:$0xff] %v6007_v49  ;;  %v2385_v54 = vadd.f32 %v2321_v30, %v2252_v37  ;;  %v1446_v51 = vadd.f32 %v1382_v47, %v1313_v62  ;;  %v1587_v53 = vmul.f32 %v5975_v22, %v5847_v13  ;;  %v1117_v57 = vmul.f32 %v5961_v38, %v5845_v16  ;;  %v6056_v13 = vpop.f32.mrb[59].mxu0 }
 0x1e0   :  { %8051 = vst [vmem:[#allocation9_spill] sm:$0xff] %v6028_v24  ;;  %8052 = vst [vmem:[#allocation11_spill] sm:$0xff] %v6037_v28  ;;  %v1588_v7 = vmul.f32 %v5975_v22, %v5872_v52  ;;  %v1782_v9 = vadd.f32 %v1718_v40, %v1649_v12  ;;  %v1312_v36 = vadd.f32 %v1248_v60, %v1115_v5  ;;  %v6063_v60 = vld [vmem:[%s7882_s5 + $0xc] ss:$0 sm:$0xff]  ;;  %v579_v30 = vadd.f32 3.0, %v6020_v50  ;;  %v8059_v24 = vld [vmem:[#allocation41_spill] sm:$0xff] }
 0x1e1   :  { %v6048_v45 = vadd.f32 %v5413_v44, %v2384_v27  ;;  %v1250_v37 = vmul.f32 %v6033_v18, %v6016_v63  ;;  %v1381_v62 = vmul.f32 %v5922_v25, %v6016_v63  ;;  %8053 = vst [vmem:[#allocation78_spill] sm:$0xff] %v6056_v13  ;;  %v1586_v16 = vmul.f32 %v5975_v22, %v5867_v20 }
 0x1e2   :  { %v1851_v12 = vmul.f32 %v6063_v60, %v6039_v0  ;;  %v584_v5 = vadd.f32 3.0, %v6024_v42  ;;  %v6070_v27 = vadd.f32 %v5413_v44, %v2385_v54  ;;  %v1651_v47 = vadd.f32 %v1587_v53, %v1446_v51  ;;  %v6083_v44 = vld [vmem:[#allocation2 + $0x201] sm:$0xff] }
 0x1e3   :  { %v1314_v40 = vadd.f32 %v1250_v37, %v1117_v57  ;;  %v1445_v10 = vadd.f32 %v1381_v62, %v1312_v36  ;;  %v1719_v20 = vmul.f32 %v6012_v43, %v5872_v52  ;;  %v2058_v29 = vmul.f32 %v6077_v3, %v5949_v41  ;;  %v1518_v57 = vld [vmem:[#allocation2 + $0x211] sm:$0xff] }
 0x1e4   :  { %v1915_v14 = vadd.f32 %v1851_v12, %v1782_v9  ;;  %v1383_v1 = vmul.f32 %v5922_v25, %v6050_v34  ;;  %v2056_v54 = vmul.f32 %v6077_v3, %v5914_v23  ;;  %v2516_v51 = vadd.f32 3.0, %v6048_v45 }
 0x1e5   :  { %v1720_v52 = vmul.f32 %v6012_v43, %v6039_v0  ;;  %v1650_v53 = vadd.f32 %v1586_v16, %v1445_v10  ;;  %v643_v37 = vmax.f32 %v579_v30, 0.0  ;;  %v648_v62 = vmax.f32 %v584_v5, 0.0  ;;  %v6104_v10 = vld [vmem:[%s7882_s5 + $0xa] ss:$0 sm:$0xff] }
 0x1e6   :  { %v1447_v36 = vadd.f32 %v1383_v1, %v1314_v40  ;;  %v6092_v9 = vadd.f32 %v5857_v17, %v8054_v31  ;;  %v2517_v12 = vadd.f32 3.0, %v6070_v27  ;;  %v1852_v23 = vmul.f32 %v6063_v60, %v6083_v44 }
 0x1e7   :  { %v1784_v49 = vadd.f32 %v1720_v52, %v1651_v47  ;;  %v1783_v56 = vadd.f32 %v1719_v20, %v1650_v53  ;;  %v6099_v46 = vmul.f32 %v6077_v3, %v5979_v15  ;;  %v2189_v31 = vmul.f32 %v6104_v10, %v5949_v41  ;;  %v8055_v53 = vld [vmem:[#allocation14_spill] sm:$0xff]  ;;  %v8056_v41 = vld [vmem:[#allocation40_spill] sm:$0xff] }
 0x1e8   :  { %v2190_v1 = vmul.f32 %v6104_v10, %v5979_v15  ;;  %v2120_v16 = vadd.f32 %v2056_v54, %v1915_v14  ;;  %v2057_v30 = vmul.f32 %v6077_v3, %v5938_v19  ;;  %v2580_v5 = vmax.f32 %v2516_v51, 0.0  ;;  %v6124_v14 = vpop.f32.mrb[60].mxu0  ;;  %v6126_v54 = vld [vmem:[#allocation2 + $0x1fa] sm:$0xff]  ;;  %v6128_v51 = vld [vmem:[#allocation2 + $0x228] sm:$0xff] }
 0x1e9   :  { %v1853_v47 = vmul.f32 %v6063_v60, %v1518_v57  ;;  %v1916_v40 = vadd.f32 %v1852_v23, %v1783_v56  ;;  %v1652_v20 = vadd.f32 %v1588_v7, %v1447_v36  ;;  %v6114_v52 = vadd.f32 3.0, %v6092_v9  ;;  %8057 = vst [vmem:[#allocation12_spill] sm:$0xff] %v6124_v14  ;;  %v6132_v36 = vpop.f32.mrb[61].mxu0 }
 0x1ea   :  { %v6118_v59 = vadd.f32 %v5857_v17, %v8055_v53  ;;  %v6122_v55 = vadd.f32 %v5857_v17, %v8056_v41  ;;  %v2581_v15 = vmax.f32 %v2517_v12, 0.0  ;;  %v707_v56 = vmin.f32 %v643_v37, 6.0  ;;  %8058 = vst [vmem:[#allocation14_spill] sm:$0xff] %v6132_v36 }
 0x1eb   :  { %v1917_v19 = vadd.f32 %v1853_v47, %v1784_v49  ;;  %v6130_v7 = vmin.f32 %v648_v62, 6.0  ;;  %v1120_v23 = vmul.f32 %v5961_v38, %v5981_v4  ;;  %v1721_v53 = vmul.f32 %v6012_v43, %v6083_v44  ;;  %v6142_v49 = vpop.f32.mrb[62].mxu0 }
 0x1ec   :  { %v2253_v41 = vadd.f32 %v2189_v31, %v2120_v16  ;;  %v6140_v12 = vadd.f32 %v5857_v17, %v8059_v24  ;;  %8060 = vst [vmem:[#allocation40_spill] sm:$0xff] %v6142_v49  ;;  %v2644_v47 = vmin.f32 %v2580_v5, 6.0  ;;  %v1251_v37 = vmul.f32 %v6033_v18, %v5981_v4  ;;  %v6148_v36 = vpop.f32.mrb[63].mxu0  ;;  %v6154_v24 = vld [vmem:[%s7882_s5 + $0xd] ss:$0 sm:$0xff] }
 0x1ed   :  { %v1118_v62 = vmul.f32 %v5961_v38, %v5945_v58  ;;  %v2121_v2 = vadd.f32 %v2057_v30, %v1916_v40  ;;  %8061 = vst [vmem:[#allocation41_spill] sm:$0xff] %v6148_v36  ;;  %v1591_v14 = vmul.f32 %v5975_v22, %v1518_v57  ;;  %v1785_v31 = vadd.f32 %v1721_v53, %v1652_v20  ;;  %v1988_v36 = vld [vmem:[#allocation2 + $0x202] sm:$0xff] }
 0x1ee   :  { %v2322_v16 = vmul.f32 %v6154_v24, %v6126_v54  ;;  %v1253_v4 = vmul.f32 %v6033_v18, %v6128_v51  ;;  %v2645_v5 = vmin.f32 %v2581_v15, 6.0  ;;  %v1722_v58 = vmul.f32 %v6012_v43, %v1518_v57  ;;  %v1989_v57 = vld [vmem:[#allocation2 + $0x212] sm:$0xff] }
 0x1ef   :  { %v2122_v30 = vadd.f32 %v2058_v29, %v1917_v19  ;;  %v1384_v40 = vmul.f32 %v5922_v25, %v6128_v51  ;;  %v1589_v20 = vmul.f32 %v5975_v22, %v6039_v0  ;;  %v1854_v53 = vmul.f32 %v6063_v60, %v1519_v35 }
 0x1f0   :  { %v2386_v49 = vadd.f32 %v2322_v16, %v2253_v41  ;;  %v771_v13 = vmul.f32 0.16666667, %v707_v56  ;;  %v2708_v26 = vmul.f32 0.16666667, %v2644_v47  ;;  %v1315_v8 = vadd.f32 %v1251_v37, %v1118_v62  ;;  %v1990_v56 = vld [vmem:[#allocation2 + $0x21a] sm:$0xff] }
 0x1f1   :  { %v2191_v28 = vmul.f32 %v6104_v10, %v6126_v54  ;;  %v2254_v15 = vadd.f32 %v2190_v1, %v2121_v2  ;;  %v6172_v29 = vmul.f32 %v5961_v38, %v6050_v34  ;;  %v1252_v0 = vmul.f32 %v6033_v18, %v6050_v34  ;;  %v6186_v16 = vld [vmem:[%s7882_s5 + $0x1] ss:$0 sm:$0xff] }
 0x1f2   :  { %v1918_v19 = vadd.f32 %v1854_v53, %v1785_v31  ;;  %v1317_v6 = vadd.f32 %v1253_v4, %v1120_v23  ;;  %v2709_v41 = vmul.f32 0.16666667, %v2645_v5  ;;  %v2323_v37 = vmul.f32 %v6154_v24, %v1988_v36 }
 0x1f3   :  { %v2255_v47 = vadd.f32 %v2191_v28, %v2122_v30  ;;  %v1448_v62 = vadd.f32 %v1384_v40, %v1315_v8  ;;  %v6178_v2 = vmul.f32 %v5975_v22, %v1519_v35  ;;  %v6181_v1 = vmul.f32 %v6012_v43, %v1519_v35 }
 0x1f4   :  { %v6189_v34 = vadd.f32 %v6186_v16, %v2386_v49  ;;  %v1386_v28 = vmul.f32 %v5922_v25, %v6168_v61  ;;  %v6194_v23 = vmul.f32 %v2708_v26, %v6048_v45  ;;  %v2324_v8 = vmul.f32 %v6154_v24, %v1989_v57 }
 0x1f5   :  { %v1119_v35 = vmul.f32 %v5961_v38, %v6016_v63  ;;  %v2387_v31 = vadd.f32 %v2323_v37, %v2254_v15  ;;  %v6200_v4 = vmul.f32 %v6077_v3, %v1989_v57  ;;  %v6203_v5 = vmul.f32 %v6077_v3, %v1990_v56 }
 0x1f6   :  { %8062 = vst [vmem:[#allocation79_spill] sm:$0xff] %v6194_v23  ;;  %v2123_v49 = vadd.f32 %v6099_v46, %v1918_v19  ;;  %v1450_v30 = vadd.f32 %v1386_v28, %v1317_v6  ;;  %v6207_v40 = vmul.f32 %v2709_v41, %v6070_v27  ;;  %v6210_v45 = vmul.f32 %v6104_v10, %v1989_v57  ;;  %v6223_v57 = vld [vmem:[#allocation2 + $0x229] sm:$0xff] }
 0x1f7   :  { %v2388_v26 = vadd.f32 %v2324_v8, %v2255_v47  ;;  %v1653_v53 = vadd.f32 %v1589_v20, %v1448_v62  ;;  %v6213_v63 = vmul.f32 %v6104_v10, %v1990_v56  ;;  %v2325_v15 = vmul.f32 %v6154_v24, %v1990_v56 }
 0x1f8   :  { %8063 = vst [vmem:[#allocation80_spill] sm:$0xff] %v6207_v40  ;;  %v2192_v37 = vmul.f32 %v6104_v10, %v1988_v36  ;;  %v2518_v32 = vadd.f32 3.0, %v6189_v34  ;;  %v2873_v46 = vsel %vm858_vm1, %v6194_v23, 0.0  ;;  %v1316_v6 = vadd.f32 %v1252_v0, %v1119_v35 }
 0x1f9   :  { %v6221_v27 = vadd.f32 %v6186_v16, %v2387_v31  ;;  %v835_v20 = vmul.f32 %v771_v13, %v6020_v50  ;;  %v1655_v41 = vadd.f32 %v1591_v14, %v1450_v30  ;;  %v776_v47 = vmul.f32 0.16666667, %v6130_v7  ;;  %v1522_v50 = vld [vmem:[#allocation2 + $0x241] sm:$0xff] }
 0x1fa   :  { %v2256_v19 = vadd.f32 %v2192_v37, %v2123_v49  ;;  %v646_v56 = vmax.f32 %v6114_v52, 0.0  ;;  %v2874_v62 = vsel %vm858_vm1, %v6207_v40, 0.0  ;;  %v1590_v28 = vmul.f32 %v5975_v22, %v6083_v44 }
 0x1fb   :  { %v6233_v0 = vadd.f32 %v6186_v16, %v2388_v26  ;;  %v1786_v8 = vadd.f32 %v1722_v58, %v1653_v53  ;;  %980 = vst.msk [vmem:[#allocation2 + $0x231] sm:$0xff] %vm858_vm1, %v835_v20  ;;  %v2582_v35 = vmax.f32 %v2518_v32, 0.0  ;;  %v1724_v13 = vmul.f32 %v6012_v43, %v6223_v57 }
 0x1fc   :  { %v840_v14 = vmul.f32 %v776_v47, %v6024_v42  ;;  %v710_v52 = vmin.f32 %v646_v56, 6.0  ;;  %v2060_v7 = vmul.f32 %v6077_v3, %v6126_v54  ;;  %v6242_v31 = vmul.f32 %v6077_v3, %v1988_v36  ;;  %v6266_v56 = vld [vmem:[#allocation2 + $0x248] sm:$0xff] }
 0x1fd   :  { %v2519_v44 = vadd.f32 3.0, %v6221_v27  ;;  %v1855_v58 = vmul.f32 %v6063_v60, %v6223_v57  ;;  %v6247_v49 = vadd.f32 %v2874_v62, %v2873_v46  ;;  %v2389_v32 = vadd.f32 %v2325_v15, %v2256_v19 }
 0x1fe   :  { %v1788_v30 = vadd.f32 %v1724_v13, %v1655_v41  ;;  %985 = vst.msk [vmem:[#allocation2 + $0x271] sm:$0xff] %vm858_vm1, %v840_v14  ;;  %v774_v26 = vmul.f32 0.16666667, %v710_v52  ;;  %v6252_v42 = vmul.f32 %v5961_v38, %v6168_v61  ;;  %v1857_v54 = vmul.f32 %v6063_v60, %v1522_v50 }
 0x1ff   :  { %v1919_v36 = vadd.f32 %v1855_v58, %v1786_v8  ;;  %v585_v53 = vadd.f32 3.0, %v6118_v59  ;;  %v2520_v37 = vadd.f32 3.0, %v6233_v0  ;;  %v2646_v20 = vmin.f32 %v2582_v35, 6.0 }
 0x200   :  { %v838_v46 = vmul.f32 %v774_v26, %v6092_v9  ;;  %v583_v15 = vadd.f32 3.0, %v6122_v55  ;;  %v2583_v19 = vmax.f32 %v2519_v44, 0.0  ;;  %v6261_v41 = vmul.f32 %v6033_v18, %v6168_v61  ;;  %v8064_v61 = vld [vmem:[#allocation42_spill] sm:$0xff] }
 0x201   :  { %v6264_v47 = vmul.f32 %v5975_v22, %v1522_v50  ;;  %v588_v62 = vadd.f32 3.0, %v6140_v12  ;;  %v6270_v8 = vadd.f32 %v6186_v16, %v2389_v32  ;;  %v6273_v35 = vmul.f32 %v6012_v43, %v1522_v50 }
 0x202   :  { %v1921_v9 = vadd.f32 %v1857_v54, %v1788_v30  ;;  %v6275_v13 = vld [vmem:[#allocation2 + $0x230] sm:$0xff]  ;;  %983 = vst.msk [vmem:[#allocation2 + $0x259] sm:$0xff] %vm858_vm1, %v838_v46  ;;  %v6280_v14 = vadd.f32 %v5857_v17, %v8064_v61  ;;  %v2124_v52 = vadd.f32 %v2060_v7, %v1919_v36  ;;  %v649_v32 = vmax.f32 %v585_v53, 0.0 }
 0x203   :  { %v1254_v44 = vmul.f32 %v6033_v18, %v6275_v13  ;;  %v1385_v58 = vmul.f32 %v5922_v25, %v6275_v13  ;;  %v2584_v26 = vmax.f32 %v2520_v37, 0.0  ;;  %v2710_v50 = vmul.f32 0.16666667, %v2646_v20  ;;  %v6289_v61 = vld [vmem:[#allocation2 + $0x22a] sm:$0xff] }
 0x204   :  { %v1387_v30 = vmul.f32 %v5922_v25, %v6266_v56  ;;  %v647_v54 = vmax.f32 %v583_v15, 0.0  ;;  %v2647_v40 = vmin.f32 %v2583_v19, 6.0  ;;  %v652_v7 = vmax.f32 %v588_v62, 0.0 }
 0x205   :  { %v1318_v46 = vadd.f32 %v1254_v44, %v6172_v29  ;;  %v1449_v23 = vadd.f32 %v1385_v58, %v1316_v6  ;;  %v2521_v36 = vadd.f32 3.0, %v6270_v8  ;;  %v1122_v48 = vmul.f32 %v5961_v38, %v6128_v51  ;;  %v6300_v6 = vld [vmem:[#allocation2 + $0x231] sm:$0xff]  ;;  %v6304_v58 = vld [vmem:[#allocation2 + $0x242] sm:$0xff] }
 0x206   :  { %v2126_v53 = vadd.f32 %v6200_v4, %v1921_v9  ;;  %v586_v37 = vadd.f32 3.0, %v6280_v14  ;;  %v2257_v15 = vadd.f32 %v6210_v45, %v2124_v52  ;;  %v713_v19 = vmin.f32 %v649_v32, 6.0 }
 0x207   :  { %v1451_v20 = vadd.f32 %v1387_v30, %v1318_v46  ;;  %v1654_v39 = vadd.f32 %v1590_v28, %v1449_v23  ;;  %v2648_v33 = vmin.f32 %v2584_v26, 6.0  ;;  %v6298_v29 = vmul.f32 %v2710_v50, %v6189_v34 }
 0x208   :  { %v2195_v62 = vmul.f32 %v6104_v10, %v6289_v61  ;;  %v711_v44 = vmin.f32 %v647_v54, 6.0  ;;  %v2711_v51 = vmul.f32 0.16666667, %v2647_v40  ;;  %v2326_v23 = vmul.f32 %v6154_v24, %v6289_v61 }
 0x209   :  { %8065 = vst [vmem:[#allocation42_spill] sm:$0xff] %v6298_v29  ;;  %v1787_v4 = vadd.f32 %v6181_v1, %v1654_v39  ;;  %v716_v45 = vmin.f32 %v652_v7, 6.0  ;;  %v2585_v28 = vmax.f32 %v2521_v36, 0.0  ;;  %v1593_v34 = vmul.f32 %v5975_v22, %v6223_v57  ;;  %v6314_v50 = vld [vmem:[#allocation2 + $0x258] sm:$0xff]  ;;  %v1523_v7 = vld [vmem:[#allocation2 + $0x249] sm:$0xff] }
 0x20a   :  { %v2259_v9 = vadd.f32 %v2195_v62, %v2126_v53  ;;  %v650_v52 = vmax.f32 %v586_v37, 0.0  ;;  %v1656_v32 = vadd.f32 %v6178_v2, %v1451_v20  ;;  %v1856_v26 = vmul.f32 %v6063_v60, %v6300_v6 }
 0x20b   :  { %v2390_v40 = vadd.f32 %v2326_v23, %v2257_v15  ;;  %v777_v30 = vmul.f32 0.16666667, %v713_v19  ;;  %v2712_v39 = vmul.f32 0.16666667, %v2648_v33  ;;  %v2876_v1 = vsel %vm858_vm1, %v6298_v29, 0.0 }
 0x20c   :  { %v2328_v54 = vmul.f32 %v6154_v24, %v6304_v58  ;;  %v775_v46 = vmul.f32 0.16666667, %v711_v44  ;;  %v6321_v57 = vmul.f32 %v2711_v51, %v6221_v27  ;;  %v1725_v2 = vmul.f32 %v6012_v43, %v6300_v6 }
 0x20d   :  { %v1920_v36 = vadd.f32 %v1856_v26, %v1787_v4  ;;  %v780_v53 = vmul.f32 0.16666667, %v716_v45  ;;  %v2649_v37 = vmin.f32 %v2585_v28, 6.0  ;;  %v1388_v33 = vmul.f32 %v5922_v25, %v6314_v50 }
 0x20e   :  { %8066 = vst [vmem:[#allocation81_spill] sm:$0xff] %v6321_v57  ;;  %v2392_v20 = vadd.f32 %v2328_v54, %v2259_v9  ;;  %v714_v15 = vmin.f32 %v650_v52, 6.0  ;;  %v1319_v19 = vadd.f32 %v6261_v41, %v1122_v48  ;;  %v1789_v62 = vadd.f32 %v1725_v2, %v1656_v32 }
 0x20f   :  { %v6329_v44 = vadd.f32 %v6186_v16, %v2390_v40  ;;  %v841_v27 = vmul.f32 %v777_v30, %v6118_v59  ;;  %v6333_v51 = vmul.f32 %v2712_v39, %v6233_v0  ;;  %v2877_v4 = vadd.f32 %v2876_v1, %v6247_v49  ;;  %v1992_v39 = vld [vmem:[#allocation2 + $0x232] sm:$0xff] }
 0x210   :  { %v1858_v23 = vmul.f32 %v6063_v60, %v1523_v7  ;;  %v839_v45 = vmul.f32 %v775_v46, %v6122_v55  ;;  %v2878_v28 = vsel %vm858_vm1, %v6321_v57, 0.0  ;;  %v2125_v48 = vadd.f32 %v6242_v31, %v1920_v36  ;;  %v1055_v1 = vld [vmem:[#allocation2 + $0x270] sm:$0xff] }
 0x211   :  { %8067 = vst [vmem:[#allocation82_spill] sm:$0xff] %v6333_v51  ;;  %v1257_v41 = vmul.f32 %v6033_v18, %v6314_v50  ;;  %986 = vst.msk [vmem:[#allocation2 + $0x279] sm:$0xff] %vm858_vm1, %v841_v27  ;;  %v844_v59 = vmul.f32 %v780_v53, %v6140_v12  ;;  %v2713_v0 = vmul.f32 0.16666667, %v2649_v37  ;;  %v6346_v9 = vadd.f32 %v6186_v16, %v2392_v20 }
 0x212   :  { %v1452_v49 = vadd.f32 %v1388_v33, %v1319_v19  ;;  %984 = vst.msk [vmem:[#allocation2 + $0x261] sm:$0xff] %vm858_vm1, %v839_v45  ;;  %v778_v55 = vmul.f32 0.16666667, %v714_v15  ;;  %v1125_v52 = vmul.f32 %v5961_v38, %v6266_v56  ;;  %v1256_v31 = vmul.f32 %v6033_v18, %v6266_v56  ;;  %v1994_v56 = vld [vmem:[#allocation2 + $0x24a] sm:$0xff] }
 0x213   :  { %v1922_v32 = vadd.f32 %v1858_v23, %v1789_v62  ;;  %v2522_v26 = vadd.f32 3.0, %v6329_v44  ;;  %989 = vst.msk [vmem:[#allocation2 + $0x2a1] sm:$0xff] %vm858_vm1, %v844_v59  ;;  %v2879_v12 = vadd.f32 %v2878_v28, %v2877_v4  ;;  %v6356_v40 = vmul.f32 %v5975_v22, %v1523_v7  ;;  %v1524_v28 = vld [vmem:[#allocation2 + $0x259] sm:$0xff] }
 0x214   :  { %v6359_v30 = vmul.f32 %v6012_v43, %v1523_v7  ;;  %v842_v54 = vmul.f32 %v778_v55, %v6280_v14  ;;  %v2880_v46 = vsel %vm858_vm1, %v6333_v51, 0.0  ;;  %v6366_v2 = vmul.f32 %v6077_v3, %v6304_v58  ;;  %v8069_v14 = vld [vmem:[#allocation43_spill] sm:$0xff] }
 0x215   :  { %v2258_v36 = vadd.f32 %v6213_v63, %v2125_v48  ;;  %v1321_v53 = vadd.f32 %v1257_v41, %v6252_v42  ;;  %v6371_v37 = vmul.f32 %v2713_v0, %v6270_v8  ;;  %v2524_v7 = vadd.f32 3.0, %v6346_v9 }
 0x216   :  { %v1657_v20 = vadd.f32 %v1593_v34, %v1452_v49  ;;  %987 = vst.msk [vmem:[#allocation2 + $0x289] sm:$0xff] %vm858_vm1, %v842_v54  ;;  %v6377_v33 = vadd.f32 %v5857_v17, %v8069_v14  ;;  %v2127_v15 = vadd.f32 %v6203_v5, %v1922_v32  ;;  %v2327_v19 = vmul.f32 %v6154_v24, %v1992_v39 }
 0x217   :  { %8068 = vst [vmem:[#allocation83_spill] sm:$0xff] %v6371_v37  ;;  %v2586_v62 = vmax.f32 %v2522_v26, 0.0  ;;  %v1390_v63 = vmul.f32 %v5922_v25, %v1055_v1  ;;  %v2881_v42 = vadd.f32 %v2880_v46, %v2879_v12  ;;  %v6383_v8 = vmul.f32 %v6077_v3, %v1994_v56 }
 0x218   :  { %v6387_v34 = vmul.f32 %v6104_v10, %v6304_v58  ;;  %v6390_v27 = vmul.f32 %v6104_v10, %v1994_v56  ;;  %v2329_v4 = vmul.f32 %v6154_v24, %v1994_v56  ;;  %v2196_v5 = vmul.f32 %v6104_v10, %v1992_v39 }
 0x219   :  { %v2391_v23 = vadd.f32 %v2327_v19, %v2258_v36  ;;  %v1454_v45 = vadd.f32 %v1390_v63, %v1321_v53  ;;  %v2882_v48 = vsel %vm858_vm1, %v6371_v37, 0.0  ;;  %v1123_v41 = vmul.f32 %v5961_v38, %v6275_v13  ;;  %v6399_v0 = vld [vmem:[#allocation2 + $0x260] sm:$0xff]  ;;  %v1526_v19 = vld [vmem:[#allocation2 + $0x271] sm:$0xff] }
 0x21a   :  { %v2588_v59 = vmax.f32 %v2524_v7, 0.0  ;;  %v1790_v58 = vadd.f32 %v6273_v35, %v1657_v20  ;;  %v2260_v49 = vadd.f32 %v2196_v5, %v2127_v15  ;;  %v2650_v55 = vmin.f32 %v2586_v62, 6.0  ;;  %v6421_v20 = vld [vmem:[#allocation2 + $0x278] sm:$0xff] }
 0x21b   :  { %v589_v32 = vadd.f32 3.0, %v6377_v33  ;;  %v6404_v26 = vadd.f32 %v5857_v17, %v5614_v21  ;;  %v1594_v12 = vmul.f32 %v5975_v22, %v6300_v6  ;;  %v2883_v54 = vadd.f32 %v2882_v48, %v2881_v42 }
 0x21c   :  { %v1859_v46 = vmul.f32 %v6063_v60, %v1524_v28  ;;  %v6411_v13 = vadd.f32 %v5857_v17, %v5679_v11  ;;  %v2064_v35 = vmul.f32 %v6077_v3, %v6289_v61  ;;  %v6416_v56 = vadd.f32 %v6186_v16, %v2391_v23 }
 0x21d   :  { %v1659_v36 = vadd.f32 %v6264_v47, %v1454_v45  ;;  %v1258_v21 = vmul.f32 %v6033_v18, %v6399_v0  ;;  %v1320_v53 = vadd.f32 %v1256_v31, %v1123_v41  ;;  %v2652_v6 = vmin.f32 %v2588_v59, 6.0 }
 0x21e   :  { %v1923_v7 = vadd.f32 %v1859_v46, %v1790_v58  ;;  %v1389_v11 = vmul.f32 %v5922_v25, %v6399_v0  ;;  %v2393_v14 = vadd.f32 %v2329_v4, %v2260_v49  ;;  %v2714_v15 = vmul.f32 0.16666667, %v2650_v55  ;;  %v6432_v4 = vld [vmem:[#allocation2 + $0x261] sm:$0xff] }
 0x21f   :  { %v1728_v61 = vmul.f32 %v6012_v43, %v1524_v28  ;;  %v1322_v62 = vadd.f32 %v1258_v21, %v1125_v52  ;;  %v2065_v63 = vmul.f32 %v6077_v3, %v1992_v39  ;;  %v1128_v47 = vmul.f32 %v5961_v38, %v1055_v1 }
 0x220   :  { %v1453_v42 = vadd.f32 %v1389_v11, %v1320_v53  ;;  %v653_v5 = vmax.f32 %v589_v32, 0.0  ;;  %v2523_v31 = vadd.f32 3.0, %v6416_v56  ;;  %v1259_v23 = vmul.f32 %v6033_v18, %v1055_v1 }
 0x221   :  { %v1792_v45 = vadd.f32 %v1728_v61, %v1659_v36  ;;  %v1391_v48 = vmul.f32 %v5922_v25, %v6421_v20  ;;  %v2716_v41 = vmul.f32 0.16666667, %v2652_v6  ;;  %v6435_v59 = vmul.f32 %v5975_v22, %v1526_v19  ;;  %v6447_v36 = vld [vmem:[#allocation2 + $0x288] sm:$0xff] }
 0x222   :  { %v2128_v52 = vadd.f32 %v2064_v35, %v1923_v7  ;;  %v1658_v39 = vadd.f32 %v1594_v12, %v1453_v42  ;;  %v6438_v58 = vadd.f32 %v6186_v16, %v2393_v14  ;;  %v6441_v49 = vmul.f32 %v2714_v15, %v6329_v44  ;;  %v6455_v7 = vld [vmem:[#allocation2 + $0x25a] sm:$0xff] }
 0x223   :  { %v1861_v1 = vmul.f32 %v6063_v60, %v1526_v19  ;;  %v1455_v55 = vadd.f32 %v1391_v48, %v1322_v62  ;;  %v1860_v46 = vmul.f32 %v6063_v60, %v6432_v4  ;;  %v717_v21 = vmin.f32 %v653_v5, 6.0 }
 0x224   :  { %8070 = vst [vmem:[#allocation43_spill] sm:$0xff] %v6441_v49  ;;  %v1791_v32 = vadd.f32 %v6359_v30, %v1658_v39  ;;  %v587_v35 = vadd.f32 3.0, %v6404_v26  ;;  %v2587_v12 = vmax.f32 %v2523_v31, 0.0  ;;  %v6451_v53 = vmul.f32 %v6012_v43, %v1526_v19 }
 0x225   :  { %v1126_v44 = vmul.f32 %v5961_v38, %v6314_v50  ;;  %v1925_v6 = vadd.f32 %v1861_v1, %v1792_v45  ;;  %v6458_v30 = vmul.f32 %v2716_v41, %v6346_v9  ;;  %v1597_v11 = vmul.f32 %v5975_v22, %v1524_v28 }
 0x226   :  { %v1924_v14 = vadd.f32 %v1860_v46, %v1791_v32  ;;  %v2261_v15 = vadd.f32 %v6387_v34, %v2128_v52  ;;  %v2884_v61 = vsel %vm858_vm1, %v6441_v49, 0.0  ;;  %v1660_v19 = vadd.f32 %v6356_v40, %v1455_v55  ;;  %v1527_v52 = vld [vmem:[#allocation2 + $0x279] sm:$0xff] }
 0x227   :  { %8071 = vst [vmem:[#allocation84_spill] sm:$0xff] %v6458_v30  ;;  %v1261_v62 = vmul.f32 %v6033_v18, %v6447_v36  ;;  %v1392_v50 = vmul.f32 %v5922_v25, %v6447_v36  ;;  %v2525_v42 = vadd.f32 3.0, %v6438_v58  ;;  %v2330_v9 = vmul.f32 %v6154_v24, %v6455_v7  ;;  %v6481_v55 = vld [vmem:[#allocation2 + $0x2a0] sm:$0xff]  ;;  %v1997_v32 = vld [vmem:[#allocation2 + $0x272] sm:$0xff] }
 0x228   :  { %v781_v28 = vmul.f32 0.16666667, %v717_v21  ;;  %v651_v5 = vmax.f32 %v587_v35, 0.0  ;;  %v2651_v31 = vmin.f32 %v2587_v12, 6.0  ;;  %v1323_v34 = vadd.f32 %v1259_v23, %v1126_v44  ;;  %v8072_v44 = vld [vmem:[#allocation47_spill] sm:$0xff] }
 0x229   :  { %v1729_v45 = vmul.f32 %v6012_v43, %v6432_v4  ;;  %v2130_v40 = vadd.f32 %v6366_v2, %v1925_v6  ;;  %v6475_v48 = vadd.f32 %v2884_v61, %v2883_v54  ;;  %v6479_v41 = vsel %vm858_vm1, %v6458_v30, 0.0  ;;  %v6586_v30 = vld [vmem:[%s7882_s5] ss:$0 sm:$0xff] }
 0x22a   :  { %v2129_v39 = vadd.f32 %v2065_v63, %v1924_v14  ;;  %v2394_v1 = vadd.f32 %v2330_v9, %v2261_v15  ;;  %v2199_v23 = vmul.f32 %v6104_v10, %v6455_v7  ;;  %v1325_v21 = vadd.f32 %v1261_v62, %v1128_v47  ;;  %v6491_v14 = vld [vmem:[#allocation2 + $0x262] sm:$0xff] }
 0x22b   :  { %v1793_v46 = vadd.f32 %v1729_v45, %v1660_v19  ;;  %v1456_v35 = vadd.f32 %v1392_v50, %v1323_v34  ;;  %v2589_v12 = vmax.f32 %v2525_v42, 0.0  ;;  %v845_v2 = vmul.f32 %v781_v28, %v6377_v33 }
 0x22c   :  { %v715_v54 = vmin.f32 %v651_v5, 6.0  ;;  %v6488_v6 = vadd.f32 %v5857_v17, %v8072_v44  ;;  %v2715_v61 = vmul.f32 0.16666667, %v2651_v31  ;;  %v1862_v63 = vmul.f32 %v6063_v60, %v1527_v52 }
 0x22d   :  { %v2263_v15 = vadd.f32 %v2199_v23, %v2130_v40  ;;  %v1394_v19 = vmul.f32 %v5922_v25, %v6481_v55  ;;  %v2332_v47 = vmul.f32 %v6154_v24, %v1997_v32  ;;  %v2262_v62 = vadd.f32 %v6390_v27, %v2129_v39  ;;  %990 = vst.msk [vmem:[#allocation2 + $0x2a9] sm:$0xff] %vm858_vm1, %v845_v2  ;;  %v8073_v27 = vld [vmem:[#allocation50_spill] sm:$0xff] }
 0x22e   :  { %v6498_v33 = vadd.f32 %v6186_v16, %v2394_v1  ;;  %v779_v50 = vmul.f32 0.16666667, %v715_v54  ;;  %v1926_v42 = vadd.f32 %v1862_v63, %v1793_v46  ;;  %v1661_v28 = vadd.f32 %v1597_v11, %v1456_v35  ;;  %v6519_v46 = vld [vmem:[#allocation2 + $0x27a] sm:$0xff]  ;;  %v6525_v2 = vld [vmem:[#allocation2 + $0x289] sm:$0xff] }
 0x22f   :  { %v1458_v9 = vadd.f32 %v1394_v19, %v1325_v21  ;;  %v592_v5 = vadd.f32 3.0, %v6411_v13  ;;  %v1129_v31 = vmul.f32 %v5961_v38, %v6421_v20  ;;  %v2331_v34 = vmul.f32 %v6154_v24, %v6491_v14 }
 0x230   :  { %v843_v45 = vmul.f32 %v779_v50, %v6404_v26  ;;  %v6509_v40 = vadd.f32 %v5857_v17, %v8073_v27  ;;  %v1260_v39 = vmul.f32 %v6033_v18, %v6421_v20  ;;  %v6514_v1 = vmul.f32 %v5975_v22, %v1527_v52 }
 0x231   :  { %v6517_v11 = vmul.f32 %v6012_v43, %v1527_v52  ;;  %v2396_v23 = vadd.f32 %v2332_v47, %v2263_v15  ;;  %v2653_v21 = vmin.f32 %v2589_v12, 6.0  ;;  %v6522_v35 = vmul.f32 %v2715_v61, %v6416_v56  ;;  %v6555_v47 = vld [vmem:[#allocation2 + $0x2a1] sm:$0xff] }
 0x232   :  { %v2395_v26 = vadd.f32 %v2331_v34, %v2262_v62  ;;  %v2526_v17 = vadd.f32 3.0, %v6498_v33  ;;  %988 = vst.msk [vmem:[#allocation2 + $0x291] sm:$0xff] %vm858_vm1, %v843_v45  ;;  %v2131_v20 = vadd.f32 %v6383_v8, %v1926_v42  ;;  %v1663_v54 = vadd.f32 %v6435_v59, %v1458_v9 }
 0x233   :  { %8074 = vst [vmem:[#allocation47_spill] sm:$0xff] %v6522_v35  ;;  %v1794_v52 = vadd.f32 %v6451_v53, %v1661_v28  ;;  %v656_v44 = vmax.f32 %v592_v5, 0.0  ;;  %v2070_v63 = vmul.f32 %v6077_v3, %v1997_v32  ;;  %v6534_v56 = vmul.f32 %v6077_v3, %v6519_v46 }
 0x234   :  { %v2201_v12 = vmul.f32 %v6104_v10, %v1997_v32  ;;  %v1127_v61 = vmul.f32 %v5961_v38, %v6399_v0  ;;  %v2200_v15 = vmul.f32 %v6104_v10, %v6491_v14  ;;  %v6542_v8 = vadd.f32 %v6186_v16, %v2396_v23 }
 0x235   :  { %v1732_v59 = vmul.f32 %v6012_v43, %v6525_v2  ;;  %v1863_v53 = vmul.f32 %v6063_v60, %v6525_v2  ;;  %v2886_v19 = vsel %vm858_vm1, %v6522_v35, 0.0  ;;  %v2333_v32 = vmul.f32 %v6154_v24, %v6519_v46  ;;  %v8098_v35 = vld [vmem:[#allocation14_spill] sm:$0xff] }
 0x236   :  { %v6553_v38 = vadd.f32 %v6186_v16, %v2395_v26  ;;  %v2590_v0 = vmax.f32 %v2526_v17, 0.0  ;;  %v2264_v62 = vadd.f32 %v2200_v15, %v2131_v20  ;;  %v720_v9 = vmin.f32 %v656_v44, 6.0  ;;  %v6568_v20 = vld [vmem:[#allocation2 + $0x2a8] sm:$0xff] }
 0x237   :  { %v1796_v50 = vadd.f32 %v1732_v59, %v1663_v54  ;;  %v1927_v42 = vadd.f32 %v1863_v53, %v1794_v52  ;;  %v2717_v28 = vmul.f32 0.16666667, %v2653_v21  ;;  %v1324_v5 = vadd.f32 %v1260_v39, %v1127_v61 }
 0x238   :  { %v1598_v34 = vmul.f32 %v5975_v22, %v6432_v4  ;;  %v590_v45 = vadd.f32 3.0, %v6488_v6  ;;  %v2887_v27 = vadd.f32 %v2886_v19, %v6475_v48  ;;  %v2068_v23 = vmul.f32 %v6077_v3, %v6455_v7 }
 0x239   :  { %v6564_v26 = vadd.f32 3.0, %v6542_v8  ;;  %v1865_v17 = vmul.f32 %v6063_v60, %v6555_v47  ;;  %v6570_v21 = vld [vmem:[#allocation2 + $0x290] sm:$0xff]  ;;  %v2527_v39 = vadd.f32 3.0, %v6553_v38  ;;  %v2654_v22 = vmin.f32 %v2590_v0, 6.0 }
 0x23a   :  { %v1262_v4 = vmul.f32 %v6033_v18, %v6570_v21  ;;  %v1393_v48 = vmul.f32 %v5922_v25, %v6570_v21  ;;  %v2397_v7 = vadd.f32 %v2333_v32, %v2264_v62  ;;  %v2132_v52 = vadd.f32 %v2068_v23, %v1927_v42  ;;  %v8076_v32 = vld [vmem:[#allocation58_spill] sm:$0xff]  ;;  %v6600_v23 = vld [vmem:[#allocation2 + $0x291] sm:$0xff] }
 0x23b   :  { %v1929_v54 = vadd.f32 %v1865_v17, %v1796_v50  ;;  %v784_v44 = vmul.f32 0.16666667, %v720_v9  ;;  %v1395_v61 = vmul.f32 %v5922_v25, %v6568_v20  ;;  %v654_v53 = vmax.f32 %v590_v45, 0.0  ;;  %v8077_v50 = vld [vmem:[#allocation35_spill] sm:$0xff] }
 0x23c   :  { %v1326_v15 = vadd.f32 %v1262_v4, %v1129_v31  ;;  %v1457_v59 = vadd.f32 %v1393_v48, %v1324_v5  ;;  %v6580_v19 = vmul.f32 %v2717_v28, %v6438_v58  ;;  %v593_v0 = vadd.f32 3.0, %v6509_v40  ;;  %v6597_v28 = vld [vmem:[#allocation2 + $0x28a] sm:$0xff] }
 0x23d   :  { %v6590_v62 = vadd.f32 %v6586_v30, %v8076_v32  ;;  %v6594_v25 = vadd.f32 %v6586_v30, %v8077_v50  ;;  %v2889_v31 = vadd.f32 %v6479_v41, %v2887_v27  ;;  %v2591_v42 = vmax.f32 %v2527_v39, 0.0 }
 0x23e   :  { %8075 = vst [vmem:[#allocation50_spill] sm:$0xff] %v6580_v19  ;;  %v1459_v58 = vadd.f32 %v1395_v61, %v1326_v15  ;;  %v1662_v9 = vadd.f32 %v1598_v34, %v1457_v59  ;;  %v2592_v5 = vmax.f32 %v6564_v26, 0.0  ;;  %v2718_v45 = vmul.f32 0.16666667, %v2654_v22 }
 0x23f   :  { %v2265_v17 = vadd.f32 %v2201_v12, %v2132_v52  ;;  %v848_v4 = vmul.f32 %v784_v44, %v6411_v13  ;;  %v6604_v48 = vadd.f32 %v6186_v16, %v2397_v7  ;;  %v2134_v50 = vadd.f32 %v2070_v63, %v1929_v54 }
 0x240   :  { %v1664_v32 = vadd.f32 %v6514_v1, %v1459_v58  ;;  %v718_v41 = vmin.f32 %v654_v53, 6.0  ;;  %v2334_v34 = vmul.f32 %v6154_v24, %v6597_v28  ;;  %v657_v27 = vmax.f32 %v593_v0, 0.0  ;;  %v6615_v1 = vld [vmem:[#allocation2 + $0x2a9] sm:$0xff] }
 0x241   :  { %993 = vst.msk [vmem:[#allocation2 + $0x2d1] sm:$0xff] %vm858_vm1, %v848_v4  ;;  %v591_v26 = vadd.f32 3.0, %v6590_v62  ;;  %v596_v39 = vadd.f32 3.0, %v6594_v25  ;;  %v2655_v12 = vmin.f32 %v2591_v42, 6.0  ;;  %v1733_v13 = vmul.f32 %v6012_v43, %v6600_v23  ;;  %v6628_v4 = vld [vmem:[#allocation2 + $0x2a2] sm:$0xff] }
 0x242   :  { %v1795_v22 = vadd.f32 %v6517_v11, %v1662_v9  ;;  %v782_v7 = vmul.f32 0.16666667, %v718_v41  ;;  %v2398_v63 = vadd.f32 %v2334_v34, %v2265_v17  ;;  %v721_v54 = vmin.f32 %v657_v27, 6.0 }
 0x243   :  { %v655_v52 = vmax.f32 %v591_v26, 0.0  ;;  %v660_v44 = vmax.f32 %v596_v39, 0.0  ;;  %v2529_v61 = vadd.f32 3.0, %v6604_v48  ;;  %v1797_v15 = vadd.f32 %v1733_v13, %v1664_v32 }
 0x244   :  { %v2203_v59 = vmul.f32 %v6104_v10, %v6597_v28  ;;  %v846_v53 = vmul.f32 %v782_v7, %v6488_v6  ;;  %v1864_v43 = vmul.f32 %v6063_v60, %v6600_v23  ;;  %v785_v0 = vmul.f32 0.16666667, %v721_v54 }
 0x245   :  { %v719_v11 = vmin.f32 %v655_v52, 6.0  ;;  %v724_v42 = vmin.f32 %v660_v44, 6.0  ;;  %v2719_v58 = vmul.f32 0.16666667, %v2655_v12  ;;  %v6624_v9 = vmul.f32 %v2718_v45, %v6498_v33  ;;  %v6639_v12 = vld [vmem:[#allocation2 + $0x171] sm:$0xff] }
 0x246   :  { %v1866_v17 = vmul.f32 %v6063_v60, %v6615_v1  ;;  %v2267_v32 = vadd.f32 %v2203_v59, %v2134_v50  ;;  %991 = vst.msk [vmem:[#allocation2 + $0x2b9] sm:$0xff] %vm858_vm1, %v846_v53  ;;  %v1928_v41 = vadd.f32 %v1864_v43, %v1795_v22  ;;  %v6632_v6 = vadd.f32 %v6186_v16, %v2398_v63  ;;  %v8083_v43 = vld [vmem:[#allocation54_spill] sm:$0xff] }
 0x247   :  { %8078 = vst [vmem:[#allocation58_spill] sm:$0xff] %v6624_v9  ;;  %v849_v34 = vmul.f32 %v785_v0, %v6509_v40  ;;  %v783_v27 = vmul.f32 0.16666667, %v719_v11  ;;  %v2890_v26 = vsel %vm858_vm1, %v6580_v19, 0.0  ;;  %v2069_v33 = vmul.f32 %v6077_v3, %v6491_v14  ;;  %8079 = vst [vmem:[#allocation35_spill] sm:$0xff] %v6639_v12  ;;  %v8084_v0 = vld [vmem:[#allocation11_spill] sm:$0xff] }
 0x248   :  { %v1930_v45 = vadd.f32 %v1866_v17, %v1797_v15  ;;  %v788_v39 = vmul.f32 0.16666667, %v724_v42  ;;  %v2593_v50 = vmax.f32 %v2529_v61, 0.0  ;;  %v2656_v13 = vmin.f32 %v2592_v5, 6.0  ;;  %v6654_v14 = vld [vmem:[%s7882_s5 + $0x5] ss:$0 sm:$0xff] }
 0x249   :  { %v1263_v22 = vmul.f32 %v6033_v18, %v6481_v55  ;;  %v2336_v7 = vmul.f32 %v6154_v24, %v6628_v4  ;;  %994 = vst.msk [vmem:[#allocation2 + $0x2d9] sm:$0xff] %vm858_vm1, %v849_v34  ;;  %v6647_v40 = vmul.f32 %v2719_v58, %v6553_v38  ;;  %v2891_v63 = vadd.f32 %v2890_v26, %v2889_v31  ;;  %v6658_v5 = vld [vmem:[#allocation2 + $0x292] sm:$0xff]  ;;  %v6665_v31 = vld [vmem:[%s7882_s5 + $0xb] ss:$0 sm:$0xff] }
 0x24a   :  { %v2892_v3 = vsel %vm858_vm1, %v6624_v9, 0.0  ;;  %v1130_v18 = vmul.f32 %v6654_v14, %v6447_v36  ;;  %v2133_v54 = vadd.f32 %v2069_v33, %v1928_v41  ;;  %v2530_v44 = vadd.f32 3.0, %v6632_v6  ;;  %v8081_v61 = vld [vmem:[#allocation76_spill] sm:$0xff]  ;;  %v2002_v41 = vld [vmem:[#allocation2 + $0x2aa] sm:$0xff]  ;;  %v8086_v33 = vld [vmem:[#allocation61_spill] sm:$0xff] }
 0x24b   :  { %8080 = vst [vmem:[#allocation85_spill] sm:$0xff] %v6647_v40  ;;  %v2400_v52 = vadd.f32 %v2336_v7, %v2267_v32  ;;  %v847_v38 = vmul.f32 %v783_v27, %v6590_v62  ;;  %v1373_v15 = vmul.f32 %v6665_v31, %v8081_v61  ;;  %v6671_v59 = vmul.f32 %v6063_v60, %v6639_v12  ;;  %v6859_v12 = vld [vmem:[%s7882_s5 + $0xd] ss:$0 sm:$0xff] }
 0x24c   :  { %v2135_v36 = vadd.f32 %v6534_v56, %v1930_v45  ;;  %v852_v53 = vmul.f32 %v788_v39, %v6594_v25  ;;  %v6677_v11 = vadd.f32 %v8084_v0, %v8083_v43  ;;  %v2202_v62 = vmul.f32 %v6104_v10, %v6519_v46  ;;  %v8089_v43 = vld [vmem:[#allocation62_spill] sm:$0xff] }
 0x24d   :  { %8082 = vst [vmem:[#allocation76_spill] sm:$0xff] %v6671_v59  ;;  %v2657_v42 = vmin.f32 %v2593_v50, 6.0  ;;  %v2720_v58 = vmul.f32 0.16666667, %v2656_v13  ;;  %v6681_v17 = vld [vmem:[#allocation2 + $0x2b8] sm:$0xff]  ;;  %992 = vst.msk [vmem:[#allocation2 + $0x2c1] sm:$0xff] %vm858_vm1, %v847_v38  ;;  %v2893_v32 = vadd.f32 %v2892_v3, %v2891_v63  ;;  %v1327_v56 = vadd.f32 %v1263_v22, %v1130_v18 }
 0x24e   :  { %8085 = vst [vmem:[#allocation54_spill] sm:$0xff] %v6677_v11  ;;  %v2894_v60 = vsel %vm858_vm1, %v6647_v40, 0.0  ;;  %v2204_v25 = vmul.f32 %v6104_v10, %v6658_v5  ;;  %997 = vst.msk [vmem:[#allocation2 + $0x301] sm:$0xff] %vm858_vm1, %v852_v53  ;;  %v2266_v34 = vadd.f32 %v2202_v62, %v2133_v54  ;;  %v6690_v46 = vadd.f32 %v6186_v16, %v2400_v52  ;;  %v6704_v10 = vld [vmem:[%s7882_s5 + $0x6] ss:$0 sm:$0xff] }
 0x24f   :  { %v2594_v27 = vmax.f32 %v2530_v44, 0.0  ;;  %v1396_v26 = vmul.f32 %v6665_v31, %v6681_v17  ;;  %v6695_v45 = vadd.f32 %v1373_v15, %v8086_v33  ;;  %v6699_v39 = vmul.f32 %v6654_v14, %v6481_v55  ;;  %v6716_v55 = vld [vmem:[%s7882_s5 + $0x8] ss:$0 sm:$0xff] }
 0x250   :  { %v1601_v50 = vmul.f32 %v6704_v10, %v6525_v2  ;;  %v2268_v13 = vadd.f32 %v2204_v25, %v2135_v36  ;;  %v2721_v22 = vmul.f32 0.16666667, %v2657_v42  ;;  %v6709_v7 = vmul.f32 %v2720_v58, %v6542_v8  ;;  %v6731_v36 = vld [vmem:[%s7882_s5 + $0x9] ss:$0 sm:$0xff] }
 0x251   :  { %8087 = vst [vmem:[#allocation11_spill] sm:$0xff] %v6695_v45  ;;  %v2335_v63 = vmul.f32 %v6154_v24, %v6658_v5  ;;  %v1460_v3 = vadd.f32 %v1396_v26, %v1327_v56  ;;  %v2895_v18 = vadd.f32 %v2894_v60, %v2893_v32  ;;  %v1264_v54 = vmul.f32 %v6716_v55, %v6568_v20  ;;  %v6750_v32 = vld [vmem:[#allocation2 + $0x2b9] sm:$0xff] }
 0x252   :  { %8088 = vst [vmem:[#allocation61_spill] sm:$0xff] %v6709_v7  ;;  %v2337_v2 = vmul.f32 %v6154_v24, %v2002_v41  ;;  %v1131_v52 = vmul.f32 %v6654_v14, %v6570_v21  ;;  %v2532_v44 = vadd.f32 3.0, %v6690_v46  ;;  %v2658_v38 = vmin.f32 %v2594_v27, 6.0 }
 0x253   :  { %v2399_v8 = vadd.f32 %v2335_v63, %v2266_v34  ;;  %v1665_v61 = vadd.f32 %v1601_v50, %v1460_v3  ;;  %v6726_v15 = vmul.f32 %v6704_v10, %v6555_v47  ;;  %v1734_v24 = vmul.f32 %v6731_v36, %v6555_v47 }
 0x254   :  { %v2401_v53 = vadd.f32 %v2337_v2, %v2268_v13  ;;  %v6737_v21 = vadd.f32 %v6586_v30, %v8089_v43  ;;  %v6740_v0 = vmul.f32 %v2721_v22, %v6604_v48  ;;  %v2896_v62 = vsel %vm858_vm1, %v6709_v7, 0.0  ;;  %v6752_v47 = vld [vmem:[#allocation2 + $0x2c0] sm:$0xff] }
 0x255   :  { %v1133_v42 = vmul.f32 %v6654_v14, %v6568_v20  ;;  %v6748_v58 = vmul.f32 %v6704_v10, %v6615_v1  ;;  %v1735_v60 = vmul.f32 %v6731_v36, %v6615_v1  ;;  %v6759_v48 = vld [vmem:[%s7882_s5 + $0x7] ss:$0 sm:$0xff]  ;;  %v1328_v20 = vadd.f32 %v1264_v54, %v1131_v52  ;;  %v6774_v1 = vld [vmem:[%s7882_s5 + $0xc] ss:$0 sm:$0xff] }
 0x256   :  { %8090 = vst [vmem:[#allocation62_spill] sm:$0xff] %v6740_v0  ;;  %v6763_v56 = vmul.f32 %v6759_v48, %v6628_v4  ;;  %v1798_v25 = vadd.f32 %v1734_v24, %v1665_v61  ;;  %v2897_v34 = vadd.f32 %v2896_v62, %v2895_v18  ;;  %v6766_v27 = vadd.f32 %v6186_v16, %v2399_v8  ;;  %v6813_v62 = vld [vmem:[#allocation2 + $0x2d1] sm:$0xff] }
 0x257   :  { %v2596_v26 = vmax.f32 %v2532_v44, 0.0  ;;  %v2722_v33 = vmul.f32 0.16666667, %v2658_v38  ;;  %v6769_v50 = vadd.f32 %v6186_v16, %v2401_v53  ;;  %v1867_v13 = vmul.f32 %v6774_v1, %v6750_v32  ;;  %v6789_v16 = vld [vmem:[%s7882_s5 + $0xa] ss:$0 sm:$0xff]  ;;  %v1063_v44 = vld [vmem:[#allocation2 + $0x2d0] sm:$0xff] }
 0x258   :  { %v1397_v22 = vmul.f32 %v6665_v31, %v6752_v47  ;;  %v594_v63 = vadd.f32 3.0, %v6737_v21  ;;  %v2898_v3 = vsel %vm858_vm1, %v6740_v0, 0.0  ;;  %v6784_v18 = vmul.f32 %v6759_v48, %v2002_v41 }
 0x259   :  { %8091 = vst [vmem:[#allocation86_spill] sm:$0xff] %v6769_v50  ;;  %v2205_v54 = vmul.f32 %v6789_v16, %v6628_v4  ;;  %v6794_v2 = vmul.f32 %v6789_v16, %v2002_v41  ;;  %v1602_v52 = vmul.f32 %v6704_v10, %v6600_v23  ;;  %v2072_v8 = vmul.f32 %v6759_v48, %v6597_v28 }
 0x25a   :  { %v1931_v38 = vadd.f32 %v1867_v13, %v1798_v25  ;;  %v1461_v61 = vadd.f32 %v1397_v22, %v1328_v20  ;;  %v6802_v24 = vmul.f32 %v6759_v48, %v6658_v5  ;;  %v2531_v53 = vadd.f32 3.0, %v6766_v27  ;;  %v8095_v13 = vld [vmem:[#allocation78_spill] sm:$0xff] }
 0x25b   :  { %v2660_v43 = vmin.f32 %v2596_v26, 6.0  ;;  %v6806_v4 = vmul.f32 %v2722_v33, %v6632_v6  ;;  %v6809_v41 = vadd.f32 3.0, %v6769_v50  ;;  %v6811_v23 = vadd.f32 %v2898_v3, %v2897_v34  ;;  %v6823_v26 = vld [vmem:[#allocation2 + $0x2d8] sm:$0xff]  ;;  %v8094_v6 = vld [vmem:[#allocation73_spill] sm:$0xff] }
 0x25c   :  { %v1265_v28 = vmul.f32 %v6716_v55, %v6681_v17  ;;  %v658_v20 = vmax.f32 %v594_v63, 0.0  ;;  %v6818_v5 = vmul.f32 %v6654_v14, %v1063_v44  ;;  %v6821_v25 = vmul.f32 %v6716_v55, %v1063_v44 }
 0x25d   :  { %8092 = vst [vmem:[#allocation87_spill] sm:$0xff] %v6806_v4  ;;  %v519_v33 = vadd.f32 %v6586_v30, %v8094_v6  ;;  %v511_v34 = vadd.f32 %v6586_v30, %v8095_v13  ;;  %v1398_v22 = vmul.f32 %v6665_v31, %v1063_v44  ;;  %v2136_v3 = vadd.f32 %v2072_v8, %v1931_v38 }
 0x25e   :  { %8093 = vst [vmem:[#allocation88_spill] sm:$0xff] %v6818_v5  ;;  %v1266_v63 = vmul.f32 %v6716_v55, %v6752_v47  ;;  %v1666_v0 = vadd.f32 %v1602_v52, %v1461_v61  ;;  %v2595_v7 = vmax.f32 %v2531_v53, 0.0  ;;  %v6832_v40 = vmul.f32 0.16666667, %v2660_v43  ;;  %v6846_v52 = vld [vmem:[#allocation2 + $0x2c1] sm:$0xff] }
 0x25f   :  { %v6836_v9 = vsel %vm858_vm1, %v6806_v4, 0.0  ;;  %v6840_v6 = vmul.f32 %v6704_v10, %v6813_v62  ;;  %v1329_v44 = vadd.f32 %v1265_v28, %v6699_v39  ;;  %v1399_v8 = vmul.f32 %v6665_v31, %v6823_v26  ;;  %v6848_v61 = vld [vmem:[#allocation2 + $0x2ba] sm:$0xff] }
 0x260   :  { %v722_v38 = vmin.f32 %v658_v20, 6.0  ;;  %v597_v53 = vadd.f32 3.0, %v519_v33  ;;  %v595_v43 = vadd.f32 3.0, %v511_v34  ;;  %v8097_v4 = vld [vmem:[#allocation12_spill] sm:$0xff]  ;;  %v524_v49 = vadd.f32 %v6586_v30, %v8098_v35 }
 0x261   :  { %8096 = vst [vmem:[#allocation73_spill] sm:$0xff] %v6840_v6  ;;  %v532_v19 = vadd.f32 %v6586_v30, %v8097_v4  ;;  %v1330_v37 = vadd.f32 %v1266_v63, %v1133_v42  ;;  %v1799_v13 = vadd.f32 %v1735_v60, %v1666_v0  ;;  %v2269_v51 = vadd.f32 %v2205_v54, %v2136_v3 }
 0x262   :  { %v786_v39 = vmul.f32 0.16666667, %v722_v38  ;;  %v661_v28 = vmax.f32 %v597_v53, 0.0  ;;  %v659_v57 = vmax.f32 %v595_v43, 0.0  ;;  %v598_v20 = vadd.f32 3.0, %v524_v49 }
 0x263   :  { %v600_v29 = vadd.f32 3.0, %v532_v19  ;;  %v1462_v59 = vadd.f32 %v1398_v22, %v1329_v44  ;;  %v1868_v45 = vmul.f32 %v6774_v1, %v6846_v52  ;;  %v2338_v35 = vmul.f32 %v6859_v12, %v6848_v61  ;;  %v8099_v44 = vld [vmem:[#allocation40_spill] sm:$0xff] }
 0x264   :  { %v850_v0 = vmul.f32 %v786_v39, %v6737_v21  ;;  %v725_v42 = vmin.f32 %v661_v28, 6.0  ;;  %v723_v60 = vmin.f32 %v659_v57, 6.0  ;;  %v662_v4 = vmax.f32 %v598_v20, 0.0 }
 0x265   :  { %v664_v54 = vmax.f32 %v600_v29, 0.0  ;;  %v1463_v3 = vadd.f32 %v1399_v8, %v1330_v37  ;;  %v1932_v63 = vadd.f32 %v1868_v45, %v1799_v13  ;;  %v2402_v22 = vadd.f32 %v2338_v35, %v2269_v51  ;;  %v2947_v51 = vld [vmem:[%s7879_s2 + $0x10] sm:$0xff]  ;;  %v2948_v37 = vld [vmem:[%s7879_s2 + $0x18] sm:$0xff] }
 0x266   :  { %995 = vst.msk [vmem:[#allocation2 + $0x2e9] sm:$0xff] %vm858_vm1, %v850_v0  ;;  %v535_v38 = vadd.f32 %v6586_v30, %v8099_v44  ;;  %v789_v53 = vmul.f32 0.16666667, %v725_v42  ;;  %v787_v43 = vmul.f32 0.16666667, %v723_v60  ;;  %v726_v6 = vmin.f32 %v662_v4, 6.0 }
 0x267   :  { %v728_v11 = vmin.f32 %v664_v54, 6.0  ;;  %v2659_v5 = vmin.f32 %v2595_v7, 6.0  ;;  %v1667_v50 = vadd.f32 %v6726_v15, %v1462_v59  ;;  %v1736_v57 = vmul.f32 %v6731_v36, %v6750_v32  ;;  %v6881_v15 = vld [vmem:[%s7882_s5 + $0x1] ss:$0 sm:$0xff] }
 0x268   :  { %v601_v29 = vadd.f32 3.0, %v535_v38  ;;  %v853_v45 = vmul.f32 %v789_v53, %v519_v33  ;;  %v851_v21 = vmul.f32 %v787_v43, %v511_v34  ;;  %v790_v8 = vmul.f32 0.16666667, %v726_v6  ;;  %8100 = vst [vmem:[#allocation78_spill] sm:$0xff] %v6881_v15  ;;  %v8103_v54 = vld [vmem:[#allocation41_spill] sm:$0xff]  ;;  %v2005_v43 = vld [vmem:[#allocation2 + $0x2d2] sm:$0xff] }
 0x269   :  { %v792_v13 = vmul.f32 0.16666667, %v728_v11  ;;  %v1668_v7 = vadd.f32 %v6748_v58, %v1463_v3  ;;  %v2137_v59 = vadd.f32 %v6802_v24, %v1932_v63  ;;  %v6884_v39 = vadd.f32 %v6881_v15, %v2402_v22 }
 0x26a   :  { %v665_v28 = vmax.f32 %v601_v29, 0.0  ;;  %998 = vst.msk [vmem:[#allocation2 + $0x309] sm:$0xff] %vm858_vm1, %v853_v45  ;;  %996 = vst.msk [vmem:[#allocation2 + $0x2f1] sm:$0xff] %vm858_vm1, %v851_v21  ;;  %v854_v11 = vmul.f32 %v790_v8, %v524_v49  ;;  %v4103_v34 = vpack.c.bf16 %v2948_v37, %v2947_v51  ;;  %v1134_v58 = vmul.f32 %v6654_v14, %v6681_v17  ;;  %v1535_v17 = vld [vmem:[#allocation2 + $0x2d9] sm:$0xff] }
 0x26b   :  { %v856_v33 = vmul.f32 %v792_v13, %v532_v19  ;;  %v1800_v24 = vadd.f32 %v1736_v57, %v1667_v50  ;;  %v1737_v6 = vmul.f32 %v6731_v36, %v6846_v52  ;;  %v8101_v35 = vmov 0.0   ;;  %v6904_v50 = vld [vmem:[#allocation2 + $0x2c2] sm:$0xff] }
 0x26c   :  { %v729_v20 = vmin.f32 %v665_v28, 6.0  ;;  %4023 = vmatprep.mubr.msk.f32.mxu0 %vm4270_vm4, %v8101_v35  ;;  %4028 = vmatprep.mubr.msk.f32.mxu1 %vm4270_vm4, %v8101_v35  ;;  %v2723_v0 = vmul.f32 0.16666667, %v2659_v5  ;;  %v6896_v42 = vmul.f32 %v6832_v40, %v6690_v46  ;;  %v6900_v49 = vmul.f32 %v6731_v36, %v6813_v62  ;;  %999 = vst.msk [vmem:[#allocation2 + $0x319] sm:$0xff] %vm858_vm1, %v854_v11 }
 0x26d   :  { %v1869_v19 = vmul.f32 %v6774_v1, %v6813_v62  ;;  %1001 = vst.msk [vmem:[#allocation2 + $0x331] sm:$0xff] %vm858_vm1, %v856_v33  ;;  %4104 = vmatpush3.bf16.msra.mxu0 %v4103_v34  ;;  %v2901_v5 = vadd.f32 %v6836_v9, %v6811_v23  ;;  %v1801_v40 = vadd.f32 %v1737_v6, %v1668_v7  ;;  %v6911_v60 = vld [vmem:[#allocation2 + $0x2e8] sm:$0xff]  ;;  %v8104_v62 = vmax.f32 %v6809_v41, 0.0 }
 0x26e   :  { %8102 = vst [vmem:[#allocation12_spill] sm:$0xff] %v6896_v42  ;;  %v2270_v46 = vadd.f32 %v6794_v2, %v2137_v59  ;;  %v6915_v4 = vadd.f32 %v6586_v30, %v8103_v54  ;;  %v1605_v63 = vmul.f32 %v6704_v10, %v6750_v32  ;;  %v2534_v22 = vadd.f32 3.0, %v6884_v39  ;;  %v2006_v32 = vld [vmem:[#allocation2 + $0x2da] sm:$0xff] }
 0x26f   :  { %v2661_v3 = vmin.f32 %v8104_v62, 6.0  ;;  %v793_v44 = vmul.f32 0.16666667, %v729_v20  ;;  %v1331_v9 = vadd.f32 %v6821_v25, %v1134_v58  ;;  %v1933_v23 = vadd.f32 %v1869_v19, %v1800_v24  ;;  %v1067_v54 = vld [vmem:[#allocation2 + $0x300] sm:$0xff] }
 0x270   :  { %v1870_v2 = vmul.f32 %v6774_v1, %v1535_v17  ;;  %v2339_v53 = vmul.f32 %v6859_v12, %v6904_v50  ;;  %v6927_v30 = vmul.f32 %v2723_v0, %v6766_v27  ;;  %v6931_v41 = vmul.f32 %v6654_v14, %v6823_v26 }
 0x271   :  { %v1400_v57 = vmul.f32 %v6665_v31, %v6911_v60  ;;  %v857_v29 = vmul.f32 %v793_v44, %v535_v38  ;;  %v1268_v25 = vmul.f32 %v6716_v55, %v6823_v26  ;;  %v599_v45 = vadd.f32 3.0, %v6915_v4  ;;  %v6979_v62 = vld [vmem:[#allocation2 + $0x2f0] sm:$0xff]  ;;  %v1538_v44 = vld [vmem:[#allocation2 + $0x301] sm:$0xff] }
 0x272   :  { %8105 = vst [vmem:[#allocation14_spill] sm:$0xff] %v6927_v30  ;;  %v1934_v51 = vadd.f32 %v1870_v2, %v1801_v40  ;;  %v2403_v37 = vadd.f32 %v2339_v53, %v2270_v46  ;;  %v2725_v21 = vmul.f32 0.16666667, %v2661_v3  ;;  %v6939_v27 = vmul.f32 %v6704_v10, %v1535_v17 }
 0x273   :  { %v6942_v13 = vmul.f32 %v6731_v36, %v1535_v17  ;;  %v2598_v8 = vmax.f32 %v2534_v22, 0.0  ;;  %1002 = vst.msk [vmem:[#allocation2 + $0x339] sm:$0xff] %vm858_vm1, %v857_v29  ;;  %v6946_v7 = vmul.f32 %v6759_v48, %v2005_v43  ;;  %v6949_v38 = vmul.f32 %v6759_v48, %v2006_v32 }
 0x274   :  { %v6952_v26 = vmul.f32 %v6789_v16, %v2005_v43  ;;  %v2138_v59 = vadd.f32 %v6763_v56, %v1933_v23  ;;  %v2902_v28 = vsel %vm858_vm1, %v6927_v30, 0.0  ;;  %v1135_v33 = vmul.f32 %v6654_v14, %v6752_v47  ;;  %v8107_v56 = vld [vmem:[#allocation86_spill] sm:$0xff] }
 0x275   :  { %v1269_v11 = vmul.f32 %v6716_v55, %v6911_v60  ;;  %v1464_v34 = vadd.f32 %v1400_v57, %v1331_v9  ;;  %v2139_v58 = vadd.f32 %v6784_v18, %v1934_v51  ;;  %v2207_v24 = vmul.f32 %v6789_v16, %v6848_v61  ;;  %v8110_v9 = vld [vmem:[#allocation88_spill] sm:$0xff] }
 0x276   :  { %v6965_v6 = vadd.f32 %v6881_v15, %v2403_v37  ;;  %v663_v20 = vmax.f32 %v599_v45, 0.0  ;;  %v6968_v35 = vmul.f32 %v2725_v21, %v8107_v56  ;;  %v6971_v0 = vmul.f32 %v6789_v16, %v2006_v32  ;;  %v1536_v45 = vld [vmem:[#allocation2 + $0x2e9] sm:$0xff] }
 0x277   :  { %v2340_v47 = vmul.f32 %v6859_v12, %v2005_v43  ;;  %v2662_v19 = vmin.f32 %v2598_v8, 6.0  ;;  %v6974_v17 = vadd.f32 %v2902_v28, %v2901_v5  ;;  %v2341_v18 = vmul.f32 %v6859_v12, %v2006_v32  ;;  %v1037_v28 = vld [vmem:[#allocation2 + $0x198] sm:$0xff] }
 0x278   :  { %8106 = vst [vmem:[#allocation40_spill] sm:$0xff] %v6965_v6  ;;  %8108 = vst [vmem:[#allocation41_spill] sm:$0xff] %v6968_v35  ;;  %v2208_v40 = vmul.f32 %v6789_v16, %v6904_v50  ;;  %v2271_v46 = vadd.f32 %v2207_v24, %v2138_v59  ;;  %v1332_v3 = vadd.f32 %v1268_v25, %v1135_v33  ;;  %v2535_v43 = vadd.f32 3.0, %v6965_v6  ;;  %v1038_v24 = vld [vmem:[#allocation2 + $0x1a0] sm:$0xff] }
 0x279   :  { %8109 = vst [vmem:[#allocation86_spill] sm:$0xff] %v6974_v17  ;;  %v1606_v22 = vmul.f32 %v6704_v10, %v6846_v52  ;;  %v1333_v23 = vadd.f32 %v1269_v11, %v8110_v9  ;;  %v1669_v2 = vadd.f32 %v1605_v63, %v1464_v34  ;;  %v2076_v5 = vmul.f32 %v6759_v48, %v6848_v61  ;;  %v8116_v9 = vld [vmem:[#allocation9_spill] sm:$0xff] }
 0x27a   :  { %v2272_v53 = vadd.f32 %v2208_v40, %v2139_v58  ;;  %v727_v32 = vmin.f32 %v663_v20, 6.0  ;;  %v6989_v57 = vmul.f32 %v6759_v48, %v6904_v50  ;;  %v2726_v29 = vmul.f32 0.16666667, %v2662_v19  ;;  %v1073_v20 = vld [vmem:[#allocation2 + $0x348] sm:$0xff] }
 0x27b   :  { %v1402_v25 = vmul.f32 %v6665_v31, %v1067_v54  ;;  %v1401_v52 = vmul.f32 %v6665_v31, %v6979_v62  ;;  %v6994_v51 = vadd.f32 %v2340_v47, %v2271_v46  ;;  %v6997_v63 = vmul.f32 %v6654_v14, %v1067_v54  ;;  %v8114_v46 = vld [vmem:[#allocation67_spill] sm:$0xff] }
 0x27c   :  { %v1271_v61 = vmul.f32 %v6716_v55, %v1067_v54  ;;  %v7001_v37 = vmul.f32 %v6704_v10, %v1538_v44  ;;  %v7004_v50 = vmul.f32 %v6731_v36, %v1538_v44  ;;  %v1873_v21 = vmul.f32 %v6774_v1, %v1538_v44  ;;  %v8115_v54 = vld [vmem:[#allocation18_spill] sm:$0xff] }
 0x27d   :  { %8111 = vst [vmem:[#allocation88_spill] sm:$0xff] %v6994_v51  ;;  %v1466_v8 = vadd.f32 %v1402_v25, %v1333_v23  ;;  %v1802_v59 = vadd.f32 %v6900_v49, %v1669_v2  ;;  %v7008_v33 = vadd.f32 %v2341_v18, %v2272_v53  ;;  %v2599_v11 = vmax.f32 %v2535_v43, 0.0  ;;  %v1074_v18 = vld [vmem:[#allocation2 + $0x350] sm:$0xff] }
 0x27e   :  { %v1270_v34 = vmul.f32 %v6716_v55, %v6979_v62  ;;  %v791_v58 = vmul.f32 0.16666667, %v727_v32  ;;  %v7013_v56 = vmul.f32 %v2726_v29, %v6884_v39  ;;  %v1138_v47 = vmul.f32 %v6654_v14, %v6911_v60  ;;  %v8117_v23 = vld [vmem:[#allocation71_spill] sm:$0xff]  ;;  %v8118_v39 = vld [vmem:[#allocation73_spill] sm:$0xff]  ;;  %v1068_v29 = vld [vmem:[#allocation2 + $0x308] sm:$0xff] }
 0x27f   :  { %8112 = vst [vmem:[#allocation89_spill] sm:$0xff] %v7008_v33  ;;  %v1871_v19 = vmul.f32 %v6774_v1, %v1536_v45  ;;  %v1465_v40 = vadd.f32 %v1401_v52, %v1332_v3  ;;  %v1307_v44 = vadd.f32 %v8115_v54, %v8114_v46  ;;  %v7023_v2 = vadd.f32 %v8117_v23, %v8116_v9  ;;  %v1069_v9 = vld [vmem:[#allocation2 + $0x318] sm:$0xff] }
 0x280   :  { %8113 = vst [vmem:[#allocation90_spill] sm:$0xff] %v7013_v56  ;;  %v855_v49 = vmul.f32 %v791_v58, %v6915_v4  ;;  %v1376_v53 = vmul.f32 %v6665_v31, %v1037_v28  ;;  %v1671_v43 = vadd.f32 %v8118_v39, %v1466_v8  ;;  %v7028_v60 = vmul.f32 %v6665_v31, %v1038_v24  ;;  %v1537_v39 = vld [vmem:[#allocation2 + $0x2f1] sm:$0xff] }
 0x281   :  { %v1935_v32 = vadd.f32 %v1871_v19, %v1802_v59  ;;  %v7031_v3 = vmul.f32 %v6665_v31, %v1073_v20  ;;  %v7033_v4 = vmin.f32 %v2599_v11, 6.0  ;;  %v7036_v25 = vmul.f32 %v6704_v10, %v1536_v45  ;;  %v1539_v59 = vld [vmem:[#allocation2 + $0x309] sm:$0xff]  ;;  %v8120_v19 = vld [vmem:[#allocation72_spill] sm:$0xff]  ;;  %v8121_v20 = vld [vmem:[#allocation65_spill] sm:$0xff] }
 0x282   :  { %v1740_v52 = vmul.f32 %v6731_v36, %v1536_v45  ;;  %v1334_v58 = vadd.f32 %v1270_v34, %v6931_v41  ;;  %1000 = vst.msk [vmem:[#allocation2 + $0x321] sm:$0xff] %vm858_vm1, %v855_v49  ;;  %v1335_v8 = vadd.f32 %v1271_v61, %v1138_v47  ;;  %v1670_v28 = vadd.f32 %v1606_v22, %v1465_v40  ;;  %v1071_v45 = vld [vmem:[#allocation2 + $0x330] sm:$0xff]  ;;  %v8122_v41 = vld [vmem:[#allocation54_spill] sm:$0xff] }
 0x283   :  { %8119 = vst [vmem:[#allocation67_spill] sm:$0xff] %v7033_v4  ;;  %v7042_v24 = vmul.f32 %v6665_v31, %v1074_v18  ;;  %v7046_v46 = vadd.f32 %v8121_v20, %v8120_v19  ;;  %v7049_v11 = vmul.f32 %v6654_v14, %v1068_v29  ;;  %v1403_v54 = vmul.f32 %v6665_v31, %v1068_v29  ;;  %v8123_v34 = vld [vmem:[#allocation75_spill] sm:$0xff]  ;;  %v7059_v18 = vld [vmem:[#allocation2 + $0x302] sm:$0xff] }
 0x284   :  { %v7054_v49 = vadd.f32 %v8123_v34, %v8122_v41  ;;  %v7056_v61 = vadd.f32 %v1376_v53, %v1307_v44  ;;  %v1804_v22 = vadd.f32 %v1740_v52, %v1671_v43  ;;  %v2140_v47 = vadd.f32 %v2076_v5, %v1935_v32  ;;  %v2007_v53 = vld [vmem:[#allocation2 + $0x2ea] sm:$0xff]  ;;  %v7073_v43 = vld [vmem:[#allocation2 + $0x2f2] sm:$0xff] }
 0x285   :  { %v1272_v40 = vmul.f32 %v6716_v55, %v1068_v29  ;;  %v1139_v23 = vmul.f32 %v6654_v14, %v6979_v62  ;;  %v7064_v19 = vmul.f32 %v6704_v10, %v1539_v59  ;;  %v7067_v20 = vmul.f32 %v6731_v36, %v1539_v59  ;;  %v1542_v56 = vld [vmem:[#allocation2 + $0x331] sm:$0xff] }
 0x286   :  { %v7070_v41 = vmul.f32 %v6774_v1, %v1539_v59  ;;  %v1467_v44 = vadd.f32 %v1403_v54, %v1334_v58  ;;  %v1803_v5 = vadd.f32 %v6942_v13, %v1670_v28  ;;  %v1275_v32 = vmul.f32 %v6716_v55, %v1071_v45 }
 0x287   :  { %v1142_v62 = vmul.f32 %v6654_v14, %v1069_v9  ;;  %v1273_v29 = vmul.f32 %v6716_v55, %v1069_v9  ;;  %v7080_v52 = vmul.f32 %v6859_v12, %v7059_v18  ;;  %v7083_v34 = vmul.f32 %v6704_v10, %v1537_v39 }
 0x288   :  { %v1741_v58 = vmul.f32 %v6731_v36, %v1537_v39  ;;  %v1404_v13 = vmul.f32 %v6665_v31, %v1069_v9  ;;  %v7087_v59 = vadd.f32 %v1873_v21, %v1804_v22  ;;  %v1336_v28 = vadd.f32 %v1272_v40, %v1139_v23  ;;  %v1072_v21 = vld [vmem:[#allocation2 + $0x338] sm:$0xff] }
 0x289   :  { %8124 = vst [vmem:[#allocation18_spill] sm:$0xff] %v7080_v52  ;;  %v1872_v54 = vmul.f32 %v6774_v1, %v1537_v39  ;;  %v2273_v30 = vadd.f32 %v6952_v26, %v2140_v47  ;;  %v1672_v35 = vadd.f32 %v6939_v27, %v1467_v44  ;;  %v7093_v17 = vmul.f32 %v6759_v48, %v2007_v53  ;;  %v1070_v9 = vld [vmem:[#allocation2 + $0x320] sm:$0xff]  ;;  %v1545_v52 = vld [vmem:[#allocation2 + $0x351] sm:$0xff] }
 0x28a   :  { %v7096_v42 = vmul.f32 %v6789_v16, %v2007_v53  ;;  %v7100_v6 = vmul.f32 %v6789_v16, %v7073_v43  ;;  %v2342_v40 = vmul.f32 %v6859_v12, %v2007_v53  ;;  %v1337_v26 = vadd.f32 %v1273_v29, %v6997_v63  ;;  %v1540_v47 = vld [vmem:[#allocation2 + $0x319] sm:$0xff] }
 0x28b   :  { %v1936_v22 = vadd.f32 %v1872_v54, %v1803_v5  ;;  %v1339_v23 = vadd.f32 %v1275_v32, %v1142_v62  ;;  %v7106_v27 = vmul.f32 %v6859_v12, %v7073_v43  ;;  %v1406_v39 = vmul.f32 %v6665_v31, %v1071_v45 }
 0x28c   :  { %v7110_v44 = vmul.f32 %v6774_v1, %v1542_v56  ;;  %v1468_v4 = vadd.f32 %v1404_v13, %v1335_v8  ;;  %v7112_v33 = vadd.f32 %v2342_v40, %v2273_v30  ;;  %v1276_v5 = vmul.f32 %v6716_v55, %v1072_v21  ;;  %v8127_v40 = vld [vmem:[#allocation35_spill] sm:$0xff] }
 0x28d   :  { %8125 = vst [vmem:[#allocation9_spill] sm:$0xff] %v7106_v27  ;;  %v1143_v53 = vmul.f32 %v6654_v14, %v1070_v9  ;;  %v1274_v63 = vmul.f32 %v6716_v55, %v1070_v9  ;;  %v7117_v29 = vadd.f32 %v1741_v58, %v1672_v35  ;;  %v1744_v32 = vmul.f32 %v6731_v36, %v1540_v47  ;;  %v4149_v58 = vld [vmem:[#allocation2 + $0x169] sm:$0xff] }
 0x28e   :  { %8126 = vst [vmem:[#allocation71_spill] sm:$0xff] %v7112_v33  ;;  %v7121_v62 = vmul.f32 %v6774_v1, %v1540_v47  ;;  %v1441_v45 = vadd.f32 %v7028_v60, %v7023_v2  ;;  %v7126_v8 = vadd.f32 %v6989_v57, %v1936_v22  ;;  %v1407_v30 = vmul.f32 %v6665_v31, %v1072_v21  ;;  %v1507_v57 = vld [vmem:[#allocation2 + $0x189] sm:$0xff]  ;;  %v1543_v22 = vld [vmem:[#allocation2 + $0x339] sm:$0xff] }
 0x28f   :  { %v1470_v13 = vadd.f32 %v1406_v39, %v1337_v26  ;;  %v1472_v14 = vadd.f32 %v7031_v3, %v1339_v23  ;;  %v1673_v55 = vadd.f32 %v7036_v25, %v1468_v4  ;;  %v1405_v35 = vmul.f32 %v6665_v31, %v1070_v9  ;;  %v8128_v26 = vld [vmem:[#allocation11_spill] sm:$0xff]  ;;  %v8129_v39 = vld [vmem:[#allocation17_spill] sm:$0xff] }
 0x290   :  { %v1581_v54 = vmul.f32 %v4149_v58, %v6704_v10  ;;  %v1582_v33 = vmul.f32 %v6704_v10, %v8127_v40  ;;  %v1338_v2 = vadd.f32 %v1274_v63, %v7049_v11  ;;  %v1340_v60 = vadd.f32 %v1276_v5, %v1143_v53  ;;  %v8130_v4 = vld [vmem:[#allocation25_spill] sm:$0xff]  ;;  %v8131_v31 = vld [vmem:[#allocation55_spill] sm:$0xff] }
 0x291   :  { %v1613_v21 = vmul.f32 %v6704_v10, %v1540_v47  ;;  %v1642_v3 = vadd.f32 %v8129_v39, %v8128_v26  ;;  %v1643_v25 = vadd.f32 %v8130_v4, %v7046_v46  ;;  %v1644_v9 = vadd.f32 %v8131_v31, %v7054_v49  ;;  %v4150_v53 = vld [vmem:[#allocation2 + $0x181] sm:$0xff]  ;;  %v1508_v39 = vld [vmem:[#allocation2 + $0x199] sm:$0xff] }
 0x292   :  { %v1645_v23 = vadd.f32 %v1581_v54, %v7056_v61  ;;  %v1646_v58 = vadd.f32 %v1582_v33, %v1441_v45  ;;  %v1675_v51 = vadd.f32 %v7001_v37, %v1470_v13  ;;  %v1713_v5 = vmul.f32 %v6731_v36, %v8127_v40  ;;  %v1541_v26 = vld [vmem:[#allocation2 + $0x321] sm:$0xff]  ;;  %v8135_v31 = vld [vmem:[#allocation68_spill] sm:$0xff] }
 0x293   :  { %v1677_v11 = vadd.f32 %v1613_v21, %v1472_v14  ;;  %v1714_v47 = vmul.f32 %v4150_v53, %v6731_v36  ;;  %v1469_v63 = vadd.f32 %v1405_v35, %v1336_v28  ;;  %v1715_v46 = vmul.f32 %v6731_v36, %v1507_v57  ;;  %v1509_v37 = vld [vmem:[#allocation2 + $0x1a1] sm:$0xff]  ;;  %v1544_v21 = vld [vmem:[#allocation2 + $0x349] sm:$0xff] }
 0x294   :  { %v1746_v4 = vmul.f32 %v6731_v36, %v1542_v56  ;;  %v1747_v49 = vmul.f32 %v6731_v36, %v1543_v22  ;;  %v1471_v61 = vadd.f32 %v1407_v30, %v1338_v2  ;;  %v1473_v33 = vadd.f32 %v7042_v24, %v1340_v60  ;;  %v8132_v45 = vld [vmem:[#allocation77_spill] sm:$0xff] }
 0x295   :  { %v8133_v13 = vld [vmem:[#allocation49_spill] sm:$0xff]  ;;  %v1776_v28 = vadd.f32 %v8135_v31, %v1643_v25  ;;  %v1777_v35 = vadd.f32 %v1713_v5, %v1644_v9  ;;  %v1778_v53 = vadd.f32 %v1714_v47, %v1645_v23  ;;  %v1779_v15 = vadd.f32 %v1715_v46, %v1646_v58  ;;  %v8140_v47 = vld [vmem:[#allocation66_spill] sm:$0xff] }
 0x296   :  { %v1774_v14 = vadd.f32 %v8133_v13, %v8132_v45  ;;  %v8134_v54 = vld [vmem:[#allocation33_spill] sm:$0xff]  ;;  %v1614_v56 = vmul.f32 %v6704_v10, %v1541_v26  ;;  %v1806_v27 = vadd.f32 %v7004_v50, %v1673_v55  ;;  %v1808_v30 = vadd.f32 %v1744_v32, %v1675_v51  ;;  %v8137_v51 = vld [vmem:[#allocation56_spill] sm:$0xff]  ;;  %v8138_v55 = vld [vmem:[#allocation70_spill] sm:$0xff] }
 0x297   :  { %v1775_v40 = vadd.f32 %v8134_v54, %v1642_v3  ;;  %v1847_v24 = vmul.f32 %v6774_v1, %v1508_v39  ;;  %v1674_v2 = vadd.f32 %v7083_v34, %v1469_v63  ;;  %v1810_v60 = vadd.f32 %v1746_v4, %v1677_v11  ;;  %v8136_v50 = vld [vmem:[#allocation69_spill] sm:$0xff]  ;;  %v8139_v34 = vld [vmem:[#allocation76_spill] sm:$0xff] }
 0x298   :  { %v1846_v45 = vmul.f32 %v6774_v1, %v1507_v57  ;;  %v1848_v3 = vmul.f32 %v6774_v1, %v1509_v37  ;;  %v1676_v25 = vadd.f32 %v7064_v19, %v1471_v61  ;;  %v1678_v9 = vadd.f32 %v1614_v56, %v1473_v33  ;;  %v7172_v46 = vld [vmem:[#allocation2 + $0x15a] sm:$0xff]  ;;  %v7178_v33 = vld [vmem:[#allocation2 + $0x16a] sm:$0xff]  ;;  %v7180_v37 = vld [vmem:[#allocation2 + $0x172] sm:$0xff] }
 0x299   :  { %v1878_v23 = vmul.f32 %v6774_v1, %v1543_v22  ;;  %v1879_v58 = vmul.f32 %v6774_v1, %v1544_v21  ;;  %v1880_v10 = vmul.f32 %v6774_v1, %v1545_v52  ;;  %v1906_v32 = vadd.f32 %v8137_v51, %v8136_v50  ;;  %v7186_v21 = vld [vmem:[#allocation2 + $0x31a] sm:$0xff] }
 0x29a   :  { %v1907_v5 = vadd.f32 %v8138_v55, %v1774_v14  ;;  %v1908_v11 = vadd.f32 %v8139_v34, %v1775_v40  ;;  %v1745_v57 = vmul.f32 %v6731_v36, %v1541_v26  ;;  %v1909_v63 = vadd.f32 %v8140_v47, %v1776_v28  ;;  %v7184_v40 = vld [vmem:[#allocation2 + $0x30a] sm:$0xff]  ;;  %v1977_v55 = vld [vmem:[#allocation2 + $0x182] sm:$0xff] }
 0x29b   :  { %v1910_v39 = vadd.f32 %v1846_v45, %v1777_v35  ;;  %v1911_v19 = vadd.f32 %v1847_v24, %v1778_v53  ;;  %v1876_v22 = vmul.f32 %v6774_v1, %v1541_v26  ;;  %v1807_v4 = vadd.f32 %v7067_v20, %v1674_v2  ;;  %v7188_v1 = vld [vmem:[#allocation2 + $0x322] sm:$0xff]  ;;  %v1978_v34 = vld [vmem:[#allocation2 + $0x18a] sm:$0xff] }
 0x29c   :  { %v1912_v52 = vadd.f32 %v1848_v3, %v1779_v15  ;;  %v1938_v61 = vadd.f32 %v7070_v41, %v7117_v29  ;;  %v1809_v13 = vadd.f32 %v1745_v57, %v1676_v25  ;;  %v1811_v36 = vadd.f32 %v1747_v49, %v1678_v9  ;;  %v4151_v20 = vld [vmem:[#allocation2 + $0x142] sm:$0xff]  ;;  %v4152_v29 = vld [vmem:[#allocation2 + $0x152] sm:$0xff] }
 0x29d   :  { %v1939_v14 = vadd.f32 %v7121_v62, %v1806_v27  ;;  %v1941_v54 = vadd.f32 %v7110_v44, %v1808_v30  ;;  %v1943_v15 = vadd.f32 %v1879_v58, %v1810_v60  ;;  %v2049_v41 = vmul.f32 %v4151_v20, %v6759_v48  ;;  %v8141_v2 = vld [vmem:[#allocation53_spill] sm:$0xff]  ;;  %v8142_v60 = vld [vmem:[#allocation44_spill] sm:$0xff]  ;;  %v8144_v25 = vld [vmem:[#allocation59_spill] sm:$0xff] }
 0x29e   :  { %v2050_v26 = vmul.f32 %v4152_v29, %v6759_v48  ;;  %v2051_v49 = vmul.f32 %v6759_v48, %v7172_v46  ;;  %v2052_v27 = vmul.f32 %v6759_v48, %v7178_v33  ;;  %v2053_v44 = vmul.f32 %v6759_v48, %v7180_v37  ;;  %v8143_v3 = vld [vmem:[#allocation45_spill] sm:$0xff]  ;;  %v8145_v20 = vld [vmem:[#allocation74_spill] sm:$0xff] }
 0x29f   :  { %v2081_v62 = vmul.f32 %v6759_v48, %v7073_v43  ;;  %v2082_v31 = vmul.f32 %v6759_v48, %v7059_v18  ;;  %v1940_v28 = vadd.f32 %v1876_v22, %v1807_v4  ;;  %v2083_v35 = vmul.f32 %v6759_v48, %v7184_v40 }
 0x2a0   :  { %v2084_v53 = vmul.f32 %v6759_v48, %v7186_v21  ;;  %v2085_v56 = vmul.f32 %v6759_v48, %v7188_v1  ;;  %v1942_v30 = vadd.f32 %v1878_v23, %v1809_v13  ;;  %v1944_v24 = vadd.f32 %v1880_v10, %v1811_v36  ;;  %v2014_v36 = vld [vmem:[#allocation2 + $0x33a] sm:$0xff] }
 0x2a1   :  { %v2110_v45 = vadd.f32 %v8142_v60, %v8141_v2  ;;  %v2111_v43 = vadd.f32 %v8143_v3, %v1906_v32  ;;  %v2112_v9 = vadd.f32 %v8144_v25, %v1907_v5  ;;  %v2113_v58 = vadd.f32 %v2049_v41, %v1908_v11  ;;  %v2013_v32 = vld [vmem:[#allocation2 + $0x332] sm:$0xff]  ;;  %v8146_v41 = vld [vmem:[#allocation46_spill] sm:$0xff] }
 0x2a2   :  { %v2114_v50 = vadd.f32 %v2050_v26, %v1909_v63  ;;  %v2115_v51 = vadd.f32 %v2051_v49, %v1910_v39  ;;  %v2116_v57 = vadd.f32 %v2052_v27, %v1911_v19  ;;  %v2117_v47 = vadd.f32 %v2053_v44, %v1912_v52  ;;  %v8147_v26 = vld [vmem:[#allocation60_spill] sm:$0xff]  ;;  %v8148_v27 = vld [vmem:[#allocation63_spill] sm:$0xff] }
 0x2a3   :  { %v2142_v22 = vadd.f32 %v6946_v7, %v7087_v59  ;;  %v2143_v48 = vadd.f32 %v6949_v38, %v1938_v61  ;;  %v2144_v23 = vadd.f32 %v7093_v17, %v1939_v14  ;;  %v2145_v10 = vadd.f32 %v2081_v62, %v1940_v28 }
 0x2a4   :  { %v2146_v4 = vadd.f32 %v2082_v31, %v1941_v54  ;;  %v2148_v13 = vadd.f32 %v2084_v53, %v1943_v15  ;;  %v2147_v5 = vadd.f32 %v2083_v35, %v1942_v30  ;;  %v2149_v11 = vadd.f32 %v2085_v56, %v1944_v24  ;;  %v1979_v30 = vld [vmem:[#allocation2 + $0x19a] sm:$0xff]  ;;  %v1980_v24 = vld [vmem:[#allocation2 + $0x1a2] sm:$0xff] }
 0x2a5   :  { %v2181_v63 = vmul.f32 %v4152_v29, %v6789_v16  ;;  %v2182_v39 = vmul.f32 %v6789_v16, %v7172_v46  ;;  %v2183_v19 = vmul.f32 %v6789_v16, %v7178_v33  ;;  %v2184_v7 = vmul.f32 %v6789_v16, %v7180_v37 }
 0x2a6   :  { %v2185_v38 = vmul.f32 %v6789_v16, %v1977_v55  ;;  %v2186_v17 = vmul.f32 %v6789_v16, %v1978_v34  ;;  %v2213_v59 = vmul.f32 %v6789_v16, %v7059_v18  ;;  %v2214_v52 = vmul.f32 %v6789_v16, %v7184_v40 }
 0x2a7   :  { %v2215_v61 = vmul.f32 %v6789_v16, %v7186_v21  ;;  %v2216_v14 = vmul.f32 %v6789_v16, %v7188_v1  ;;  %v2217_v54 = vmul.f32 %v6789_v16, %v2013_v32  ;;  %v2218_v15 = vmul.f32 %v6789_v16, %v2014_v36 }
 0x2a8   :  { %v2242_v29 = vadd.f32 %v8146_v41, %v8145_v20  ;;  %v2243_v49 = vadd.f32 %v8147_v26, %v2110_v45  ;;  %v2244_v18 = vadd.f32 %v8148_v27, %v2111_v43  ;;  %v2245_v44 = vadd.f32 %v2181_v63, %v2112_v9  ;;  %v8155_v41 = vld [vmem:[#allocation48_spill] sm:$0xff]  ;;  %v8156_v26 = vld [vmem:[#allocation19_spill] sm:$0xff] }
 0x2a9   :  { %v2246_v62 = vadd.f32 %v2182_v39, %v2113_v58  ;;  %v2247_v31 = vadd.f32 %v2183_v19, %v2114_v50  ;;  %v2248_v28 = vadd.f32 %v2184_v7, %v2115_v51  ;;  %v2249_v35 = vadd.f32 %v2185_v38, %v2116_v57  ;;  %v2015_v58 = vld [vmem:[#allocation2 + $0x34a] sm:$0xff]  ;;  %v2016_v50 = vld [vmem:[#allocation2 + $0x352] sm:$0xff] }
 0x2aa   :  { %v2250_v53 = vadd.f32 %v2186_v17, %v2117_v47  ;;  %v2274_v56 = vadd.f32 %v6971_v0, %v7126_v8  ;;  %v2275_v16 = vadd.f32 %v7096_v42, %v2142_v22  ;;  %v2276_v2 = vadd.f32 %v7100_v6, %v2143_v48 }
 0x2ab   :  { %v2277_v60 = vadd.f32 %v2213_v59, %v2144_v23  ;;  %v2278_v3 = vadd.f32 %v2214_v52, %v2145_v10  ;;  %v2279_v45 = vadd.f32 %v2215_v61, %v2146_v4  ;;  %v2280_v25 = vadd.f32 %v2216_v14, %v2147_v5  ;;  %v8149_v23 = vld [vmem:[#allocation64_spill] sm:$0xff]  ;;  %v8150_v4 = vld [vmem:[#allocation57_spill] sm:$0xff] }
 0x2ac   :  { %v2281_v43 = vadd.f32 %v2217_v54, %v2148_v13  ;;  %v2282_v9 = vadd.f32 %v2218_v15, %v2149_v11  ;;  %v2313_v51 = vmul.f32 %v6859_v12, %v7172_v46  ;;  %v2314_v0 = vmul.f32 %v6859_v12, %v7178_v33  ;;  %v8153_v54 = vld [vmem:[#allocation27_spill] sm:$0xff]  ;;  %v8154_v15 = vld [vmem:[#allocation78_spill] sm:$0xff] }
 0x2ad   :  { %v2315_v8 = vmul.f32 %v6859_v12, %v7180_v37  ;;  %v2316_v42 = vmul.f32 %v6859_v12, %v1977_v55  ;;  %v2317_v6 = vmul.f32 %v6859_v12, %v1978_v34  ;;  %v2318_v57 = vmul.f32 %v6859_v12, %v1979_v30  ;;  %v8158_v30 = vld [vmem:[#allocation88_spill] sm:$0xff] }
 0x2ae   :  { %v2319_v47 = vmul.f32 %v6859_v12, %v1980_v24  ;;  %v2345_v22 = vmul.f32 %v6859_v12, %v7184_v40  ;;  %v2346_v46 = vmul.f32 %v6859_v12, %v7186_v21  ;;  %v2347_v33 = vmul.f32 %v6859_v12, %v7188_v1  ;;  %v8151_v1 = vld [vmem:[#allocation9_spill] sm:$0xff] }
 0x2af   :  { %v2348_v48 = vmul.f32 %v6859_v12, %v2013_v32  ;;  %v2349_v37 = vmul.f32 %v6859_v12, %v2014_v36  ;;  %v2350_v55 = vmul.f32 %v6859_v12, %v2015_v58  ;;  %v2351_v34 = vmul.f32 %v6859_v12, %v2016_v50  ;;  %v8152_v32 = vld [vmem:[#allocation18_spill] sm:$0xff] }
 0x2b0   :  { %v2375_v10 = vadd.f32 %v8149_v23, %v2242_v29  ;;  %v2376_v13 = vadd.f32 %v8150_v4, %v2243_v49  ;;  %v2377_v5 = vadd.f32 %v2313_v51, %v2244_v18  ;;  %v2378_v40 = vadd.f32 %v2314_v0, %v2245_v44 }
 0x2b1   :  { %v2379_v11 = vadd.f32 %v2315_v8, %v2246_v62  ;;  %v2380_v63 = vadd.f32 %v2316_v42, %v2247_v31  ;;  %v2381_v21 = vadd.f32 %v2317_v6, %v2248_v28  ;;  %v2382_v39 = vadd.f32 %v2318_v57, %v2249_v35 }
 0x2b2   :  { %v2383_v19 = vadd.f32 %v2319_v47, %v2250_v53  ;;  %v2407_v7 = vadd.f32 %v8151_v1, %v2274_v56  ;;  %v2408_v38 = vadd.f32 %v8152_v32, %v2275_v16  ;;  %v2409_v36 = vadd.f32 %v2345_v22, %v2276_v2  ;;  %v8159_v16 = vld [vmem:[#allocation89_spill] sm:$0xff] }
 0x2b3   :  { %v2410_v17 = vadd.f32 %v2346_v46, %v2277_v60  ;;  %v2411_v59 = vadd.f32 %v2347_v33, %v2278_v3  ;;  %v2412_v52 = vadd.f32 %v2348_v48, %v2279_v45  ;;  %v2413_v12 = vadd.f32 %v2349_v37, %v2280_v25  ;;  %v8160_v60 = vld [vmem:[#allocation71_spill] sm:$0xff] }
 0x2b4   :  { %v2414_v61 = vadd.f32 %v2350_v55, %v2281_v43  ;;  %v2415_v14 = vadd.f32 %v2351_v34, %v2282_v9  ;;  %v7269_v20 = vadd.f32 %v8154_v15, %v8153_v54  ;;  %v7273_v29 = vadd.f32 %v8154_v15, %v8155_v41 }
 0x2b5   :  { %v7277_v49 = vadd.f32 %v8154_v15, %v8156_v26  ;;  %v7280_v27 = vadd.f32 %v8154_v15, %v2375_v10  ;;  %v7283_v18 = vadd.f32 %v8154_v15, %v2376_v13  ;;  %v7286_v44 = vadd.f32 %v8154_v15, %v2377_v5 }
 0x2b6   :  { %v7289_v62 = vadd.f32 %v8154_v15, %v2378_v40  ;;  %v7292_v31 = vadd.f32 %v8154_v15, %v2379_v11  ;;  %v7295_v28 = vadd.f32 %v8154_v15, %v2380_v63  ;;  %v7298_v35 = vadd.f32 %v8154_v15, %v2381_v21 }
 0x2b7   :  { %v7301_v53 = vadd.f32 %v8154_v15, %v2382_v39  ;;  %v7304_v56 = vadd.f32 %v8154_v15, %v2383_v19  ;;  %v7308_v24 = vadd.f32 %v8154_v15, %v8158_v30  ;;  %v7312_v2 = vadd.f32 %v8154_v15, %v8159_v16 }
 0x2b8   :  { %v7316_v3 = vadd.f32 %v8154_v15, %v8160_v60  ;;  %v7319_v45 = vadd.f32 %v8154_v15, %v2407_v7  ;;  %v7322_v25 = vadd.f32 %v8154_v15, %v2408_v38  ;;  %v7325_v43 = vadd.f32 %v8154_v15, %v2409_v36 }
 0x2b9   :  { %8157 = vst [vmem:[#allocation73_spill] sm:$0xff] %v7304_v56  ;;  %v7328_v9 = vadd.f32 %v8154_v15, %v2410_v17  ;;  %v7331_v58 = vadd.f32 %v8154_v15, %v2411_v59  ;;  %v7334_v50 = vadd.f32 %v8154_v15, %v2412_v52  ;;  %v7337_v51 = vadd.f32 %v8154_v15, %v2413_v12 }
 0x2ba   :  { %v7340_v0 = vadd.f32 %v8154_v15, %v2414_v61  ;;  %v7343_v8 = vadd.f32 %v8154_v15, %v2415_v14  ;;  %v2504_v42 = vadd.f32 3.0, %v7269_v20  ;;  %v2505_v6 = vadd.f32 3.0, %v7273_v29 }
 0x2bb   :  { %8161 = vst [vmem:[#allocation72_spill] sm:$0xff] %v7337_v51  ;;  %v2506_v57 = vadd.f32 3.0, %v7277_v49  ;;  %v2507_v47 = vadd.f32 3.0, %v7280_v27  ;;  %v2508_v22 = vadd.f32 3.0, %v7283_v18  ;;  %v2509_v46 = vadd.f32 3.0, %v7286_v44 }
 0x2bc   :  { %8162 = vst [vmem:[#allocation65_spill] sm:$0xff] %v7340_v0  ;;  %8163 = vst [vmem:[#allocation54_spill] sm:$0xff] %v7343_v8  ;;  %v2510_v33 = vadd.f32 3.0, %v7289_v62  ;;  %v2511_v48 = vadd.f32 3.0, %v7292_v31  ;;  %v2512_v37 = vadd.f32 3.0, %v7295_v28  ;;  %v2513_v55 = vadd.f32 3.0, %v7298_v35 }
 0x2bd   :  { %v2514_v34 = vadd.f32 3.0, %v7301_v53  ;;  %v2515_v23 = vadd.f32 3.0, %v7304_v56  ;;  %v2536_v10 = vadd.f32 3.0, %v7308_v24  ;;  %v2537_v4 = vadd.f32 3.0, %v7312_v2 }
 0x2be   :  { %v2538_v13 = vadd.f32 3.0, %v7316_v3  ;;  %v2539_v5 = vadd.f32 3.0, %v7319_v45  ;;  %v2540_v40 = vadd.f32 3.0, %v7322_v25  ;;  %v2541_v11 = vadd.f32 3.0, %v7325_v43 }
 0x2bf   :  { %v2542_v63 = vadd.f32 3.0, %v7328_v9  ;;  %v2543_v21 = vadd.f32 3.0, %v7331_v58  ;;  %v2544_v39 = vadd.f32 3.0, %v7334_v50  ;;  %v7367_v19 = vadd.f32 3.0, %v7337_v51 }
 0x2c0   :  { %v7370_v1 = vadd.f32 3.0, %v7340_v0  ;;  %v7373_v7 = vadd.f32 3.0, %v7343_v8  ;;  %v2568_v32 = vmax.f32 %v2504_v42, 0.0  ;;  %v2569_v38 = vmax.f32 %v2505_v6, 0.0 }
 0x2c1   :  { %v2570_v36 = vmax.f32 %v2506_v57, 0.0  ;;  %v2571_v17 = vmax.f32 %v2507_v47, 0.0  ;;  %v2572_v59 = vmax.f32 %v2508_v22, 0.0  ;;  %v2573_v52 = vmax.f32 %v2509_v46, 0.0  ;;  %v8169_v57 = vld [vmem:[#allocation22_spill] sm:$0xff] }
 0x2c2   :  { %v2574_v12 = vmax.f32 %v2510_v33, 0.0  ;;  %v2575_v61 = vmax.f32 %v2511_v48, 0.0  ;;  %v2576_v14 = vmax.f32 %v2512_v37, 0.0  ;;  %v2577_v54 = vmax.f32 %v2513_v55, 0.0  ;;  %v8164_v48 = vld [vmem:[#allocation51_spill] sm:$0xff] }
 0x2c3   :  { %v2578_v15 = vmax.f32 %v2514_v34, 0.0  ;;  %v2579_v41 = vmax.f32 %v2515_v23, 0.0  ;;  %v2600_v26 = vmax.f32 %v2536_v10, 0.0  ;;  %v2601_v30 = vmax.f32 %v2537_v4, 0.0 }
 0x2c4   :  { %v2602_v16 = vmax.f32 %v2538_v13, 0.0  ;;  %v2603_v60 = vmax.f32 %v2539_v5, 0.0  ;;  %v2604_v0 = vmax.f32 %v2540_v40, 0.0  ;;  %v2605_v51 = vmax.f32 %v2541_v11, 0.0 }
 0x2c5   :  { %v2606_v8 = vmax.f32 %v2542_v63, 0.0  ;;  %v2607_v56 = vmax.f32 %v2543_v21, 0.0  ;;  %v2608_v42 = vmax.f32 %v2544_v39, 0.0  ;;  %v2632_v22 = vmin.f32 %v2568_v32, 6.0 }
 0x2c6   :  { %v2633_v46 = vmin.f32 %v2569_v38, 6.0  ;;  %v2634_v33 = vmin.f32 %v2570_v36, 6.0  ;;  %v2695_v37 = vmul.f32 0.16666667, %v8164_v48  ;;  %v2635_v55 = vmin.f32 %v2571_v17, 6.0  ;;  %v8165_v36 = vld [vmem:[#allocation24_spill] sm:$0xff] }
 0x2c7   :  { %v2636_v34 = vmin.f32 %v2572_v59, 6.0  ;;  %v2637_v23 = vmin.f32 %v2573_v52, 6.0  ;;  %v2638_v10 = vmin.f32 %v2574_v12, 6.0  ;;  %v2639_v4 = vmin.f32 %v2575_v61, 6.0  ;;  %v8166_v17 = vld [vmem:[#allocation16_spill] sm:$0xff]  ;;  %v8167_v61 = vld [vmem:[#allocation67_spill] sm:$0xff] }
 0x2c8   :  { %v7379_v13 = vmin.f32 %v2576_v14, 6.0  ;;  %v7381_v5 = vmin.f32 %v2577_v54, 6.0  ;;  %v7383_v40 = vmin.f32 %v2578_v15, 6.0  ;;  %v7385_v11 = vmin.f32 %v2579_v41, 6.0  ;;  %v8168_v54 = vld [vmem:[#allocation23_spill] sm:$0xff] }
 0x2c9   :  { %v2664_v63 = vmin.f32 %v2600_v26, 6.0  ;;  %v2665_v21 = vmin.f32 %v2601_v30, 6.0  ;;  %v2666_v39 = vmin.f32 %v2602_v16, 6.0  ;;  %v2667_v32 = vmin.f32 %v2603_v60, 6.0  ;;  %v8170_v30 = vld [vmem:[#allocation52_spill] sm:$0xff] }
 0x2ca   :  { %v2696_v38 = vmul.f32 0.16666667, %v2632_v22  ;;  %v7388_v48 = vmul.f32 %v2695_v37, %v8165_v36  ;;  %v2835_v59 = vsel %vm858_vm1, %v8166_v17, 0.0  ;;  %v2668_v52 = vmin.f32 %v2604_v0, 6.0 }
 0x2cb   :  { %v2669_v12 = vmin.f32 %v2605_v51, 6.0  ;;  %v2727_v14 = vmul.f32 0.16666667, %v8167_v61  ;;  %v2836_v15 = vadd.f32 %v2835_v59, %v8168_v54  ;;  %v2697_v47 = vmul.f32 0.16666667, %v2633_v46  ;;  %v8171_v59 = vld [vmem:[#allocation40_spill] sm:$0xff] }
 0x2cc   :  { %v2698_v41 = vmul.f32 0.16666667, %v2634_v33  ;;  %v2837_v26 = vsel %vm858_vm1, %v8169_v57, 0.0  ;;  %v2839_v16 = vsel %vm858_vm1, %v8170_v30, 0.0  ;;  %v2670_v60 = vmin.f32 %v2606_v8, 6.0  ;;  %v8172_v57 = vld [vmem:[#allocation12_spill] sm:$0xff] }
 0x2cd   :  { %v2671_v22 = vmin.f32 %v2607_v56, 6.0  ;;  %v7398_v37 = vmin.f32 %v2608_v42, 6.0  ;;  %v2838_v36 = vadd.f32 %v2837_v26, %v2836_v15  ;;  %v2699_v6 = vmul.f32 0.16666667, %v2635_v55  ;;  %v8174_v26 = vld [vmem:[#allocation41_spill] sm:$0xff] }
 0x2ce   :  { %v2700_v0 = vmul.f32 0.16666667, %v2636_v34  ;;  %v7401_v51 = vmul.f32 %v2696_v38, %v7269_v20  ;;  %v2841_v46 = vsel %vm858_vm1, %v7388_v48, 0.0  ;;  %v2728_v33 = vmul.f32 0.16666667, %v2664_v63  ;;  %v8173_v20 = vld [vmem:[#allocation86_spill] sm:$0xff] }
 0x2cf   :  { %v7406_v61 = vmul.f32 %v2727_v14, %v8171_v59  ;;  %v2840_v54 = vadd.f32 %v2839_v16, %v2838_v36  ;;  %v2904_v8 = vsel %vm858_vm1, %v8172_v57, 0.0  ;;  %v2729_v56 = vmul.f32 0.16666667, %v2665_v21  ;;  %v8175_v14 = vld [vmem:[#allocation90_spill] sm:$0xff] }
 0x2d0   :  { %v7411_v42 = vmul.f32 %v2697_v47, %v7273_v29  ;;  %v7414_v55 = vmul.f32 %v2698_v41, %v7277_v49  ;;  %v2905_v34 = vadd.f32 %v2904_v8, %v8173_v20  ;;  %v2730_v38 = vmul.f32 0.16666667, %v2666_v39 }
 0x2d1   :  { %v2842_v15 = vadd.f32 %v2841_v46, %v2840_v54  ;;  %v2906_v63 = vsel %vm858_vm1, %v8174_v26, 0.0  ;;  %v2908_v16 = vsel %vm858_vm1, %v8175_v14, 0.0  ;;  %v2701_v36 = vmul.f32 0.16666667, %v2637_v23 }
 0x2d2   :  { %v7422_v59 = vmul.f32 %v2699_v6, %v7280_v27  ;;  %v2843_v29 = vsel %vm858_vm1, %v7401_v51, 0.0  ;;  %v2907_v47 = vadd.f32 %v2906_v63, %v2905_v34  ;;  %v2731_v49 = vmul.f32 0.16666667, %v2667_v32 }
 0x2d3   :  { %v7427_v21 = vmul.f32 %v2728_v33, %v7308_v24  ;;  %v2844_v39 = vadd.f32 %v2843_v29, %v2842_v15  ;;  %v2910_v41 = vsel %vm858_vm1, %v7406_v61, 0.0  ;;  %v2702_v46 = vmul.f32 0.16666667, %v2638_v10 }
 0x2d4   :  { %v2845_v54 = vsel %vm858_vm1, %v7411_v42, 0.0  ;;  %v2847_v27 = vsel %vm858_vm1, %v7414_v55, 0.0  ;;  %v2909_v6 = vadd.f32 %v2908_v16, %v2907_v47  ;;  %v8176_v23 = vmax.f32 %v7367_v19, 0.0 }
 0x2d5   :  { %v7438_v32 = vmul.f32 %v2729_v56, %v7312_v2  ;;  %v7441_v24 = vmul.f32 %v2730_v38, %v7316_v3  ;;  %v2846_v33 = vadd.f32 %v2845_v54, %v2844_v39  ;;  %v2703_v20 = vmul.f32 0.16666667, %v2639_v4 }
 0x2d6   :  { %v2673_v8 = vmin.f32 %v8176_v23, 6.0  ;;  %v7444_v10 = vmul.f32 %v2700_v0, %v7283_v18  ;;  %v2849_v34 = vsel %vm858_vm1, %v7422_v59, 0.0  ;;  %v2911_v15 = vadd.f32 %v2910_v41, %v2909_v6 }
 0x2d7   :  { %v2732_v63 = vmul.f32 0.16666667, %v2668_v52  ;;  %v7449_v16 = vmul.f32 %v2731_v49, %v7319_v45  ;;  %v2848_v19 = vadd.f32 %v2847_v27, %v2846_v33  ;;  %v2912_v2 = vsel %vm858_vm1, %v7427_v21, 0.0 }
 0x2d8   :  { %v2733_v56 = vmul.f32 0.16666667, %v2669_v12  ;;  %v7454_v3 = vmul.f32 %v2701_v36, %v7286_v44  ;;  %v7457_v4 = vmul.f32 %v2702_v46, %v7289_v62  ;;  %v2913_v18 = vadd.f32 %v2912_v2, %v2911_v15 }
 0x2d9   :  { %v2734_v0 = vmul.f32 0.16666667, %v2670_v60  ;;  %v2850_v38 = vadd.f32 %v2849_v34, %v2848_v19  ;;  %v2914_v52 = vsel %vm858_vm1, %v7438_v32, 0.0  ;;  %v2916_v45 = vsel %vm858_vm1, %v7441_v24, 0.0 }
 0x2da   :  { %v2704_v29 = vmul.f32 0.16666667, %v7379_v13  ;;  %v7465_v47 = vmul.f32 %v2703_v20, %v7292_v31  ;;  %v2851_v44 = vsel %vm858_vm1, %v7444_v10, 0.0  ;;  %v2915_v12 = vadd.f32 %v2914_v52, %v2913_v18 }
 0x2db   :  { %v2735_v62 = vmul.f32 0.16666667, %v2671_v22  ;;  %v7470_v36 = vmul.f32 %v2732_v63, %v7322_v25  ;;  %v2852_v60 = vadd.f32 %v2851_v44, %v2850_v38  ;;  %v2918_v49 = vsel %vm858_vm1, %v7449_v16, 0.0  ;;  %v8179_v38 = vld [vmem:[#allocation73_spill] sm:$0xff]  ;;  %v8180_v44 = vld [vmem:[#allocation72_spill] sm:$0xff] }
 0x2dc   :  { %v2705_v39 = vmul.f32 0.16666667, %v7381_v5  ;;  %v2853_v13 = vsel %vm858_vm1, %v7454_v3, 0.0  ;;  %v2855_v31 = vsel %vm858_vm1, %v7457_v4, 0.0  ;;  %v2917_v41 = vadd.f32 %v2916_v45, %v2915_v12 }
 0x2dd   :  { %v8177_v46 = vmax.f32 %v7370_v1, 0.0  ;;  %v7482_v22 = vmul.f32 %v2733_v56, %v7325_v43  ;;  %v7485_v25 = vmul.f32 %v2734_v0, %v7328_v9  ;;  %v2854_v27 = vadd.f32 %v2853_v13, %v2852_v60 }
 0x2de   :  { %v2706_v6 = vmul.f32 0.16666667, %v7383_v40  ;;  %v7489_v5 = vmul.f32 %v2704_v29, %v7295_v28  ;;  %v2857_v23 = vsel %vm858_vm1, %v7465_v47, 0.0  ;;  %v2919_v33 = vadd.f32 %v2918_v49, %v2917_v41  ;;  %v8181_v49 = vld [vmem:[#allocation65_spill] sm:$0xff] }
 0x2df   :  { %v2674_v54 = vmin.f32 %v8177_v46, 6.0  ;;  %v2736_v20 = vmul.f32 0.16666667, %v7398_v37  ;;  %v7495_v1 = vmul.f32 %v2735_v62, %v7331_v58  ;;  %v2856_v43 = vadd.f32 %v2855_v31, %v2854_v27 }
 0x2e0   :  { %v2920_v9 = vsel %vm858_vm1, %v7470_v36, 0.0  ;;  %v8178_v34 = vmax.f32 %v7373_v7, 0.0  ;;  %v2707_v40 = vmul.f32 0.16666667, %v7385_v11  ;;  %v7503_v28 = vmul.f32 %v2705_v39, %v7298_v35 }
 0x2e1   :  { %v2921_v63 = vadd.f32 %v2920_v9, %v2919_v33  ;;  %v2737_v19 = vmul.f32 0.16666667, %v2673_v8  ;;  %v2858_v2 = vadd.f32 %v2857_v23, %v2856_v43  ;;  %v2922_v37 = vsel %vm858_vm1, %v7482_v22, 0.0 }
 0x2e2   :  { %v2675_v15 = vmin.f32 %v8178_v34, 6.0  ;;  %v2924_v58 = vsel %vm858_vm1, %v7485_v25, 0.0  ;;  %v7510_v56 = vmul.f32 %v2706_v6, %v7301_v53  ;;  %v2859_v7 = vsel %vm858_vm1, %v7489_v5, 0.0 }
 0x2e3   :  { %v2923_v18 = vadd.f32 %v2922_v37, %v2921_v63  ;;  %v2738_v11 = vmul.f32 0.16666667, %v2674_v54  ;;  %v7515_v35 = vmul.f32 %v2736_v20, %v7334_v50  ;;  %v2860_v0 = vadd.f32 %v2859_v7, %v2858_v2  ;;  %v8182_v54 = vld [vmem:[#allocation54_spill] sm:$0xff] }
 0x2e4   :  { %v2926_v8 = vsel %vm858_vm1, %v7495_v1, 0.0  ;;  %v7520_v52 = vmul.f32 %v2707_v40, %v8179_v38  ;;  %v2861_v45 = vsel %vm858_vm1, %v7503_v28, 0.0  ;;  %v2739_v29 = vmul.f32 0.16666667, %v2675_v15 }
 0x2e5   :  { %v2925_v53 = vadd.f32 %v2924_v58, %v2923_v18  ;;  %v7525_v12 = vmul.f32 %v2737_v19, %v8180_v44  ;;  %v2862_v62 = vadd.f32 %v2861_v45, %v2860_v0  ;;  %v2863_v50 = vsel %vm858_vm1, %v7510_v56, 0.0  ;;  %v3836_v44 = vld [vmem:[%s7882_s5 + $0x2] ss:$0 sm:$0xff] }
 0x2e6   :  { %v7530_v39 = vmul.f32 %v2738_v11, %v8181_v49  ;;  %v2928_v31 = vsel %vm858_vm1, %v7515_v35, 0.0  ;;  %v2865_v41 = vsel %vm858_vm1, %v7520_v52, 0.0  ;;  %v7537_v27 = vmul.f32 %v2739_v29, %v8182_v54  ;;  %v3030_v29 = vld [vmem:[%s7880_s3] sm:$0xff] }
 0x2e7   :  { %v2927_v60 = vadd.f32 %v2926_v8, %v2925_v53  ;;  %v2864_v13 = vadd.f32 %v2863_v50, %v2862_v62  ;;  %v2930_v23 = vsel %vm858_vm1, %v7525_v12, 0.0  ;;  %4027 = vmatpush3.msra.mxu1 %v3030_v29 }
 0x2e8   :  { %v2932_v43 = vsel %vm858_vm1, %v7530_v39, 0.0  ;;  %v2934_v15 = vsel %vm858_vm1, %v7537_v27, 0.0 }
 0x2e9   :  { %v2929_v46 = vadd.f32 %v2928_v31, %v2927_v60  ;;  %v2866_v6 = vadd.f32 %v2865_v41, %v2864_v13  ;;  %v4114_v13 = vld [vmem:[%s7881_s4] sm:$0xff]   ;;  %v4115_v31 = vld [vmem:[%s7881_s4 + $0x8] sm:$0xff]  }
 0x2ea   :  { %4031 = vmatprep.subr.bf16.mxu1 %v4114_v13  ;;  %v3838_v41 = vld [vmem:[%s7882_s5 + $0x3] ss:$0 sm:$0xff] }
 0x2eb   :  { %v2931_v33 = vadd.f32 %v2930_v23, %v2929_v46  ;;  %v2867_v20 = vrot.slane %v2866_v6, 4  ;;  %v4271_v46 = vmov 1966171168  }
 0x2ec   :  { %v3115_v54 = vunpack.c.l.s4 %v4271_v46 }
 0x2ed   :  { %v2933_v9 = vadd.f32 %v2932_v43, %v2931_v33  ;;  %v2868_v34 = vadd.f32 %v2867_v20, %v2866_v6  ;;  %v3117_v6 = vlaneseq }
 0x2ef   :  { %v2935_v40 = vadd.f32 %v2934_v15, %v2933_v9  ;;  %v2869_v63 = vrot.slane %v2868_v34, 2  ;;  %v3116_v9 = vunpack.c.0.s8 %v3115_v54  ;;  %v8190_v54 = vld [vmem:[#allocation36_spill] sm:$0xff] }
 0x2f1   :  { %v2936_v19 = vrot.slane %v2935_v40, 4  ;;  %v2870_v2 = vadd.f32 %v2869_v63, %v2868_v34  ;;  %v7561_v34 = vshrl.u32 %v3117_v6, 7 }
 0x2f3   :  { %v2937_v37 = vadd.f32 %v2936_v19, %v2935_v40  ;;  %v2871_v58 = vrot.slane %v2870_v2, 1  ;;  %v3119_v63 = vsub.s32 %v3116_v9, %v7561_v34 }
 0x2f5   :  { %v2938_v7 = vrot.slane %v2937_v37, 2  ;;  %v2872_v11 = vadd.f32 %v2871_v58, %v2870_v2 }
 0x2f7   :  { %v2939_v18 = vadd.f32 %v2938_v7, %v2937_v37  ;;  %v2943_v38 = vmul.f32 0.00390625, %v2872_v11  ;;  %v3138_v37 = vsub.s32 0, %v7561_v34 }
 0x2f9   :  { %v2940_v0 = vrot.slane %v2939_v18, 1 }
 0x2fb   :  { %v2941_v8 = vadd.f32 %v2940_v0, %v2939_v18  ;;  %v8183_v18 = vld [vmem:[#allocation21_spill] sm:$0xff]  ;;  %v8184_v0 = vld [vmem:[#allocation26_spill] sm:$0xff] }
 0x2fd   :  { %v2944_v45 = vmul.f32 0.00390625, %v2941_v8 }
 0x2ff   :  { %v2956_v53 = vsel %vm2955_vm5, %v2944_v45, %v2943_v38  ;;  %v8185_v38 = vld [vmem:[#allocation28_spill] sm:$0xff] }
 0x300   :  { %4024 = vmatmul.mubr.msk.f32.vlgmr.msra.gmra.mrb[64].mxu0 %vm858_vm1, %v2956_v53  ;;  %v8186_v53 = vld [vmem:[#allocation29_spill] sm:$0xff] }
 0x3d3   :  { %v3025_v62 = vpop.f32.mrb[64].mxu0 }
 0x3d4   :  { %v3026_v50 = vadd.f32 %v3836_v44, %v3025_v62  ;;  %v4025_v60 = vpop.f32.mrb[65].mxu0  ;;  %v8187_v44 = vld [vmem:[#allocation30_spill] sm:$0xff] }
 0x3d6   :  { %v3029_v49 = vmax.f32 %v3026_v50, 0.0  ;;  %v8188_v50 = vld [vmem:[#allocation31_spill] sm:$0xff] }
 0x3d8   :  { %4029 = vmatmul.mubr.msk.f32.vlgmr.msra.gmra.mrb[0].mxu1 %vm3035_vm6, %v3029_v49 }
 0x3d9   :  { %4032 = vmatpush3.bf16.msra.mxu1 %v4114_v13 }
 0x3da   :  { %4033 = vmatprep.subr.bf16.mxu1 %v4115_v31 }
 0x3dd   :  { %4034 = vmatpush3.bf16.msra.mxu1 %v4115_v31 }
 0x4ab   :  { %v3105_v23 = vpop.f32.mrb[0].mxu1 }
 0x4ac   :  { %v3106_v33 = vadd.f32 %v3838_v41, %v3105_v23  ;;  %v4030_v20 = vpop.f32.mrb[1].mxu1  ;;  %v8189_v41 = vld [vmem:[#allocation32_spill] sm:$0xff]  ;;  %v8191_v23 = vld [vmem:[#allocation34_spill] sm:$0xff] }
 0x4ad   :  { %v8192_v20 = vld [vmem:[#allocation10_spill] sm:$0xff] }
 0x4ae   :  { %v3109_v43 = vadd.f32 3.0, %v3106_v33 }
 0x4b0   :  { %v3110_v15 = vmax.f32 %v3109_v43, 0.0 }
 0x4b2   :  { %v3111_v40 = vmin.f32 %v3110_v15, 6.0  ;;  %v8193_v15 = vld [vmem:[#allocation13_spill] sm:$0xff] }
 0x4b4   :  { %v3112_v19 = vmul.f32 0.16666667, %v3111_v40 }
 0x4b6   :  { %v3120_v2 = vrot.slane %v3112_v19, %v3119_v63  ;;  %v8194_v19 = vld [vmem:[#allocation37_spill] sm:$0xff] }
 0x4b8   :  { %v3128_v58 = vrot.slane %v3120_v2, %v3119_v63 }
 0x4ba   :  { %v7565_v7 = vrot.slane %v3128_v58, %v3138_v37 }
 0x4bc   :  { %v3146_v11 = vmul.f32 %v7565_v7, %v8183_v18  ;;  %v3147_v8 = vmul.f32 %v7565_v7, %v8184_v0  ;;  %v3148_v45 = vmul.f32 %v7565_v7, %v8185_v38  ;;  %v3149_v29 = vmul.f32 %v7565_v7, %v8186_v53  ;;  %v8195_v18 = vld [vmem:[#allocation38_spill] sm:$0xff]  ;;  %v8196_v0 = vld [vmem:[#allocation39_spill] sm:$0xff] }
 0x4bd   :  { %v3150_v62 = vmul.f32 %v7565_v7, %v8187_v44  ;;  %v3151_v60 = vmul.f32 %v7565_v7, %v8188_v50  ;;  %v3152_v46 = vmul.f32 %v7565_v7, %v8189_v41  ;;  %v3153_v6 = vmul.f32 %v7565_v7, %v8190_v54  ;;  %v8197_v53 = vld [vmem:[#allocation15_spill] sm:$0xff]  ;;  %v8198_v44 = vld [vmem:[#allocation20_spill] sm:$0xff] }
 0x4be   :  { %v3210_v49 = vpack.c.bf16 %v3147_v8, %v3146_v11  ;;  %v3211_v13 = vpack.c.bf16 %v3149_v29, %v3148_v45  ;;  %v3154_v33 = vmul.f32 %v7565_v7, %v8191_v23  ;;  %v3155_v43 = vmul.f32 %v7565_v7, %v8192_v20 }
 0x4bf   :  { %v3212_v31 = vpack.c.bf16 %v3151_v60, %v3150_v62  ;;  %v3213_v9 = vpack.c.bf16 %v3153_v6, %v3152_v46  ;;  %v3156_v40 = vmul.f32 %v7565_v7, %v8193_v15  ;;  %v3157_v58 = vmul.f32 %v7565_v7, %v8194_v19  ;;  %v8199_v60 = vld [vmem:[#allocation22_spill] sm:$0xff] }
 0x4c0   :  { %4035 = vmatprep.mubr.msk.bf16.mxu1 %vm858_vm1, %v3210_v49  ;;  %v3214_v34 = vpack.c.bf16 %v3155_v43, %v3154_v33  ;;  %v3158_v11 = vmul.f32 %v7565_v7, %v8195_v18  ;;  %v3159_v8 = vmul.f32 %v7565_v7, %v8196_v0  ;;  %v3160_v29 = vmul.f32 %v7565_v7, %v8197_v53  ;;  %v8204_v0 = vld [vmem:[#allocation82_spill] sm:$0xff]  ;;  %v8206_v53 = vld [vmem:[#allocation43_spill] sm:$0xff] }
 0x4c1   :  { %4036 = vmatmul.mubr.msk.bf16.vlgmr.msra.gmra.mrb[4].mxu1 %vm858_vm1, %v3211_v13  ;;  %v3215_v38 = vpack.c.bf16 %v3157_v58, %v3156_v40  ;;  %v3161_v62 = vmul.f32 %v7565_v7, %v8198_v44  ;;  %v3162_v50 = vmul.f32 %v7565_v7, %v8166_v17  ;;  %v3163_v49 = vmul.f32 %v7565_v7, %v8199_v60  ;;  %v8201_v40 = vld [vmem:[#allocation80_spill] sm:$0xff]  ;;  %v8202_v58 = vld [vmem:[#allocation42_spill] sm:$0xff]  ;;  %v8207_v44 = vld [vmem:[#allocation47_spill] sm:$0xff] }
 0x4c2   :  { %4039 = vmatprep.mubr.msk.bf16.mxu1 %vm858_vm1, %v3212_v31  ;;  %v3216_v45 = vpack.c.bf16 %v3159_v8, %v3158_v11  ;;  %v3164_v41 = vmul.f32 %v7565_v7, %v8170_v30  ;;  %v3165_v46 = vmul.f32 %v7565_v7, %v7388_v48  ;;  %v3166_v54 = vmul.f32 %v7565_v7, %v7401_v51  ;;  %v8203_v11 = vld [vmem:[#allocation81_spill] sm:$0xff] }
 0x4c3   :  { %v3217_v13 = vpack.c.bf16 %v3161_v62, %v3160_v29  ;;  %v3218_v31 = vpack.c.bf16 %v3163_v49, %v3162_v50  ;;  %v3167_v17 = vmul.f32 %v7565_v7, %v7411_v42  ;;  %v3168_v33 = vmul.f32 %v7565_v7, %v7414_v55  ;;  %v8208_v50 = vld [vmem:[#allocation84_spill] sm:$0xff]  ;;  %v8209_v49 = vld [vmem:[#allocation50_spill] sm:$0xff] }
 0x4c4   :  { %v3219_v6 = vpack.c.bf16 %v3165_v46, %v3164_v41  ;;  %v3169_v30 = vmul.f32 %v7565_v7, %v7422_v59  ;;  %v3170_v48 = vmul.f32 %v7565_v7, %v7444_v10  ;;  %v3171_v51 = vmul.f32 %v7565_v7, %v7454_v3  ;;  %v8210_v46 = vld [vmem:[#allocation58_spill] sm:$0xff] }
 0x4c5   :  { %v3220_v23 = vpack.c.bf16 %v3167_v17, %v3166_v54  ;;  %v3121_v42 = vcombine.high %v3120_v2, %v3120_v2  ;;  %v3173_v55 = vmul.f32 %v7565_v7, %v7465_v47  ;;  %v3174_v10 = vmul.f32 %v7565_v7, %v7489_v5  ;;  %v8211_v17 = vld [vmem:[#allocation85_spill] sm:$0xff] }
 0x4c6   :  { %v3221_v20 = vpack.c.bf16 %v3169_v30, %v3168_v33  ;;  %v3222_v43 = vpack.c.bf16 %v3171_v51, %v3170_v48  ;;  %v3175_v3 = vmul.f32 %v7565_v7, %v7503_v28  ;;  %v3177_v47 = vmul.f32 %v7565_v7, %v7520_v52  ;;  %v8213_v30 = vld [vmem:[#allocation62_spill] sm:$0xff] }
 0x4c7   :  { %v3135_v59 = vrot.slane %v3121_v42, %v3119_v63  ;;  %v8200_v63 = vld [vmem:[#allocation79_spill] sm:$0xff] }
 0x4c8   :  { %v3224_v15 = vpack.c.bf16 %v3175_v3, %v3174_v10  ;;  %v8214_v42 = vld [vmem:[#allocation87_spill] sm:$0xff] }
 0x4c9   :  { %4040 = vmatmul.mubr.msk.bf16.gmra.mrb[8].mxu1 %vm858_vm1, %v3213_v9  ;;  %v3172_v9 = vmul.f32 %v7565_v7, %v7457_v4  ;;  %v7640_v2 = vrot.slane %v3135_v59, %v3138_v37  ;;  %v3176_v4 = vmul.f32 %v7565_v7, %v7510_v56  ;;  %v8205_v7 = vld [vmem:[#allocation83_spill] sm:$0xff] }
 0x4ca   :  { %4043 = vmatprep.mubr.msk.bf16.mxu1 %vm858_vm1, %v3214_v34 }
 0x4cb   :  { %v3223_v34 = vpack.c.bf16 %v3173_v55, %v3172_v9  ;;  %v3178_v5 = vmul.f32 %v7640_v2, %v8200_v63  ;;  %v3179_v28 = vmul.f32 %v7640_v2, %v8201_v40  ;;  %v3225_v19 = vpack.c.bf16 %v3177_v47, %v3176_v4  ;;  %v8215_v9 = vld [vmem:[#allocation14_spill] sm:$0xff] }
 0x4cc   :  { %v3180_v18 = vmul.f32 %v7640_v2, %v8202_v58  ;;  %v3181_v56 = vmul.f32 %v7640_v2, %v8203_v11  ;;  %v3182_v52 = vmul.f32 %v7640_v2, %v8204_v0  ;;  %v3183_v8 = vmul.f32 %v7640_v2, %v8205_v7  ;;  %v4153_v0 = vld [vmem:[#allocation3 + $0x10] sm:$0xff] }
 0x4cd   :  { %v3226_v37 = vpack.c.bf16 %v3179_v28, %v3178_v5  ;;  %v3184_v29 = vmul.f32 %v7640_v2, %v8206_v53  ;;  %v3185_v62 = vmul.f32 %v7640_v2, %v8207_v44  ;;  %v3186_v60 = vmul.f32 %v7640_v2, %v8208_v50  ;;  %v4156_v53 = vld [vmem:[#allocation3 + $0x8] sm:$0xff] }
 0x4ce   :  { %v3188_v54 = vmul.f32 %v7640_v2, %v8210_v46  ;;  %v3191_v48 = vmul.f32 %v7640_v2, %v8213_v30  ;;  %v3193_v55 = vmul.f32 %v7640_v2, %v8215_v9  ;;  %v3194_v59 = vmul.f32 %v7640_v2, %v8172_v57  ;;  %v4160_v30 = vld [vmem:[#allocation3 + $0x28] sm:$0xff] }
 0x4cf   :  { %v3195_v10 = vmul.f32 %v7640_v2, %v8174_v26  ;;  %v3197_v4 = vmul.f32 %v7640_v2, %v7406_v61  ;;  %v3198_v47 = vmul.f32 %v7640_v2, %v7427_v21  ;;  %v3199_v57 = vmul.f32 %v7640_v2, %v7438_v32 }
 0x4d0   :  { %v3200_v5 = vmul.f32 %v7640_v2, %v7441_v24  ;;  %v3202_v61 = vmul.f32 %v7640_v2, %v7470_v36  ;;  %v3203_v21 = vmul.f32 %v7640_v2, %v7482_v22  ;;  %v3204_v28 = vmul.f32 %v7640_v2, %v7485_v25 }
 0x4d1   :  { %4044 = vmatmul.mubr.msk.bf16.gmra.mrb[12].mxu1 %vm858_vm1, %v3215_v38  ;;  %v3227_v38 = vpack.c.bf16 %v3181_v56, %v3180_v18  ;;  %v3236_v26 = vpack.c.bf16 %v3199_v57, %v3198_v47  ;;  %v3205_v24 = vmul.f32 %v7640_v2, %v7495_v1  ;;  %v3207_v36 = vmul.f32 %v7640_v2, %v7525_v12  ;;  %v7732_v1 = vld [vmem:[%s7882_s5 + $0x4] ss:$0 sm:$0xff]  ;;  %v4163_v47 = vld [vmem:[#allocation3 + $0x58] sm:$0xff]  ;;  %s4272_s5 = smov [#allocation6]  }
 0x4d2   :  { %4047 = vmatprep.mubr.msk.bf16.mxu1 %vm858_vm1, %v3216_v45  ;;  %v3228_v45 = vpack.c.bf16 %v3183_v8, %v3182_v52  ;;  %v3238_v32 = vpack.c.bf16 %v3203_v21, %v3202_v61  ;;  %v3209_v25 = vmul.f32 %v7640_v2, %v7537_v27  ;;  %s3780_s20 = sshll.u32 %s4272_s5, 4  ;;  %s3781_s20 = int_to_ptr.vmem [resolvable:$true] %s3780_s20 }
 0x4d3   :  { %s4239_s21 = scalar_lea.vmem %s3781_s20, 8192  ;;  %p4244_p9 = scmp.lt.s32.totalorder %s3781_s20, %s3781_s20 }
 0x4d4   :  { %p4240_p8 = scmp.ne.s32.totalorder %s3781_s20, %s4239_s21  ;;  %p4245_p10 = scmp.lt.s32.totalorder %s4239_s21, %s4239_s21 }
 0x4d6   :  { %p4246_p11 = por %p4245_p10, %p4244_p9 }
 0x4d8   :  { %p4247_p12 = pnand %p4246_p11, %p4240_p8 }
 0x4d9   :  { %4048 = vmatmul.mubr.msk.bf16.gmra.mrb[16].mxu1 %vm858_vm1, %v3217_v13  ;;  %v3187_v13 = vmul.f32 %v7640_v2, %v8209_v49 }
 0x4da   :  { %4051 = vmatprep.mubr.msk.bf16.mxu1 %vm858_vm1, %v3218_v31  ;;  %v3229_v31 = vpack.c.bf16 %v3185_v62, %v3184_v29 }
 0x4db   :  { %v3230_v41 = vpack.c.bf16 %v3187_v13, %v3186_v60  ;;  %v4157_v13 = vld [vmem:[#allocation3 + $0x30] sm:$0xff] }
 0x4e1   :  { %4052 = vmatmul.mubr.msk.bf16.gmra.mrb[20].mxu1 %vm858_vm1, %v3219_v6  ;;  %v3189_v6 = vmul.f32 %v7640_v2, %v8211_v17 }
 0x4e2   :  { %4055 = vmatprep.mubr.msk.bf16.mxu1 %vm858_vm1, %v3220_v23  ;;  %v8212_v23 = vld [vmem:[#allocation61_spill] sm:$0xff] }
 0x4e3   :  { %v3190_v33 = vmul.f32 %v7640_v2, %v8212_v23  ;;  %v3231_v51 = vpack.c.bf16 %v3189_v6, %v3188_v54  ;;  %v4158_v54 = vld [vmem:[#allocation3 + $0x20] sm:$0xff]  ;;  %v4159_v23 = vld [vmem:[#allocation3 + $0x38] sm:$0xff] }
 0x4e9   :  { %4056 = vmatmul.mubr.msk.bf16.gmra.mrb[24].mxu1 %vm858_vm1, %v3221_v20  ;;  %v3232_v20 = vpack.c.bf16 %v3191_v48, %v3190_v33 }
 0x4ea   :  { %4059 = vmatprep.mubr.msk.bf16.mxu1 %vm858_vm1, %v3222_v43  ;;  %v3192_v43 = vmul.f32 %v7640_v2, %v8214_v42 }
 0x4ec   :  { %v3233_v3 = vpack.c.bf16 %v3193_v55, %v3192_v43  ;;  %v4161_v55 = vld [vmem:[#allocation3 + $0x50] sm:$0xff] }
 0x4f1   :  { %4060 = vmatmul.mubr.msk.bf16.gmra.mrb[28].mxu1 %vm858_vm1, %v3223_v34  ;;  %v3234_v34 = vpack.c.bf16 %v3195_v10, %v3194_v59 }
 0x4f2   :  { %4063 = vmatprep.mubr.msk.bf16.mxu1 %vm858_vm1, %v3224_v15  ;;  %v3196_v15 = vmul.f32 %v7640_v2, %v8175_v14  ;;  %v3201_v14 = vmul.f32 %v7640_v2, %v7449_v16  ;;  %v3206_v16 = vmul.f32 %v7640_v2, %v7515_v35 }
 0x4f4   :  { %v3235_v63 = vpack.c.bf16 %v3197_v4, %v3196_v15  ;;  %v3237_v40 = vpack.c.bf16 %v3201_v14, %v3200_v5  ;;  %v3240_v22 = vpack.c.bf16 %v3207_v36, %v3206_v16  ;;  %v4166_v36 = vld [vmem:[#allocation3 + $0x60] sm:$0xff] }
 0x4f9   :  { %4064 = vmatmul.mubr.msk.bf16.gmra.mrb[32].mxu1 %vm858_vm1, %v3225_v19  ;;  %v3239_v19 = vpack.c.bf16 %v3205_v24, %v3204_v28 }
 0x4fa   :  { %4067 = vmatprep.mubr.msk.bf16.mxu1 %vm858_vm1, %v3226_v37  ;;  %v3208_v37 = vmul.f32 %v7640_v2, %v7530_v39  ;;  %v4154_v2 = vld [vmem:[#allocation3] sm:$0xff] }
 0x4fc   :  { %v3241_v58 = vpack.c.bf16 %v3209_v25, %v3208_v37  ;;  %v4167_v37 = vld [vmem:[#allocation3 + $0x78] sm:$0xff] }
 0x501   :  { %4068 = vmatmul.mubr.msk.bf16.gmra.mrb[36].mxu1 %vm858_vm1, %v3227_v38  ;;  %v4155_v38 = vld [vmem:[#allocation3 + $0x18] sm:$0xff] }
 0x502   :  { %4071 = vmatprep.mubr.msk.bf16.mxu1 %vm858_vm1, %v3228_v45 }
 0x509   :  { %4072 = vmatmul.mubr.msk.bf16.gmra.mrb[40].mxu1 %vm858_vm1, %v3229_v31 }
 0x50a   :  { %4075 = vmatprep.mubr.msk.bf16.mxu1 %vm858_vm1, %v3230_v41 }
 0x511   :  { %4076 = vmatmul.mubr.msk.bf16.gmra.mrb[44].mxu1 %vm858_vm1, %v3231_v51 }
 0x512   :  { %4079 = vmatprep.mubr.msk.bf16.mxu1 %vm858_vm1, %v3232_v20 }
 0x519   :  { %4080 = vmatmul.mubr.msk.bf16.gmra.mrb[48].mxu1 %vm858_vm1, %v3233_v3 }
 0x51a   :  { %4083 = vmatprep.mubr.msk.bf16.mxu1 %vm858_vm1, %v3234_v34  ;;  %v4162_v34 = vld [vmem:[#allocation3 + $0x40] sm:$0xff] }
 0x521   :  { %4084 = vmatmul.mubr.msk.bf16.gmra.mrb[52].mxu1 %vm858_vm1, %v3235_v63  ;;  %v4164_v63 = vld [vmem:[#allocation3 + $0x48] sm:$0xff] }
 0x522   :  { %4087 = vmatprep.mubr.msk.bf16.mxu1 %vm858_vm1, %v3236_v26 }
 0x529   :  { %4088 = vmatmul.mubr.msk.bf16.gmra.mrb[56].mxu1 %vm858_vm1, %v3237_v40 }
 0x52a   :  { %4091 = vmatprep.mubr.msk.bf16.mxu1 %vm858_vm1, %v3238_v32  ;;  %v4165_v32 = vld [vmem:[#allocation3 + $0x70] sm:$0xff] }
 0x531   :  { %4092 = vmatmul.mubr.msk.bf16.gmra.mrb[60].mxu1 %vm858_vm1, %v3239_v19 }
 0x532   :  { %4095 = vmatprep.mubr.msk.bf16.mxu1 %vm858_vm1, %v3240_v22 }
 0x539   :  { %4096 = vmatmul.mubr.msk.bf16.gmra.mrb[64].mxu1 %vm858_vm1, %v3241_v58  ;;  %v4168_v58 = vld [vmem:[#allocation3 + $0x68] sm:$0xff] }
 0x594   :  { %v4037_v35 = vpop.f32.mrb[4].mxu1 }
 0x595   :  { %v3401_v12 = vadd.f32 %v4037_v35, %v7732_v1  ;;  %v3392_v18 = vpop.f32.mrb[5].mxu1 }
 0x596   :  { %v3393_v11 = vadd.f32 %v7732_v1, %v3392_v18  ;;  %v4038_v56 = vpop.f32.mrb[6].mxu1 }
 0x597   :  { %v3649_v39 = vadd.f32 %v4153_v0, %v3401_v12  ;;  %v3404_v52 = vadd.f32 %v4038_v56, %v7732_v1  ;;  %v3395_v27 = vpop.f32.mrb[7].mxu1 }
 0x598   :  { %v3647_v7 = vadd.f32 %v4154_v2, %v3393_v11  ;;  %v3396_v8 = vadd.f32 %v7732_v1, %v3395_v27 }
 0x599   :  { %3713 = vst.msk [vmem:[#allocation6 + $0x10] sm:$0xff] %vm152_vm0, %v3649_v39  ;;  %v3650_v45 = vadd.f32 %v4155_v38, %v3404_v52  ;;  %v4169_v39 = vld [vmem:[#allocation3 + $0x90] sm:$0xff] }
 0x59a   :  { %3711 = vst.msk [vmem:[#allocation6] sm:$0xff] %vm152_vm0, %v3647_v7  ;;  %v3648_v29 = vadd.f32 %v4156_v53, %v3396_v8  ;;  %v4170_v7 = vld [vmem:[#allocation3 + $0x80] sm:$0xff] }
 0x59b   :  { %3714 = vst.msk [vmem:[#allocation6 + $0x18] sm:$0xff] %vm152_vm0, %v3650_v45  ;;  %v4171_v45 = vld [vmem:[#allocation3 + $0x98] sm:$0xff] }
 0x59c   :  { %3712 = vst.msk [vmem:[#allocation6 + $0x8] sm:$0xff] %vm152_vm0, %v3648_v29  ;;  %v4041_v44 = vpop.f32.mrb[8].mxu1  ;;  %v4172_v29 = vld [vmem:[#allocation3 + $0x88] sm:$0xff] }
 0x59d   :  { %v3417_v62 = vadd.f32 %v4041_v44, %v7732_v1  ;;  %v3408_v50 = vpop.f32.mrb[9].mxu1 }
 0x59e   :  { %v3409_v60 = vadd.f32 %v7732_v1, %v3408_v50  ;;  %v4042_v49 = vpop.f32.mrb[10].mxu1 }
 0x59f   :  { %v3653_v31 = vadd.f32 %v4157_v13, %v3417_v62  ;;  %v3420_v41 = vadd.f32 %v4042_v49, %v7732_v1  ;;  %v3411_v46 = vpop.f32.mrb[11].mxu1 }
 0x5a0   :  { %v3651_v17 = vadd.f32 %v4158_v54, %v3409_v60  ;;  %v3412_v6 = vadd.f32 %v7732_v1, %v3411_v46 }
 0x5a1   :  { %3717 = vst.msk [vmem:[#allocation6 + $0x30] sm:$0xff] %vm152_vm0, %v3653_v31  ;;  %v3654_v33 = vadd.f32 %v4159_v23, %v3420_v41  ;;  %v4173_v31 = vld [vmem:[#allocation3 + $0xb0] sm:$0xff] }
 0x5a2   :  { %3715 = vst.msk [vmem:[#allocation6 + $0x20] sm:$0xff] %vm152_vm0, %v3651_v17  ;;  %v3652_v48 = vadd.f32 %v4160_v30, %v3412_v6  ;;  %v4174_v17 = vld [vmem:[#allocation3 + $0xa0] sm:$0xff] }
 0x5a3   :  { %3718 = vst.msk [vmem:[#allocation6 + $0x38] sm:$0xff] %vm152_vm0, %v3654_v33  ;;  %v4175_v33 = vld [vmem:[#allocation3 + $0xb8] sm:$0xff] }
 0x5a4   :  { %3716 = vst.msk [vmem:[#allocation6 + $0x28] sm:$0xff] %vm152_vm0, %v3652_v48  ;;  %v4045_v51 = vpop.f32.mrb[12].mxu1  ;;  %v4176_v48 = vld [vmem:[#allocation3 + $0xa8] sm:$0xff] }
 0x5a5   :  { %v3433_v20 = vadd.f32 %v4045_v51, %v7732_v1  ;;  %v3424_v42 = vpop.f32.mrb[13].mxu1 }
 0x5a6   :  { %v3425_v43 = vadd.f32 %v7732_v1, %v3424_v42  ;;  %v4046_v9 = vpop.f32.mrb[14].mxu1 }
 0x5a7   :  { %v3657_v59 = vadd.f32 %v4161_v55, %v3433_v20  ;;  %v3436_v10 = vadd.f32 %v4046_v9, %v7732_v1  ;;  %v3427_v3 = vpop.f32.mrb[15].mxu1 }
 0x5a8   :  { %v3655_v15 = vadd.f32 %v4162_v34, %v3425_v43  ;;  %v3428_v4 = vadd.f32 %v7732_v1, %v3427_v3 }
 0x5a9   :  { %3721 = vst.msk [vmem:[#allocation6 + $0x50] sm:$0xff] %vm152_vm0, %v3657_v59  ;;  %v3658_v57 = vadd.f32 %v4163_v47, %v3436_v10  ;;  %v4177_v59 = vld [vmem:[#allocation3 + $0xd0] sm:$0xff] }
 0x5aa   :  { %3719 = vst.msk [vmem:[#allocation6 + $0x40] sm:$0xff] %vm152_vm0, %v3655_v15  ;;  %v3656_v26 = vadd.f32 %v4164_v63, %v3428_v4  ;;  %v4178_v15 = vld [vmem:[#allocation3 + $0xc0] sm:$0xff] }
 0x5ab   :  { %3722 = vst.msk [vmem:[#allocation6 + $0x58] sm:$0xff] %vm152_vm0, %v3658_v57  ;;  %v4179_v57 = vld [vmem:[#allocation3 + $0xd8] sm:$0xff] }
 0x5ac   :  { %3720 = vst.msk [vmem:[#allocation6 + $0x48] sm:$0xff] %vm152_vm0, %v3656_v26  ;;  %v4049_v5 = vpop.f32.mrb[16].mxu1  ;;  %v4180_v26 = vld [vmem:[#allocation3 + $0xc8] sm:$0xff] }
 0x5ad   :  { %v3449_v14 = vadd.f32 %v4049_v5, %v7732_v1  ;;  %v3440_v61 = vpop.f32.mrb[17].mxu1 }
 0x5ae   :  { %v3441_v21 = vadd.f32 %v7732_v1, %v3440_v61  ;;  %v4050_v40 = vpop.f32.mrb[18].mxu1 }
 0x5af   :  { %v3661_v28 = vadd.f32 %v4165_v32, %v3449_v14  ;;  %v3452_v24 = vadd.f32 %v4050_v40, %v7732_v1  ;;  %v3443_v16 = vpop.f32.mrb[19].mxu1 }
 0x5b0   :  { %v3659_v19 = vadd.f32 %v4166_v36, %v3441_v21  ;;  %v3444_v22 = vadd.f32 %v7732_v1, %v3443_v16 }
 0x5b1   :  { %3725 = vst.msk [vmem:[#allocation6 + $0x70] sm:$0xff] %vm152_vm0, %v3661_v28  ;;  %v3662_v25 = vadd.f32 %v4167_v37, %v3452_v24  ;;  %v4181_v28 = vld [vmem:[#allocation3 + $0xf0] sm:$0xff] }
 0x5b2   :  { %3723 = vst.msk [vmem:[#allocation6 + $0x60] sm:$0xff] %vm152_vm0, %v3659_v19  ;;  %v3660_v35 = vadd.f32 %v4168_v58, %v3444_v22  ;;  %v4182_v19 = vld [vmem:[#allocation3 + $0xe0] sm:$0xff] }
 0x5b3   :  { %3726 = vst.msk [vmem:[#allocation6 + $0x78] sm:$0xff] %vm152_vm0, %v3662_v25  ;;  %v4183_v25 = vld [vmem:[#allocation3 + $0xf8] sm:$0xff] }
 0x5b4   :  { %3724 = vst.msk [vmem:[#allocation6 + $0x68] sm:$0xff] %vm152_vm0, %v3660_v35  ;;  %v4053_v12 = vpop.f32.mrb[20].mxu1  ;;  %v4184_v35 = vld [vmem:[#allocation3 + $0xe8] sm:$0xff] }
 0x5b5   :  { %v3465_v18 = vadd.f32 %v4053_v12, %v7732_v1  ;;  %v3456_v11 = vpop.f32.mrb[21].mxu1 }
 0x5b6   :  { %v3457_v56 = vadd.f32 %v7732_v1, %v3456_v11  ;;  %v4054_v0 = vpop.f32.mrb[22].mxu1 }
 0x5b7   :  { %v3665_v52 = vadd.f32 %v4169_v39, %v3465_v18  ;;  %v3468_v27 = vadd.f32 %v4054_v0, %v7732_v1  ;;  %v3459_v2 = vpop.f32.mrb[23].mxu1 }
 0x5b8   :  { %v3663_v8 = vadd.f32 %v4170_v7, %v3457_v56  ;;  %v3460_v38 = vadd.f32 %v7732_v1, %v3459_v2 }
 0x5b9   :  { %3729 = vst.msk [vmem:[#allocation6 + $0x90] sm:$0xff] %vm152_vm0, %v3665_v52  ;;  %v3666_v53 = vadd.f32 %v4171_v45, %v3468_v27  ;;  %v4185_v52 = vld [vmem:[#allocation3 + $0x110] sm:$0xff] }
 0x5ba   :  { %3727 = vst.msk [vmem:[#allocation6 + $0x80] sm:$0xff] %vm152_vm0, %v3663_v8  ;;  %v3664_v44 = vadd.f32 %v4172_v29, %v3460_v38  ;;  %v4186_v8 = vld [vmem:[#allocation3 + $0x100] sm:$0xff] }
 0x5bb   :  { %3730 = vst.msk [vmem:[#allocation6 + $0x98] sm:$0xff] %vm152_vm0, %v3666_v53  ;;  %v4187_v53 = vld [vmem:[#allocation3 + $0x118] sm:$0xff] }
 0x5bc   :  { %3728 = vst.msk [vmem:[#allocation6 + $0x88] sm:$0xff] %vm152_vm0, %v3664_v44  ;;  %v4057_v62 = vpop.f32.mrb[24].mxu1  ;;  %v4188_v44 = vld [vmem:[#allocation3 + $0x108] sm:$0xff] }
 0x5bd   :  { %v3481_v50 = vadd.f32 %v4057_v62, %v7732_v1  ;;  %v3472_v60 = vpop.f32.mrb[25].mxu1 }
 0x5be   :  { %v3473_v49 = vadd.f32 %v7732_v1, %v3472_v60  ;;  %v4058_v13 = vpop.f32.mrb[26].mxu1 }
 0x5bf   :  { %v3669_v41 = vadd.f32 %v4173_v31, %v3481_v50  ;;  %v3484_v46 = vadd.f32 %v4058_v13, %v7732_v1  ;;  %v3475_v54 = vpop.f32.mrb[27].mxu1 }
 0x5c0   :  { %v3667_v6 = vadd.f32 %v4174_v17, %v3473_v49  ;;  %v3476_v23 = vadd.f32 %v7732_v1, %v3475_v54 }
 0x5c1   :  { %3733 = vst.msk [vmem:[#allocation6 + $0xb0] sm:$0xff] %vm152_vm0, %v3669_v41  ;;  %v3670_v30 = vadd.f32 %v4175_v33, %v3484_v46  ;;  %v4189_v41 = vld [vmem:[#allocation3 + $0x130] sm:$0xff] }
 0x5c2   :  { %3731 = vst.msk [vmem:[#allocation6 + $0xa0] sm:$0xff] %vm152_vm0, %v3667_v6  ;;  %v3668_v51 = vadd.f32 %v4176_v48, %v3476_v23  ;;  %v4190_v6 = vld [vmem:[#allocation3 + $0x120] sm:$0xff] }
 0x5c3   :  { %3734 = vst.msk [vmem:[#allocation6 + $0xb8] sm:$0xff] %vm152_vm0, %v3670_v30  ;;  %v4191_v30 = vld [vmem:[#allocation3 + $0x138] sm:$0xff] }
 0x5c4   :  { %3732 = vst.msk [vmem:[#allocation6 + $0xa8] sm:$0xff] %vm152_vm0, %v3668_v51  ;;  %v4061_v20 = vpop.f32.mrb[28].mxu1  ;;  %v4192_v51 = vld [vmem:[#allocation3 + $0x128] sm:$0xff] }
 0x5c5   :  { %v3497_v42 = vadd.f32 %v4061_v20, %v7732_v1  ;;  %v3488_v43 = vpop.f32.mrb[29].mxu1 }
 0x5c6   :  { %v3489_v9 = vadd.f32 %v7732_v1, %v3488_v43  ;;  %v4062_v55 = vpop.f32.mrb[30].mxu1 }
 0x5c7   :  { %v3673_v10 = vadd.f32 %v4177_v59, %v3497_v42  ;;  %v3500_v3 = vadd.f32 %v4062_v55, %v7732_v1  ;;  %v3491_v34 = vpop.f32.mrb[31].mxu1 }
 0x5c8   :  { %v3671_v4 = vadd.f32 %v4178_v15, %v3489_v9  ;;  %v3492_v47 = vadd.f32 %v7732_v1, %v3491_v34 }
 0x5c9   :  { %3737 = vst.msk [vmem:[#allocation6 + $0xd0] sm:$0xff] %vm152_vm0, %v3673_v10  ;;  %v3674_v63 = vadd.f32 %v4179_v57, %v3500_v3  ;;  %v4193_v10 = vld [vmem:[#allocation3 + $0x150] sm:$0xff] }
 0x5ca   :  { %3735 = vst.msk [vmem:[#allocation6 + $0xc0] sm:$0xff] %vm152_vm0, %v3671_v4  ;;  %v3672_v5 = vadd.f32 %v4180_v26, %v3492_v47  ;;  %v4194_v4 = vld [vmem:[#allocation3 + $0x140] sm:$0xff] }
 0x5cb   :  { %3738 = vst.msk [vmem:[#allocation6 + $0xd8] sm:$0xff] %vm152_vm0, %v3674_v63  ;;  %v4195_v63 = vld [vmem:[#allocation3 + $0x158] sm:$0xff] }
 0x5cc   :  { %3736 = vst.msk [vmem:[#allocation6 + $0xc8] sm:$0xff] %vm152_vm0, %v3672_v5  ;;  %v4065_v14 = vpop.f32.mrb[32].mxu1  ;;  %v4196_v5 = vld [vmem:[#allocation3 + $0x148] sm:$0xff] }
 0x5cd   :  { %v3513_v61 = vadd.f32 %v4065_v14, %v7732_v1  ;;  %v3504_v21 = vpop.f32.mrb[33].mxu1 }
 0x5ce   :  { %v3505_v40 = vadd.f32 %v7732_v1, %v3504_v21  ;;  %v4066_v32 = vpop.f32.mrb[34].mxu1 }
 0x5cf   :  { %v3677_v24 = vadd.f32 %v4181_v28, %v3513_v61  ;;  %v3516_v16 = vadd.f32 %v4066_v32, %v7732_v1  ;;  %v3507_v36 = vpop.f32.mrb[35].mxu1 }
 0x5d0   :  { %v3675_v22 = vadd.f32 %v4182_v19, %v3505_v40  ;;  %v3508_v37 = vadd.f32 %v7732_v1, %v3507_v36 }
 0x5d1   :  { %3741 = vst.msk [vmem:[#allocation6 + $0xf0] sm:$0xff] %vm152_vm0, %v3677_v24  ;;  %v3678_v58 = vadd.f32 %v4183_v25, %v3516_v16  ;;  %v4197_v24 = vld [vmem:[#allocation3 + $0x170] sm:$0xff] }
 0x5d2   :  { %3739 = vst.msk [vmem:[#allocation6 + $0xe0] sm:$0xff] %vm152_vm0, %v3675_v22  ;;  %v3676_v12 = vadd.f32 %v4184_v35, %v3508_v37  ;;  %v4198_v22 = vld [vmem:[#allocation3 + $0x160] sm:$0xff] }
 0x5d3   :  { %3742 = vst.msk [vmem:[#allocation6 + $0xf8] sm:$0xff] %vm152_vm0, %v3678_v58  ;;  %v4199_v58 = vld [vmem:[#allocation3 + $0x178] sm:$0xff] }
 0x5d4   :  { %3740 = vst.msk [vmem:[#allocation6 + $0xe8] sm:$0xff] %vm152_vm0, %v3676_v12  ;;  %v4069_v18 = vpop.f32.mrb[36].mxu1  ;;  %v4200_v12 = vld [vmem:[#allocation3 + $0x168] sm:$0xff] }
 0x5d5   :  { %v3529_v11 = vadd.f32 %v4069_v18, %v7732_v1  ;;  %v3520_v56 = vpop.f32.mrb[37].mxu1 }
 0x5d6   :  { %v3521_v0 = vadd.f32 %v7732_v1, %v3520_v56  ;;  %v4070_v39 = vpop.f32.mrb[38].mxu1 }
 0x5d7   :  { %v3681_v27 = vadd.f32 %v4185_v52, %v3529_v11  ;;  %v3532_v2 = vadd.f32 %v4070_v39, %v7732_v1  ;;  %v3523_v7 = vpop.f32.mrb[39].mxu1 }
 0x5d8   :  { %v3679_v38 = vadd.f32 %v4186_v8, %v3521_v0  ;;  %v3524_v45 = vadd.f32 %v7732_v1, %v3523_v7 }
 0x5d9   :  { %3745 = vst.msk [vmem:[#allocation6 + $0x110] sm:$0xff] %vm152_vm0, %v3681_v27  ;;  %v3682_v29 = vadd.f32 %v4187_v53, %v3532_v2  ;;  %v4201_v27 = vld [vmem:[#allocation3 + $0x190] sm:$0xff] }
 0x5da   :  { %3743 = vst.msk [vmem:[#allocation6 + $0x100] sm:$0xff] %vm152_vm0, %v3679_v38  ;;  %v3680_v62 = vadd.f32 %v4188_v44, %v3524_v45  ;;  %v4202_v38 = vld [vmem:[#allocation3 + $0x180] sm:$0xff] }
 0x5db   :  { %3746 = vst.msk [vmem:[#allocation6 + $0x118] sm:$0xff] %vm152_vm0, %v3682_v29  ;;  %v4203_v29 = vld [vmem:[#allocation3 + $0x198] sm:$0xff] }
 0x5dc   :  { %3744 = vst.msk [vmem:[#allocation6 + $0x108] sm:$0xff] %vm152_vm0, %v3680_v62  ;;  %v4073_v50 = vpop.f32.mrb[40].mxu1  ;;  %v4204_v62 = vld [vmem:[#allocation3 + $0x188] sm:$0xff] }
 0x5dd   :  { %v3545_v60 = vadd.f32 %v4073_v50, %v7732_v1  ;;  %v3536_v49 = vpop.f32.mrb[41].mxu1 }
 0x5de   :  { %v3537_v13 = vadd.f32 %v7732_v1, %v3536_v49  ;;  %v4074_v31 = vpop.f32.mrb[42].mxu1 }
 0x5df   :  { %v3685_v46 = vadd.f32 %v4189_v41, %v3545_v60  ;;  %v3548_v54 = vadd.f32 %v4074_v31, %v7732_v1  ;;  %v3539_v17 = vpop.f32.mrb[43].mxu1 }
 0x5e0   :  { %v3683_v23 = vadd.f32 %v4190_v6, %v3537_v13  ;;  %v3540_v33 = vadd.f32 %v7732_v1, %v3539_v17 }
 0x5e1   :  { %3749 = vst.msk [vmem:[#allocation6 + $0x130] sm:$0xff] %vm152_vm0, %v3685_v46  ;;  %v3686_v48 = vadd.f32 %v4191_v30, %v3548_v54  ;;  %v4205_v46 = vld [vmem:[#allocation3 + $0x1b0] sm:$0xff] }
 0x5e2   :  { %3747 = vst.msk [vmem:[#allocation6 + $0x120] sm:$0xff] %vm152_vm0, %v3683_v23  ;;  %v3684_v20 = vadd.f32 %v4192_v51, %v3540_v33  ;;  %v4206_v23 = vld [vmem:[#allocation3 + $0x1a0] sm:$0xff] }
 0x5e3   :  { %3750 = vst.msk [vmem:[#allocation6 + $0x138] sm:$0xff] %vm152_vm0, %v3686_v48  ;;  %v4207_v48 = vld [vmem:[#allocation3 + $0x1b8] sm:$0xff] }
 0x5e4   :  { %3748 = vst.msk [vmem:[#allocation6 + $0x128] sm:$0xff] %vm152_vm0, %v3684_v20  ;;  %v4077_v42 = vpop.f32.mrb[44].mxu1  ;;  %v4208_v20 = vld [vmem:[#allocation3 + $0x1a8] sm:$0xff] }
 0x5e5   :  { %v3561_v43 = vadd.f32 %v4077_v42, %v7732_v1  ;;  %v3552_v9 = vpop.f32.mrb[45].mxu1 }
 0x5e6   :  { %v3553_v55 = vadd.f32 %v7732_v1, %v3552_v9  ;;  %v4078_v59 = vpop.f32.mrb[46].mxu1 }
 0x5e7   :  { %v3689_v3 = vadd.f32 %v4193_v10, %v3561_v43  ;;  %v3564_v34 = vadd.f32 %v4078_v59, %v7732_v1  ;;  %v3555_v15 = vpop.f32.mrb[47].mxu1 }
 0x5e8   :  { %v3687_v47 = vadd.f32 %v4194_v4, %v3553_v55  ;;  %v3556_v57 = vadd.f32 %v7732_v1, %v3555_v15 }
 0x5e9   :  { %3753 = vst.msk [vmem:[#allocation6 + $0x150] sm:$0xff] %vm152_vm0, %v3689_v3  ;;  %v3690_v26 = vadd.f32 %v4195_v63, %v3564_v34  ;;  %v4209_v3 = vld [vmem:[#allocation3 + $0x1d0] sm:$0xff] }
 0x5ea   :  { %3751 = vst.msk [vmem:[#allocation6 + $0x140] sm:$0xff] %vm152_vm0, %v3687_v47  ;;  %v3688_v14 = vadd.f32 %v4196_v5, %v3556_v57  ;;  %v4210_v47 = vld [vmem:[#allocation3 + $0x1c0] sm:$0xff] }
 0x5eb   :  { %3754 = vst.msk [vmem:[#allocation6 + $0x158] sm:$0xff] %vm152_vm0, %v3690_v26  ;;  %v4211_v26 = vld [vmem:[#allocation3 + $0x1d8] sm:$0xff] }
 0x5ec   :  { %3752 = vst.msk [vmem:[#allocation6 + $0x148] sm:$0xff] %vm152_vm0, %v3688_v14  ;;  %v4081_v61 = vpop.f32.mrb[48].mxu1  ;;  %v4212_v14 = vld [vmem:[#allocation3 + $0x1c8] sm:$0xff] }
 0x5ed   :  { %v3577_v21 = vadd.f32 %v4081_v61, %v7732_v1  ;;  %v3568_v40 = vpop.f32.mrb[49].mxu1 }
 0x5ee   :  { %v3569_v32 = vadd.f32 %v7732_v1, %v3568_v40  ;;  %v4082_v28 = vpop.f32.mrb[50].mxu1 }
 0x5ef   :  { %v3693_v16 = vadd.f32 %v4197_v24, %v3577_v21  ;;  %v3580_v36 = vadd.f32 %v4082_v28, %v7732_v1  ;;  %v3571_v19 = vpop.f32.mrb[51].mxu1 }
 0x5f0   :  { %v3691_v37 = vadd.f32 %v4198_v22, %v3569_v32  ;;  %v3572_v25 = vadd.f32 %v7732_v1, %v3571_v19 }
 0x5f1   :  { %3757 = vst.msk [vmem:[#allocation6 + $0x170] sm:$0xff] %vm152_vm0, %v3693_v16  ;;  %v3694_v35 = vadd.f32 %v4199_v58, %v3580_v36  ;;  %v4213_v16 = vld [vmem:[#allocation3 + $0x1f0] sm:$0xff] }
 0x5f2   :  { %3755 = vst.msk [vmem:[#allocation6 + $0x160] sm:$0xff] %vm152_vm0, %v3691_v37  ;;  %v3692_v18 = vadd.f32 %v4200_v12, %v3572_v25  ;;  %v4214_v37 = vld [vmem:[#allocation3 + $0x1e0] sm:$0xff] }
 0x5f3   :  { %3758 = vst.msk [vmem:[#allocation6 + $0x178] sm:$0xff] %vm152_vm0, %v3694_v35  ;;  %v4215_v35 = vld [vmem:[#allocation3 + $0x1f8] sm:$0xff] }
 0x5f4   :  { %3756 = vst.msk [vmem:[#allocation6 + $0x168] sm:$0xff] %vm152_vm0, %v3692_v18  ;;  %v4085_v11 = vpop.f32.mrb[52].mxu1  ;;  %v4216_v18 = vld [vmem:[#allocation3 + $0x1e8] sm:$0xff] }
 0x5f5   :  { %v3593_v56 = vadd.f32 %v4085_v11, %v7732_v1  ;;  %v3584_v0 = vpop.f32.mrb[53].mxu1 }
 0x5f6   :  { %v3585_v39 = vadd.f32 %v7732_v1, %v3584_v0  ;;  %v4086_v52 = vpop.f32.mrb[54].mxu1 }
 0x5f7   :  { %v3697_v2 = vadd.f32 %v4201_v27, %v3593_v56  ;;  %v3596_v7 = vadd.f32 %v4086_v52, %v7732_v1  ;;  %v3587_v8 = vpop.f32.mrb[55].mxu1 }
 0x5f8   :  { %v3695_v45 = vadd.f32 %v4202_v38, %v3585_v39  ;;  %v3588_v53 = vadd.f32 %v7732_v1, %v3587_v8 }
 0x5f9   :  { %3761 = vst.msk [vmem:[#allocation6 + $0x190] sm:$0xff] %vm152_vm0, %v3697_v2  ;;  %v3698_v44 = vadd.f32 %v4203_v29, %v3596_v7 }
 0x5fa   :  { %3759 = vst.msk [vmem:[#allocation6 + $0x180] sm:$0xff] %vm152_vm0, %v3695_v45  ;;  %v3696_v50 = vadd.f32 %v4204_v62, %v3588_v53 }
 0x5fb   :  { %3762 = vst.msk [vmem:[#allocation6 + $0x198] sm:$0xff] %vm152_vm0, %v3698_v44 }
 0x5fc   :  { %3760 = vst.msk [vmem:[#allocation6 + $0x188] sm:$0xff] %vm152_vm0, %v3696_v50  ;;  %v4089_v60 = vpop.f32.mrb[56].mxu1 }
 0x5fd   :  { %v3609_v49 = vadd.f32 %v4089_v60, %v7732_v1  ;;  %v3600_v13 = vpop.f32.mrb[57].mxu1 }
 0x5fe   :  { %v3601_v31 = vadd.f32 %v7732_v1, %v3600_v13  ;;  %v4090_v41 = vpop.f32.mrb[58].mxu1 }
 0x5ff   :  { %v3701_v54 = vadd.f32 %v4205_v46, %v3609_v49  ;;  %v3612_v17 = vadd.f32 %v4090_v41, %v7732_v1  ;;  %v3603_v6 = vpop.f32.mrb[59].mxu1 }
 0x600   :  { %v3699_v33 = vadd.f32 %v4206_v23, %v3601_v31  ;;  %v3604_v30 = vadd.f32 %v7732_v1, %v3603_v6 }
 0x601   :  { %3765 = vst.msk [vmem:[#allocation6 + $0x1b0] sm:$0xff] %vm152_vm0, %v3701_v54  ;;  %v3702_v51 = vadd.f32 %v4207_v48, %v3612_v17 }
 0x602   :  { %3763 = vst.msk [vmem:[#allocation6 + $0x1a0] sm:$0xff] %vm152_vm0, %v3699_v33  ;;  %v3700_v42 = vadd.f32 %v4208_v20, %v3604_v30 }
 0x603   :  { %3766 = vst.msk [vmem:[#allocation6 + $0x1b8] sm:$0xff] %vm152_vm0, %v3702_v51 }
 0x604   :  { %3764 = vst.msk [vmem:[#allocation6 + $0x1a8] sm:$0xff] %vm152_vm0, %v3700_v42  ;;  %v4093_v43 = vpop.f32.mrb[60].mxu1 }
 0x605   :  { %v3625_v9 = vadd.f32 %v4093_v43, %v7732_v1  ;;  %v3616_v55 = vpop.f32.mrb[61].mxu1 }
 0x606   :  { %v3617_v59 = vadd.f32 %v7732_v1, %v3616_v55  ;;  %v4094_v10 = vpop.f32.mrb[62].mxu1 }
 0x607   :  { %v3705_v34 = vadd.f32 %v4209_v3, %v3625_v9  ;;  %v3628_v15 = vadd.f32 %v4094_v10, %v7732_v1  ;;  %v3619_v4 = vpop.f32.mrb[63].mxu1 }
 0x608   :  { %v3703_v57 = vadd.f32 %v4210_v47, %v3617_v59  ;;  %v3620_v63 = vadd.f32 %v7732_v1, %v3619_v4 }
 0x609   :  { %3769 = vst.msk [vmem:[#allocation6 + $0x1d0] sm:$0xff] %vm152_vm0, %v3705_v34  ;;  %v3706_v5 = vadd.f32 %v4211_v26, %v3628_v15 }
 0x60a   :  { %3767 = vst.msk [vmem:[#allocation6 + $0x1c0] sm:$0xff] %vm152_vm0, %v3703_v57  ;;  %v3704_v61 = vadd.f32 %v4212_v14, %v3620_v63 }
 0x60b   :  { %3770 = vst.msk [vmem:[#allocation6 + $0x1d8] sm:$0xff] %vm152_vm0, %v3706_v5 }
 0x60c   :  { %3768 = vst.msk [vmem:[#allocation6 + $0x1c8] sm:$0xff] %vm152_vm0, %v3704_v61  ;;  %v4097_v21 = vpop.f32.mrb[64].mxu1 }
 0x60d   :  { %v3641_v40 = vadd.f32 %v4097_v21, %v7732_v1  ;;  %v3632_v32 = vpop.f32.mrb[65].mxu1 }
 0x60e   :  { %v3633_v28 = vadd.f32 %v7732_v1, %v3632_v32  ;;  %v4098_v24 = vpop.f32.mrb[66].mxu1 }
 0x60f   :  { %v3709_v36 = vadd.f32 %v4213_v16, %v3641_v40  ;;  %v3644_v19 = vadd.f32 %v4098_v24, %v7732_v1  ;;  %v3635_v22 = vpop.f32.mrb[67].mxu1 }
 0x610   :  { %v3707_v25 = vadd.f32 %v4214_v37, %v3633_v28  ;;  %v3636_v58 = vadd.f32 %v7732_v1, %v3635_v22 }
 0x611   :  { %3773 = vst.msk [vmem:[#allocation6 + $0x1f0] sm:$0xff] %vm152_vm0, %v3709_v36  ;;  %v3710_v12 = vadd.f32 %v4215_v35, %v3644_v19 }
 0x612   :  { %3771 = vst.msk [vmem:[#allocation6 + $0x1e0] sm:$0xff] %vm152_vm0, %v3707_v25  ;;  %v3708_v11 = vadd.f32 %v4216_v18, %v3636_v58 }
 0x613   :  { %3774 = vst.msk [vmem:[#allocation6 + $0x1f8] sm:$0xff] %vm152_vm0, %v3710_v12 }
 0x614   :  { %3772 = vst.msk [vmem:[#allocation6 + $0x1e8] sm:$0xff] %vm152_vm0, %v3708_v11 }
 0x615   :  { %4250 = shalt.err (!%p4247_p12)
}
 0x616   :  { %s4251_s24 = scalar_lea.hbm %s7883_s6, 8192 }
 0x617   :  { %p4252_p13 = scmp.ne.s32.totalorder %s7883_s6, %s4251_s24  ;;  %p4255_p0 = scmp.lt.u32.totalorder %s4251_s24, %s7883_s6 }
 0x619   :  { %p4257_p1 = pnand %p4255_p0, %p4252_p13 }
 0x61b   :  { %4260 = shalt.err (!%p4257_p1)
}
 0x61c   :  { %3786 = dma.vmem_to_hbm [thread:$0]  %s3781_s20, 8192, %s7883_s6, [#allocation5], %s4266_s7, %s4266_s7, %s4267_s8  }
 0x61d   :  { %4263 = dma.done.wait [#allocation5], 8192  }
 0x61e   :  { %4264 = vsyncadd [#allocation5], 4294959104 }
 0x61f   :  { %3790 = vsyncpa [#allocation4], 1 }
 0x620   :  { %3791 = vsyncpa [#allocation5], 1 }

</bundles_post_ra>
